<compile_context>
chip_gen: v6e
topology: v6e:2x2x1
jax: 0.10.0
libtpu: 0.0.40
codegen_flags: <defaults>
</compile_context>

<pallas_src>
import functools

import jax
import jax.numpy as jnp
from jax import lax
from jax.experimental import pallas as pl
from jax.experimental.pallas import tpu as pltpu

EPS = 1e-5


# --------------------------------------------------------------------------
# VMEM-aware tiling helpers.
# --------------------------------------------------------------------------
def _vmem_cap():
    try:
        info = pltpu.get_tpu_info()
        return int(getattr(info, "vmem_capacity_bytes", 128 * 1024 * 1024))
    except Exception:
        return 128 * 1024 * 1024


_VMEM_CAP = _vmem_cap()
_BIG_VMEM = _VMEM_CAP >= 96 * 1024 * 1024          # v5e/v6e: 128 MiB, v7x: 64 MiB
_VMEM_LIMIT = int(min(int(0.8 * _VMEM_CAP), 100 * 1024 * 1024))


def _cp(sem):
    return pltpu.CompilerParams(dimension_semantics=sem,
                                vmem_limit_bytes=_VMEM_LIMIT)


def _row_tile(n, cap=None):
    """Sublane-axis tile: multiple of 16 (bf16-safe) dividing n, else full n."""
    cap = cap if cap is not None else (512 if _BIG_VMEM else 256)
    for t in (1024, 512, 256, 128, 64, 32, 16):
        if t <= cap and n % t == 0:
            return t
    return n                                         # full extent is always legal


def _lane_tile(n, cap=None):
    """Lane-axis tile: multiple of 128 dividing n, else full n."""
    cap = cap if cap is not None else (512 if _BIG_VMEM else 256)
    for t in (1024, 512, 256, 128):
        if t <= cap and n % t == 0:
            return t
    return n


# --------------------------------------------------------------------------
# Kernel 1: per-batch degree prepass (hoisted out of the pdist tile loop).
#   xn = x/(||x||+eps);  D_j = ((sum_i xn_i).xn_j - 1)/N;  deg = relu(tanh(D))
#   csq_j = ||x_j||^2 + deg_j^2    (squared norm of the 129-dim knn feature)
#   output srow[b, j] = [deg_j, csq_j]
# --------------------------------------------------------------------------
def deg_prepass_kernel(x_ref, srow_ref):
    x = x_ref[0]                                          # (N, C)
    n = x.shape[0]
    sq = jnp.sum(x * x, axis=-1, keepdims=True)           # (N, 1)
    xn = x / (jnp.sqrt(sq) + EPS)
    s = jnp.sum(xn, axis=0, keepdims=True)                # (1, C)
    d = (jnp.sum(xn * s, axis=-1, keepdims=True) - 1.0) / float(n)
    deg = jnp.maximum(jnp.tanh(d), 0.0)                   # (N, 1)
    csq = sq + deg * deg                                  # (N, 1)
    srow_ref[0, :, 0:1] = deg
    srow_ref[0, :, 1:2] = csq


def deg_prepass(xb):
    B, N, C = xb.shape
    return pl.pallas_call(
        deg_prepass_kernel,
        out_shape=jax.ShapeDtypeStruct((B, N, 2), jnp.float32),
        grid=(B,),
        in_specs=[pl.BlockSpec((1, N, C), lambda b: (b, 0, 0))],
        out_specs=pl.BlockSpec((1, N, 2), lambda b: (b, 0, 0)),
        compiler_params=_cp(("parallel",)),
    )(xb)


# --------------------------------------------------------------------------
# Kernel 2: knn pairwise distance, tiled over rows AND columns (bf16 MXU).
#   p_ij = 2(x_i.x_j + deg_i deg_j) - csq_i - csq_j
# --------------------------------------------------------------------------
def pdist_kernel(xr_ref, xc_ref, sr_ref, sc_ref, p_ref):
    xr = xr_ref[0].astype(jnp.bfloat16)                   # (tn, C)
    xc = xc_ref[0].astype(jnp.bfloat16)                   # (tc, C)
    g = lax.dot_general(xr, xc, (((1,), (1,)), ((), ())),
                        preferred_element_type=jnp.float32)      # (tn, tc)
    sr = sr_ref[0]                                        # (tn, 2)
    sc = sc_ref[0]                                        # (2, tc)
    deg_r, rsq = sr[:, 0:1], sr[:, 1:2]                   # (tn, 1)
    deg_c, csq = sc[0:1, :], sc[1:2, :]                   # (1, tc)
    p_ref[0] = 2.0 * (g + deg_r * deg_c) - rsq - csq


def pdist(xb, srow, scol):
    B, N, C = xb.shape
    tn = _row_tile(N)
    tc = _lane_tile(N)
    return pl.pallas_call(
        pdist_kernel,
        out_shape=jax.ShapeDtypeStruct((B, N, N), jnp.float32),
        grid=(B, N // tn, N // tc),
        in_specs=[pl.BlockSpec((1, tn, C), lambda b, i, j: (b, i, 0)),
                  pl.BlockSpec((1, tc, C), lambda b, i, j: (b, j, 0)),
                  pl.BlockSpec((1, tn, 2), lambda b, i, j: (b, i, 0)),
                  pl.BlockSpec((1, 2, tc), lambda b, i, j: (b, 0, j))],
        out_specs=pl.BlockSpec((1, tn, tc), lambda b, i, j: (b, i, j)),
        compiler_params=_cp(("parallel", "parallel", "parallel")),
    )(xb, xb, srow, scol)


# --------------------------------------------------------------------------
# Kernel 3: per-point linears for conv0 (projection commutes with gather).
#   cen  = x @ (Wa+Wb)_x^T + deg*(wa_d+wb_d) + bias     (f32, center term)
#   proj = x @ Wb_x^T      + deg* wb_d                  (bf16, gathered later)
# --------------------------------------------------------------------------
def point_linear_kernel(x_ref, sr_ref, wabT_ref, wabd_ref, b_ref, wbT_ref,
                        wbd_ref, cen_ref, proj_ref):
    x = x_ref[...].astype(jnp.bfloat16)                   # (tp, C)
    d = sr_ref[:, 0:1]                                    # (tp, 1)  degree
    cen = jnp.dot(x, wabT_ref[...], preferred_element_type=jnp.float32)
    cen_ref[...] = cen + d * wabd_ref[...] + b_ref[...]
    proj = jnp.dot(x, wbT_ref[...], preferred_element_type=jnp.float32)
    proj_ref[...] = (proj + d * wbd_ref[...]).astype(jnp.bfloat16)


def point_linear(x_p, srow_p, wabT, wab_d, bias0, wbT, wb_d):
    P, C = x_p.shape
    Cout = wabT.shape[1]
    tp = _row_tile(P)
    row = lambda i: (i, 0)
    full = lambda i: (0, 0)
    return pl.pallas_call(
        point_linear_kernel,
        out_shape=(jax.ShapeDtypeStruct((P, Cout), jnp.float32),
                   jax.ShapeDtypeStruct((P, Cout), jnp.bfloat16)),
        grid=(P // tp,),
        in_specs=[pl.BlockSpec((tp, C), row),
                  pl.BlockSpec((tp, 2), row),
                  pl.BlockSpec((C, Cout), full),
                  pl.BlockSpec((1, Cout), full),
                  pl.BlockSpec((1, Cout), full),
                  pl.BlockSpec((C, Cout), full),
                  pl.BlockSpec((1, Cout), full)],
        out_specs=(pl.BlockSpec((tp, Cout), row),
                   pl.BlockSpec((tp, Cout), row)),
        compiler_params=_cp(("parallel",)),
    )(x_p, srow_p, wabT, wab_d, bias0, wbT, wb_d)


# --------------------------------------------------------------------------
# Kernel 4: conv0 pooling pass:  y[p,j] = cen[p] - gproj[p,j]  (no matmul).
# Emits pre-BN k-max / k-min and per-tile (sum, sumsq) for BN0 statistics.
# --------------------------------------------------------------------------
def conv0_pool_kernel(cen_ref, gp_ref, ymax_ref, ymin_ref, s_ref, ss_ref):
    cen = cen_ref[...]                                    # (tp, C) f32
    g = gp_ref[...].astype(jnp.float32)                   # (tp, k, C)
    kf = float(g.shape[1])
    gmax = jnp.max(g, axis=1)
    gmin = jnp.min(g, axis=1)
    gsum = jnp.sum(g, axis=1)
    gss = jnp.sum(g * g, axis=1)
    ymax_ref[...] = cen - gmin
    ymin_ref[...] = cen - gmax
    sy = kf * cen - gsum
    ssy = kf * cen * cen - 2.0 * cen * gsum + gss
    s_ref[0] = jnp.sum(sy, axis=0, keepdims=True)
    ss_ref[0] = jnp.sum(ssy, axis=0, keepdims=True)


def conv0_pool(cen, gproj):
    P, C = cen.shape
    k = gproj.shape[1]
    tp = _row_tile(P)
    T = P // tp
    row = lambda i: (i, 0)
    return pl.pallas_call(
        conv0_pool_kernel,
        out_shape=(jax.ShapeDtypeStruct((P, C), jnp.float32),
                   jax.ShapeDtypeStruct((P, C), jnp.float32),
                   jax.ShapeDtypeStruct((T, 1, C), jnp.float32),
                   jax.ShapeDtypeStruct((T, 1, C), jnp.float32)),
        grid=(T,),
        in_specs=[pl.BlockSpec((tp, C), row),
                  pl.BlockSpec((tp, k, C), lambda i: (i, 0, 0))],
        out_specs=(pl.BlockSpec((tp, C), row),
                   pl.BlockSpec((tp, C), row),
                   pl.BlockSpec((1, 1, C), lambda i: (i, 0, 0)),
                   pl.BlockSpec((1, 1, C), lambda i: (i, 0, 0))),
        compiler_params=_cp(("parallel",)),
    )(cen, gproj)


# --------------------------------------------------------------------------
# Residual-block kernels, N-tiled: grid (B, N//tn), both "parallel".
# Each applies the previous half-block's fused IN+BN affine (+ReLU,
# +residual), runs the next 1x1 conv (bf16 MXU), and emits per-tile sum/sumsq
# of the raw conv output for the wrapper-side IN/BN finalization.
# --------------------------------------------------------------------------
def fuse_first_kernel(ymax_ref, ymin_ref, sc_ref, sh_ref, wT_ref, b_ref,
                      h_ref, y_ref, s_ref, ss_ref):
    sc, sh = sc_ref[...], sh_ref[...]                     # (1, C)
    sel = jnp.where(sc >= 0.0, ymax_ref[0], ymin_ref[0])  # BN-affine commutes w/ max
    h = jnp.maximum(sel * sc + sh, 0.0)                   # conv0 output (post pool)
    h_ref[0] = h
    y = jnp.dot(h.astype(jnp.bfloat16), wT_ref[...],
                preferred_element_type=jnp.float32) + b_ref[...]
    y_ref[0] = y
    s_ref[0, 0] = jnp.sum(y, axis=0, keepdims=True)
    ss_ref[0, 0] = jnp.sum(y * y, axis=0, keepdims=True)


def fuse_apply_kernel(y_ref, a_ref, c_ref, wT_ref, b_ref, y2_ref, s_ref, ss_ref):
    act = jnp.maximum(y_ref[0] * a_ref[0] + c_ref[0], 0.0)
    y2 = jnp.dot(act.astype(jnp.bfloat16), wT_ref[...],
                 preferred_element_type=jnp.float32) + b_ref[...]
    y2_ref[0] = y2
    s_ref[0, 0] = jnp.sum(y2, axis=0, keepdims=True)
    ss_ref[0, 0] = jnp.sum(y2 * y2, axis=0, keepdims=True)


def fuse_resid_kernel(y_ref, a_ref, c_ref, xres_ref, wT_ref, b_ref,
                      h_ref, y2_ref, s_ref, ss_ref):
    h = jnp.maximum(y_ref[0] * a_ref[0] + c_ref[0] + xres_ref[0], 0.0)
    h_ref[0] = h
    y2 = jnp.dot(h.astype(jnp.bfloat16), wT_ref[...],
                 preferred_element_type=jnp.float32) + b_ref[...]
    y2_ref[0] = y2
    s_ref[0, 0] = jnp.sum(y2, axis=0, keepdims=True)
    ss_ref[0, 0] = jnp.sum(y2 * y2, axis=0, keepdims=True)


def head_kernel(y_ref, a_ref, c_ref, xres_ref, wl_ref, bl_ref, o_ref):
    feat = jnp.maximum(y_ref[0] * a_ref[0] + c_ref[0] + xres_ref[0], 0.0)  # (tn, C)
    logit = lax.dot_general(wl_ref[...], feat, (((1,), (1,)), ((), ())),
                            preferred_element_type=jnp.float32) + bl_ref[...]
    o_ref[0] = logit                                       # (1, tn) lane-dense


def _res_specs(B, N, C, tn):
    act = pl.BlockSpec((1, tn, C), lambda b, t: (b, t, 0))
    aff = pl.BlockSpec((1, 1, C), lambda b, t: (b, 0, 0))
    vecC = pl.BlockSpec((1, C), lambda b, t: (0, 0))
    mat = pl.BlockSpec((C, C), lambda b, t: (0, 0))
    stat = pl.BlockSpec((1, 1, 1, C), lambda b, t: (b, t, 0, 0))
    return act, aff, vecC, mat, stat


def fuse_first(ymax, ymin, sc0, sh0, wT, bias):
    B, N, C = ymax.shape
    tn = _lane_tile(N)
    Tn = N // tn
    act, _, vecC, mat, stat = _res_specs(B, N, C, tn)
    return pl.pallas_call(
        fuse_first_kernel,
        out_shape=(jax.ShapeDtypeStruct((B, N, C), jnp.float32),
                   jax.ShapeDtypeStruct((B, N, C), jnp.float32),
                   jax.ShapeDtypeStruct((B, Tn, 1, C), jnp.float32),
                   jax.ShapeDtypeStruct((B, Tn, 1, C), jnp.float32)),
        grid=(B, Tn),
        in_specs=[act, act, vecC, vecC, mat, vecC],
        out_specs=(act, act, stat, stat),
        compiler_params=_cp(("parallel", "parallel")),
    )(ymax, ymin, sc0, sh0, wT, bias)


def fuse_apply(y, A, Bc, wT, bias):
    B, N, C = y.shape
    tn = _lane_tile(N)
    Tn = N // tn
    act, aff, vecC, mat, stat = _res_specs(B, N, C, tn)
    return pl.pallas_call(
        fuse_apply_kernel,
        out_shape=(jax.ShapeDtypeStruct((B, N, C), jnp.float32),
                   jax.ShapeDtypeStruct((B, Tn, 1, C), jnp.float32),
                   jax.ShapeDtypeStruct((B, Tn, 1, C), jnp.float32)),
        grid=(B, Tn),
        in_specs=[act, aff, aff, mat, vecC],
        out_specs=(act, stat, stat),
        compiler_params=_cp(("parallel", "parallel")),
    )(y, A, Bc, wT, bias)


def fuse_resid(y2, A2, B2, xres, wT, bias):
    B, N, C = y2.shape
    tn = _lane_tile(N)
    Tn = N // tn
    act, aff, vecC, mat, stat = _res_specs(B, N, C, tn)
    return pl.pallas_call(
        fuse_resid_kernel,
        out_shape=(jax.ShapeDtypeStruct((B, N, C), jnp.float32),
                   jax.ShapeDtypeStruct((B, N, C), jnp.float32),
                   jax.ShapeDtypeStruct((B, Tn, 1, C), jnp.float32),
                   jax.ShapeDtypeStruct((B, Tn, 1, C), jnp.float32)),
        grid=(B, Tn),
        in_specs=[act, aff, aff, act, mat, vecC],
        out_specs=(act, act, stat, stat),
        compiler_params=_cp(("parallel", "parallel")),
    )(y2, A2, B2, xres, wT, bias)


def linear_head(y2, A2, B2, xres, wl, bl):
    B, N, C = y2.shape
    tn = _lane_tile(N)
    act, aff, _, _, _ = _res_specs(B, N, C, tn)
    out = pl.pallas_call(
        head_kernel,
        out_shape=jax.ShapeDtypeStruct((B, 1, N), jnp.float32),
        grid=(B, N // tn),
        in_specs=[act, aff, aff, act,
                  pl.BlockSpec((1, C), lambda b, t: (0, 0)),
                  pl.BlockSpec((1, 1), lambda b, t: (0, 0))],
        out_specs=pl.BlockSpec((1, 1, tn), lambda b, t: (b, 0, t)),
        compiler_params=_cp(("parallel", "parallel")),
    )(y2, A2, B2, xres, wl, bl)
    return out[:, 0, :]                                   # (B, N)


# --------------------------------------------------------------------------
# Wrapper-side norm finalizations (tiny, on partial sums).
# --------------------------------------------------------------------------
def _bn_scale_shift(s_part, ss_part, gamma, beta, count):
    """BatchNorm(train) per-channel scale/shift from per-tile (sum, sumsq)."""
    s = jnp.sum(s_part[:, 0, :], axis=0)
    ss = jnp.sum(ss_part[:, 0, :], axis=0)
    mean = s / count
    var = jnp.maximum(ss / count - mean * mean, 0.0)
    scale = gamma * lax.rsqrt(var + EPS)
    shift = beta - mean * scale
    return scale[None, :], shift[None, :]                 # (1, C)


def _in_bn_affine(s_part, ss_part, gamma, beta, n_count):
    """Fused InstanceNorm + BatchNorm(train) affine per (batch, channel).

    For z = IN(y):  sum_n z = 0 exactly, so BN mean = 0 and
    BN var = mean_b[v_b / (v_b + eps)].  Returns A, B with BN(IN(y)) = A*y + B.
    """
    sy = jnp.sum(s_part[:, :, 0, :], axis=1)              # (B, C)
    ssy = jnp.sum(ss_part[:, :, 0, :], axis=1)             # (B, C)
    m = sy / n_count
    v = jnp.maximum(ssy / n_count - m * m, 0.0)
    var_bn = jnp.mean(v / (v + EPS), axis=0)                # (C,)
    sc_bn = gamma * lax.rsqrt(var_bn + EPS)
    A = sc_bn[None, :] * lax.rsqrt(v + EPS)                 # (B, C)
    Bc = beta[None, :] - m * A
    return A[:, None, :], Bc[:, None, :]                    # (B, 1, C)


# --------------------------------------------------------------------------
# Parameter init (deterministic, synthetic).  Conv weights in PyTorch
# (Cout, Cin) convention.  BN gamma=1, beta=0; IN has no params.  The unused
# `right` branch of ResNet_Block (pre=False) has no effect on the forward.
# --------------------------------------------------------------------------
def init_params(key, C=128):
    cin0 = 2 * (C + 1)
    keys = jax.random.split(key, 32)
    ki = iter(range(32))

    def conv_w(cout, cin, scale=0.05):
        return scale * jax.random.normal(keys[next(ki)], (cout, cin), jnp.float32)

    def conv_b(cout, scale=0.01):
        return scale * jax.random.normal(keys[next(ki)], (cout,), jnp.float32)

    params = {
        'w0': conv_w(C, cin0), 'b0': conv_b(C),
        'g0': jnp.ones((C,), jnp.float32), 't0': jnp.zeros((C,), jnp.float32),
        'res': [],
        'wl': conv_w(1, C), 'bl': conv_b(1),
    }
    for _ in range(4):
        params['res'].append({
            'w1': conv_w(C, C), 'b1': conv_b(C),
            'g1': jnp.ones((C,), jnp.float32), 't1': jnp.zeros((C,), jnp.float32),
            'w2': conv_w(C, C), 'b2': conv_b(C),
            'g2': jnp.ones((C,), jnp.float32), 't2': jnp.zeros((C,), jnp.float32),
        })
    return params


# --------------------------------------------------------------------------
# Full NM_block forward.  data: (B, 128, N) channels-first (PyTorch layout).
# --------------------------------------------------------------------------
def nm_block_forward(params, data, x_unused, *, k_n):
    del x_unused                                          # unused in PyTorch forward too
    B, C, N = data.shape
    P = B * N
    xb = jnp.transpose(data, (0, 2, 1)).astype(jnp.float32)           # (B, N, C)

    # --- graph degree prepass + knn pairwise distance -----------------------
    srow = deg_prepass(xb)                                             # (B, N, 2) = [deg, csq]
    scol = jnp.transpose(srow, (0, 2, 1))                              # tiny, lane-dense columns
    pd = pdist(xb, srow, scol)                                         # (B, N, N)
    # TODO(synk): top-k selection + neighbour gather have no clean Pallas
    # equivalent; done with lax.top_k / XLA gather.
    _, idx = lax.top_k(pd, k_n + 1)
    idx = idx[..., 1:]                                                 # (B, N, k)

    # --- conv0: split W @ [center; center-neigh] = (Wa+Wb)@center - Wb@neigh
    W0 = params['w0']                                                  # (Cout, 2*(C+1))
    Wa, Wb = W0[:, :C + 1], W0[:, C + 1:]
    Wab = Wa + Wb
    wabT = Wab[:, :C].T.astype(jnp.bfloat16)
    wab_d = Wab[:, C][None, :]
    wbT = Wb[:, :C].T.astype(jnp.bfloat16)
    wb_d = Wb[:, C][None, :]
    bias0 = params['b0'][None, :]

    x_p = xb.reshape(P, C)
    srow_p = srow.reshape(P, 2)
    cen, proj = point_linear(x_p, srow_p, wabT, wab_d, bias0, wbT, wb_d)
    proj_b = proj.reshape(B, N, C)                                     # bf16
    gproj = jax.vmap(lambda a, i: a[i])(proj_b, idx)                   # (B, N, k, C) bf16
    ymax, ymin, s0, ss0 = conv0_pool(cen, gproj.reshape(P, k_n, C))
    sc0, sh0 = _bn_scale_shift(s0, ss0, params['g0'], params['t0'], float(P * k_n))

    ymax_b = ymax.reshape(B, N, C)
    ymin_b = ymin.reshape(B, N, C)

    # --- 4 residual blocks: Conv-IN-BN-ReLU-Conv-IN-BN + skip, final ReLU ----
    nf = float(N)
    blk = params['res'][0]
    h, y1, s1, ss1 = fuse_first(ymax_b, ymin_b, sc0, sh0,
                                blk['w1'].T.astype(jnp.bfloat16), blk['b1'][None, :])
    A1, B1 = _in_bn_affine(s1, ss1, blk['g1'], blk['t1'], nf)
    y2, s2, ss2 = fuse_apply(y1, A1, B1,
                             blk['w2'].T.astype(jnp.bfloat16), blk['b2'][None, :])
    A2, B2 = _in_bn_affine(s2, ss2, blk['g2'], blk['t2'], nf)

    x_res = h
    for i in (1, 2, 3):
        blk = params['res'][i]
        x_res, y1, s1, ss1 = fuse_resid(y2, A2, B2, x_res,
                                        blk['w1'].T.astype(jnp.bfloat16),
                                        blk['b1'][None, :])
        A1, B1 = _in_bn_affine(s1, ss1, blk['g1'], blk['t1'], nf)
        y2, s2, ss2 = fuse_apply(y1, A1, B1,
                                 blk['w2'].T.astype(jnp.bfloat16), blk['b2'][None, :])
        A2, B2 = _in_bn_affine(s2, ss2, blk['g2'], blk['t2'], nf)

    # --- final residual finalize + linear head (fused, lane-dense output) ----
    logit = linear_head(y2, A2, B2, x_res,
                        params['wl'], params['bl'].reshape(1, 1))      # (B, N)
    return logit


if __name__ == "__main__":
    key = jax.random.PRNGKey(0)
    B, C, N = 2, 128, 16
    k_n = 8
    kd, kx, kp = jax.random.split(key, 3)
    data = jax.random.normal(kd, (B, C, N), dtype=jnp.float32)
    x_unused = jax.random.normal(kx, (B, 4, N), dtype=jnp.float32)
    params = init_params(kp, C=C)

    fwd = jax.jit(functools.partial(nm_block_forward, k_n=k_n))
    logit = fwd(params, data, x_unused)
    logit = jax.block_until_ready(logit)

    assert logit.shape == (B, N), logit.shape
    assert bool(jnp.all(jnp.isfinite(logit)))
    print("KERNEL_OK")
</pallas_src>

<mosaic_0001>
module attributes {stable_mosaic.version = 11 : i64} {
  func.func @deg_prepass_kernel(%arg0: i32, %arg1: memref<1x16x128xf32, #tpu.memory_space<vmem>>, %arg2: memref<1x16x2xf32, #tpu.memory_space<vmem>>) attributes {dimension_semantics = [#tpu.dimension_semantics<parallel>], iteration_bounds = array<i64: 2>, scalar_prefetch = 0 : i64, scratch_operands = 0 : i64, tpu.core_type = #tpu.core_type<tc>, window_params = [{transform_indices = @transform_0, window_bounds = array<i64: 1, 16, 128>}, {transform_indices = @transform_1, window_bounds = array<i64: 1, 16, 2>}]} {
    %c0 = arith.constant 0 : index
    %c0_0 = arith.constant 0 : index
    %c0_1 = arith.constant 0 : index
    %0 = vector.load %arg1[%c0, %c0_0, %c0_1] : memref<1x16x128xf32, #tpu.memory_space<vmem>>, vector<1x16x128xf32>
    %1 = vector.shape_cast %0 : vector<1x16x128xf32> to vector<16x128xf32>
    %2 = arith.mulf %1, %1 : vector<16x128xf32>
    %cst = arith.constant dense<0.000000e+00> : vector<16xf32>
    %3 = vector.multi_reduction <add>, %2, %cst [1] : vector<16x128xf32> to vector<16xf32>
    %4 = vector.shape_cast %3 : vector<16xf32> to vector<16x1xf32>
    %5 = math.sqrt %4 : vector<16x1xf32>
    %cst_2 = arith.constant 9.99999974E-6 : f32
    %6 = vector.broadcast %cst_2 : f32 to vector<16x1xf32>
    %7 = arith.addf %5, %6 : vector<16x1xf32>
    %8 = vector.broadcast %7 : vector<16x1xf32> to vector<16x128xf32>
    %9 = arith.divf %1, %8 : vector<16x128xf32>
    %cst_3 = arith.constant dense<0.000000e+00> : vector<128xf32>
    %10 = vector.multi_reduction <add>, %9, %cst_3 [0] : vector<16x128xf32> to vector<128xf32>
    %11 = vector.shape_cast %10 : vector<128xf32> to vector<1x128xf32>
    %12 = vector.broadcast %11 : vector<1x128xf32> to vector<16x128xf32>
    %13 = arith.mulf %9, %12 : vector<16x128xf32>
    %cst_4 = arith.constant dense<0.000000e+00> : vector<16xf32>
    %14 = vector.multi_reduction <add>, %13, %cst_4 [1] : vector<16x128xf32> to vector<16xf32>
    %15 = vector.shape_cast %14 : vector<16xf32> to vector<16x1xf32>
    %cst_5 = arith.constant 1.000000e+00 : f32
    %16 = vector.broadcast %cst_5 : f32 to vector<16x1xf32>
    %17 = arith.subf %15, %16 : vector<16x1xf32>
    %cst_6 = arith.constant 1.600000e+01 : f32
    %18 = vector.broadcast %cst_6 : f32 to vector<16x1xf32>
    %19 = arith.divf %17, %18 : vector<16x1xf32>
    %20 = math.tanh %19 : vector<16x1xf32>
    %cst_7 = arith.constant 0.000000e+00 : f32
    %21 = vector.broadcast %cst_7 : f32 to vector<16x1xf32>
    %22 = arith.maximumf %20, %21 : vector<16x1xf32>
    %23 = arith.mulf %22, %22 : vector<16x1xf32>
    %24 = arith.addf %4, %23 : vector<16x1xf32>
    %c0_8 = arith.constant 0 : index
    %c0_9 = arith.constant 0 : index
    %c0_10 = arith.constant 0 : index
    %25 = vector.load %arg2[%c0_8, %c0_9, %c0_10] : memref<1x16x2xf32, #tpu.memory_space<vmem>>, vector<1x16x1xf32>
    %26 = vector.shape_cast %25 : vector<1x16x1xf32> to vector<16x1xf32>
    %27 = vector.shape_cast %22 : vector<16x1xf32> to vector<1x16x1xf32>
    tpu.vector_store %arg2[%c0_8, %c0_9, %c0_10], %27 {strides = array<i32>} : memref<1x16x2xf32, #tpu.memory_space<vmem>>, vector<1x16x1xf32>,
    %c0_11 = arith.constant 0 : index
    %c0_12 = arith.constant 0 : index
    %c1 = arith.constant 1 : index
    %28 = vector.load %arg2[%c0_11, %c0_12, %c1] : memref<1x16x2xf32, #tpu.memory_space<vmem>>, vector<1x16x1xf32>
    %29 = vector.shape_cast %28 : vector<1x16x1xf32> to vector<16x1xf32>
    %30 = vector.shape_cast %24 : vector<16x1xf32> to vector<1x16x1xf32>
    tpu.vector_store %arg2[%c0_11, %c0_12, %c1], %30 {strides = array<i32>} : memref<1x16x2xf32, #tpu.memory_space<vmem>>, vector<1x16x1xf32>,
    return
  }
  func.func @transform_0(%arg0: i32) -> (i32, i32, i32) {
    %c0_i32 = arith.constant 0 : i32
    %c0_i32_0 = arith.constant 0 : i32
    %c0_i32_1 = arith.constant 0 : i32
    return %arg0, %c0_i32, %c0_i32_0 : i32, i32, i32
  }
  func.func @transform_1(%arg0: i32) -> (i32, i32, i32) {
    %c0_i32 = arith.constant 0 : i32
    %c0_i32_0 = arith.constant 0 : i32
    %c0_i32_1 = arith.constant 0 : i32
    return %arg0, %c0_i32, %c0_i32_0 : i32, i32, i32
  }
}

module attributes {stable_mosaic.version = 11 : i64} {
  func.func @point_linear_kernel(%arg0: i32, %arg1: memref<32x128xf32, #tpu.memory_space<vmem>>, %arg2: memref<32x2xf32, #tpu.memory_space<vmem>>, %arg3: memref<128x128xbf16, #tpu.memory_space<vmem>>, %arg4: memref<1x128xf32, #tpu.memory_space<vmem>>, %arg5: memref<1x128xf32, #tpu.memory_space<vmem>>, %arg6: memref<128x128xbf16, #tpu.memory_space<vmem>>, %arg7: memref<1x128xf32, #tpu.memory_space<vmem>>, %arg8: memref<32x128xf32, #tpu.memory_space<vmem>>, %arg9: memref<32x128xbf16, #tpu.memory_space<vmem>>) attributes {dimension_semantics = [#tpu.dimension_semantics<parallel>], iteration_bounds = array<i64: 1>, scalar_prefetch = 0 : i64, scratch_operands = 0 : i64, tpu.core_type = #tpu.core_type<tc>, window_params = [{transform_indices = @transform_0, window_bounds = array<i64: 32, 128>}, {transform_indices = @transform_1, window_bounds = array<i64: 32, 2>}, {pipeline_mode = #tpu.pipeline_mode<synchronous>, transform_indices = @transform_2, window_bounds = array<i64: 128, 128>}, {pipeline_mode = #tpu.pipeline_mode<synchronous>, transform_indices = @transform_3, window_bounds = array<i64: 1, 128>}, {pipeline_mode = #tpu.pipeline_mode<synchronous>, transform_indices = @transform_4, window_bounds = array<i64: 1, 128>}, {pipeline_mode = #tpu.pipeline_mode<synchronous>, transform_indices = @transform_5, window_bounds = array<i64: 128, 128>}, {pipeline_mode = #tpu.pipeline_mode<synchronous>, transform_indices = @transform_6, window_bounds = array<i64: 1, 128>}, {transform_indices = @transform_7, window_bounds = array<i64: 32, 128>}, {transform_indices = @transform_8, window_bounds = array<i64: 32, 128>}]} {
    %c0 = arith.constant 0 : index
    %c0_0 = arith.constant 0 : index
    %0 = vector.load %arg1[%c0, %c0_0] : memref<32x128xf32, #tpu.memory_space<vmem>>, vector<32x128xf32>
    %1 = arith.truncf %0 : vector<32x128xf32> to vector<32x128xbf16>
    %c0_1 = arith.constant 0 : index
    %c0_2 = arith.constant 0 : index
    %2 = vector.load %arg2[%c0_1, %c0_2] : memref<32x2xf32, #tpu.memory_space<vmem>>, vector<32x1xf32>
    %c0_3 = arith.constant 0 : index
    %c0_4 = arith.constant 0 : index
    %3 = vector.load %arg3[%c0_3, %c0_4] : memref<128x128xbf16, #tpu.memory_space<vmem>>, vector<128x128xbf16>
    %cst = arith.constant dense<0.000000e+00> : vector<32x128xf32>
    %4 = tpu.matmul %1, %3, %cst {dimension_numbers = #tpu.dot_dimension_numbers<[1], [0], [0], [1], [0, 0, 1, 1], [], []>} : vector<32x128xbf16>, vector<128x128xbf16>, vector<32x128xf32> -> vector<32x128xf32>
    %c0_5 = arith.constant 0 : index
    %c0_6 = arith.constant 0 : index
    %5 = vector.load %arg4[%c0_5, %c0_6] : memref<1x128xf32, #tpu.memory_space<vmem>>, vector<1x128xf32>
    %6 = vector.broadcast %2 : vector<32x1xf32> to vector<32x128xf32>
    %7 = vector.broadcast %5 : vector<1x128xf32> to vector<32x128xf32>
    %8 = arith.mulf %6, %7 : vector<32x128xf32>
    %9 = arith.addf %4, %8 : vector<32x128xf32>
    %c0_7 = arith.constant 0 : index
    %c0_8 = arith.constant 0 : index
    %10 = vector.load %arg5[%c0_7, %c0_8] : memref<1x128xf32, #tpu.memory_space<vmem>>, vector<1x128xf32>
    %11 = vector.broadcast %10 : vector<1x128xf32> to vector<32x128xf32>
    %12 = arith.addf %9, %11 : vector<32x128xf32>
    %c0_9 = arith.constant 0 : index
    %c0_10 = arith.constant 0 : index
    %13 = vector.load %arg8[%c0_9, %c0_10] : memref<32x128xf32, #tpu.memory_space<vmem>>, vector<32x128xf32>
    tpu.vector_store %arg8[%c0_9, %c0_10], %12 {strides = array<i32>} : memref<32x128xf32, #tpu.memory_space<vmem>>, vector<32x128xf32>,
    %c0_11 = arith.constant 0 : index
    %c0_12 = arith.constant 0 : index
    %14 = vector.load %arg6[%c0_11, %c0_12] : memref<128x128xbf16, #tpu.memory_space<vmem>>, vector<128x128xbf16>
    %cst_13 = arith.constant dense<0.000000e+00> : vector<32x128xf32>
    %15 = tpu.matmul %1, %14, %cst_13 {dimension_numbers = #tpu.dot_dimension_numbers<[1], [0], [0], [1], [0, 0, 1, 1], [], []>} : vector<32x128xbf16>, vector<128x128xbf16>, vector<32x128xf32> -> vector<32x128xf32>
    %c0_14 = arith.constant 0 : index
    %c0_15 = arith.constant 0 : index
    %16 = vector.load %arg7[%c0_14, %c0_15] : memref<1x128xf32, #tpu.memory_space<vmem>>, vector<1x128xf32>
    %17 = vector.broadcast %2 : vector<32x1xf32> to vector<32x128xf32>
    %18 = vector.broadcast %16 : vector<1x128xf32> to vector<32x128xf32>
    %19 = arith.mulf %17, %18 : vector<32x128xf32>
    %20 = arith.addf %15, %19 : vector<32x128xf32>
    %21 = arith.truncf %20 : vector<32x128xf32> to vector<32x128xbf16>
    %c0_16 = arith.constant 0 : index
    %c0_17 = arith.constant 0 : index
    %22 = vector.load %arg9[%c0_16, %c0_17] : memref<32x128xbf16, #tpu.memory_space<vmem>>, vector<32x128xbf16>
    tpu.vector_store %arg9[%c0_16, %c0_17], %21 {strides = array<i32>} : memref<32x128xbf16, #tpu.memory_space<vmem>>, vector<32x128xbf16>,
    return
  }
  func.func @transform_0(%arg0: i32) -> (i32, i32) {
    %c0_i32 = arith.constant 0 : i32
    %c0_i32_0 = arith.constant 0 : i32
    return %arg0, %c0_i32 : i32, i32
  }
  func.func @transform_1(%arg0: i32) -> (i32, i32) {
    %c0_i32 = arith.constant 0 : i32
    %c0_i32_0 = arith.constant 0 : i32
    return %arg0, %c0_i32 : i32, i32
  }
  func.func @transform_2(%arg0: i32) -> (i32, i32) {
    %c0_i32 = arith.constant 0 : i32
    %c0_i32_0 = arith.constant 0 : i32
    %c0_i32_1 = arith.constant 0 : i32
    return %c0_i32, %c0_i32_0 : i32, i32
  }
  func.func @transform_3(%arg0: i32) -> (i32, i32) {
    %c0_i32 = arith.constant 0 : i32
    %c0_i32_0 = arith.constant 0 : i32
    %c0_i32_1 = arith.constant 0 : i32
    return %c0_i32, %c0_i32_0 : i32, i32
  }
  func.func @transform_4(%arg0: i32) -> (i32, i32) {
    %c0_i32 = arith.constant 0 : i32
    %c0_i32_0 = arith.constant 0 : i32
    %c0_i32_1 = arith.constant 0 : i32
    return %c0_i32, %c0_i32_0 : i32, i32
  }
  func.func @transform_5(%arg0: i32) -> (i32, i32) {
    %c0_i32 = arith.constant 0 : i32
    %c0_i32_0 = arith.constant 0 : i32
    %c0_i32_1 = arith.constant 0 : i32
    return %c0_i32, %c0_i32_0 : i32, i32
  }
  func.func @transform_6(%arg0: i32) -> (i32, i32) {
    %c0_i32 = arith.constant 0 : i32
    %c0_i32_0 = arith.constant 0 : i32
    %c0_i32_1 = arith.constant 0 : i32
    return %c0_i32, %c0_i32_0 : i32, i32
  }
  func.func @transform_7(%arg0: i32) -> (i32, i32) {
    %c0_i32 = arith.constant 0 : i32
    %c0_i32_0 = arith.constant 0 : i32
    return %arg0, %c0_i32 : i32, i32
  }
  func.func @transform_8(%arg0: i32) -> (i32, i32) {
    %c0_i32 = arith.constant 0 : i32
    %c0_i32_0 = arith.constant 0 : i32
    return %arg0, %c0_i32 : i32, i32
  }
}

module attributes {stable_mosaic.version = 11 : i64} {
  func.func @pdist_kernel(%arg0: i32, %arg1: i32, %arg2: i32, %arg3: memref<1x16x128xf32, #tpu.memory_space<vmem>>, %arg4: memref<1x16x128xf32, #tpu.memory_space<vmem>>, %arg5: memref<1x16x2xf32, #tpu.memory_space<vmem>>, %arg6: memref<1x2x16xf32, #tpu.memory_space<vmem>>, %arg7: memref<1x16x16xf32, #tpu.memory_space<vmem>>) attributes {dimension_semantics = [#tpu.dimension_semantics<parallel>, #tpu.dimension_semantics<parallel>, #tpu.dimension_semantics<parallel>], iteration_bounds = array<i64: 2, 1, 1>, scalar_prefetch = 0 : i64, scratch_operands = 0 : i64, tpu.core_type = #tpu.core_type<tc>, window_params = [{transform_indices = @transform_0, window_bounds = array<i64: 1, 16, 128>}, {transform_indices = @transform_1, window_bounds = array<i64: 1, 16, 128>}, {transform_indices = @transform_2, window_bounds = array<i64: 1, 16, 2>}, {transform_indices = @transform_3, window_bounds = array<i64: 1, 2, 16>}, {transform_indices = @transform_4, window_bounds = array<i64: 1, 16, 16>}]} {
    %c0 = arith.constant 0 : index
    %c0_0 = arith.constant 0 : index
    %c0_1 = arith.constant 0 : index
    %0 = vector.load %arg3[%c0, %c0_0, %c0_1] : memref<1x16x128xf32, #tpu.memory_space<vmem>>, vector<1x16x128xf32>
    %1 = vector.shape_cast %0 : vector<1x16x128xf32> to vector<16x128xf32>
    %2 = arith.truncf %1 : vector<16x128xf32> to vector<16x128xbf16>
    %c0_2 = arith.constant 0 : index
    %c0_3 = arith.constant 0 : index
    %c0_4 = arith.constant 0 : index
    %3 = vector.load %arg4[%c0_2, %c0_3, %c0_4] : memref<1x16x128xf32, #tpu.memory_space<vmem>>, vector<1x16x128xf32>
    %4 = vector.shape_cast %3 : vector<1x16x128xf32> to vector<16x128xf32>
    %5 = arith.truncf %4 : vector<16x128xf32> to vector<16x128xbf16>
    %cst = arith.constant dense<0.000000e+00> : vector<16x16xf32>
    %6 = tpu.matmul %2, %5, %cst {dimension_numbers = #tpu.dot_dimension_numbers<[1], [1], [0], [0], [0, 0, 1, 0], [], []>} : vector<16x128xbf16>, vector<16x128xbf16>, vector<16x16xf32> -> vector<16x16xf32>
    %c0_5 = arith.constant 0 : index
    %c0_6 = arith.constant 0 : index
    %c0_7 = arith.constant 0 : index
    %7 = vector.load %arg5[%c0_5, %c0_6, %c0_7] : memref<1x16x2xf32, #tpu.memory_space<vmem>>, vector<1x16x2xf32>
    %8 = vector.shape_cast %7 : vector<1x16x2xf32> to vector<16x2xf32>
    %c0_8 = arith.constant 0 : index
    %c0_9 = arith.constant 0 : index
    %c0_10 = arith.constant 0 : index
    %9 = vector.load %arg6[%c0_8, %c0_9, %c0_10] : memref<1x2x16xf32, #tpu.memory_space<vmem>>, vector<1x2x16xf32>
    %10 = vector.shape_cast %9 : vector<1x2x16xf32> to vector<2x16xf32>
    %11 = vector.extract_strided_slice %8 {offsets = [0, 0], sizes = [16, 1], strides = [1, 1]} : vector<16x2xf32> to vector<16x1xf32>
    %12 = vector.extract_strided_slice %8 {offsets = [0, 1], sizes = [16, 1], strides = [1, 1]} : vector<16x2xf32> to vector<16x1xf32>
    %13 = vector.extract_strided_slice %10 {offsets = [0, 0], sizes = [1, 16], strides = [1, 1]} : vector<2x16xf32> to vector<1x16xf32>
    %14 = vector.extract_strided_slice %10 {offsets = [1, 0], sizes = [1, 16], strides = [1, 1]} : vector<2x16xf32> to vector<1x16xf32>
    %15 = vector.broadcast %11 : vector<16x1xf32> to vector<16x16xf32>
    %16 = vector.broadcast %13 : vector<1x16xf32> to vector<16x16xf32>
    %17 = arith.mulf %15, %16 : vector<16x16xf32>
    %18 = arith.addf %6, %17 : vector<16x16xf32>
    %cst_11 = arith.constant 2.000000e+00 : f32
    %19 = vector.broadcast %cst_11 : f32 to vector<16x16xf32>
    %20 = arith.mulf %19, %18 : vector<16x16xf32>
    %21 = vector.broadcast %12 : vector<16x1xf32> to vector<16x16xf32>
    %22 = arith.subf %20, %21 : vector<16x16xf32>
    %23 = vector.broadcast %14 : vector<1x16xf32> to vector<16x16xf32>
    %24 = arith.subf %22, %23 : vector<16x16xf32>
    %c0_12 = arith.constant 0 : index
    %c0_13 = arith.constant 0 : index
    %c0_14 = arith.constant 0 : index
    %25 = vector.load %arg7[%c0_12, %c0_13, %c0_14] : memref<1x16x16xf32, #tpu.memory_space<vmem>>, vector<1x16x16xf32>
    %26 = vector.shape_cast %25 : vector<1x16x16xf32> to vector<16x16xf32>
    %27 = vector.shape_cast %24 : vector<16x16xf32> to vector<1x16x16xf32>
    tpu.vector_store %arg7[%c0_12, %c0_13, %c0_14], %27 {strides = array<i32>} : memref<1x16x16xf32, #tpu.memory_space<vmem>>, vector<1x16x16xf32>,
    return
  }
  func.func @transform_0(%arg0: i32, %arg1: i32, %arg2: i32) -> (i32, i32, i32) {
    %c0_i32 = arith.constant 0 : i32
    %c0_i32_0 = arith.constant 0 : i32
    return %arg0, %arg1, %c0_i32 : i32, i32, i32
  }
  func.func @transform_1(%arg0: i32, %arg1: i32, %arg2: i32) -> (i32, i32, i32) {
    %c0_i32 = arith.constant 0 : i32
    %c0_i32_0 = arith.constant 0 : i32
    return %arg0, %arg2, %c0_i32 : i32, i32, i32
  }
  func.func @transform_2(%arg0: i32, %arg1: i32, %arg2: i32) -> (i32, i32, i32) {
    %c0_i32 = arith.constant 0 : i32
    %c0_i32_0 = arith.constant 0 : i32
    return %arg0, %arg1, %c0_i32 : i32, i32, i32
  }
  func.func @transform_3(%arg0: i32, %arg1: i32, %arg2: i32) -> (i32, i32, i32) {
    %c0_i32 = arith.constant 0 : i32
    %c0_i32_0 = arith.constant 0 : i32
    return %arg0, %c0_i32, %arg2 : i32, i32, i32
  }
  func.func @transform_4(%arg0: i32, %arg1: i32, %arg2: i32) -> (i32, i32, i32) {
    %c0_i32 = arith.constant 0 : i32
    return %arg0, %arg1, %arg2 : i32, i32, i32
  }
}

module attributes {stable_mosaic.version = 11 : i64} {
  func.func @fuse_first_kernel(%arg0: i32, %arg1: i32, %arg2: memref<1x16x128xf32, #tpu.memory_space<vmem>>, %arg3: memref<1x16x128xf32, #tpu.memory_space<vmem>>, %arg4: memref<1x128xf32, #tpu.memory_space<vmem>>, %arg5: memref<1x128xf32, #tpu.memory_space<vmem>>, %arg6: memref<128x128xbf16, #tpu.memory_space<vmem>>, %arg7: memref<1x128xf32, #tpu.memory_space<vmem>>, %arg8: memref<1x16x128xf32, #tpu.memory_space<vmem>>, %arg9: memref<1x16x128xf32, #tpu.memory_space<vmem>>, %arg10: memref<1x1x1x128xf32, #tpu.memory_space<vmem>>, %arg11: memref<1x1x1x128xf32, #tpu.memory_space<vmem>>) attributes {dimension_semantics = [#tpu.dimension_semantics<parallel>, #tpu.dimension_semantics<parallel>], iteration_bounds = array<i64: 2, 1>, scalar_prefetch = 0 : i64, scratch_operands = 0 : i64, tpu.core_type = #tpu.core_type<tc>, window_params = [{transform_indices = @transform_0, window_bounds = array<i64: 1, 16, 128>}, {transform_indices = @transform_1, window_bounds = array<i64: 1, 16, 128>}, {pipeline_mode = #tpu.pipeline_mode<synchronous>, transform_indices = @transform_2, window_bounds = array<i64: 1, 128>}, {pipeline_mode = #tpu.pipeline_mode<synchronous>, transform_indices = @transform_3, window_bounds = array<i64: 1, 128>}, {pipeline_mode = #tpu.pipeline_mode<synchronous>, transform_indices = @transform_4, window_bounds = array<i64: 128, 128>}, {pipeline_mode = #tpu.pipeline_mode<synchronous>, transform_indices = @transform_5, window_bounds = array<i64: 1, 128>}, {transform_indices = @transform_6, window_bounds = array<i64: 1, 16, 128>}, {transform_indices = @transform_7, window_bounds = array<i64: 1, 16, 128>}, {transform_indices = @transform_8, window_bounds = array<i64: 1, 1, 1, 128>}, {transform_indices = @transform_9, window_bounds = array<i64: 1, 1, 1, 128>}]} {
    %c0 = arith.constant 0 : index
    %c0_0 = arith.constant 0 : index
    %0 = vector.load %arg4[%c0, %c0_0] : memref<1x128xf32, #tpu.memory_space<vmem>>, vector<1x128xf32>
    %c0_1 = arith.constant 0 : index
    %c0_2 = arith.constant 0 : index
    %1 = vector.load %arg5[%c0_1, %c0_2] : memref<1x128xf32, #tpu.memory_space<vmem>>, vector<1x128xf32>
    %cst = arith.constant 0.000000e+00 : f32
    %2 = vector.broadcast %cst : f32 to vector<1x128xf32>
    %3 = arith.cmpf oge, %0, %2 : vector<1x128xf32>
    %c0_3 = arith.constant 0 : index
    %c0_4 = arith.constant 0 : index
    %c0_5 = arith.constant 0 : index
    %4 = vector.load %arg2[%c0_3, %c0_4, %c0_5] : memref<1x16x128xf32, #tpu.memory_space<vmem>>, vector<1x16x128xf32>
    %5 = vector.shape_cast %4 : vector<1x16x128xf32> to vector<16x128xf32>
    %c0_6 = arith.constant 0 : index
    %c0_7 = arith.constant 0 : index
    %c0_8 = arith.constant 0 : index
    %6 = vector.load %arg3[%c0_6, %c0_7, %c0_8] : memref<1x16x128xf32, #tpu.memory_space<vmem>>, vector<1x16x128xf32>
    %7 = vector.shape_cast %6 : vector<1x16x128xf32> to vector<16x128xf32>
    %8 = vector.shape_cast %3 : vector<1x128xi1> to vector<1x128xi1>
    %9 = vector.broadcast %8 : vector<1x128xi1> to vector<16x128xi1>
    %10 = arith.select %9, %5, %7 : vector<16x128xi1>, vector<16x128xf32>
    %11 = vector.broadcast %0 : vector<1x128xf32> to vector<16x128xf32>
    %12 = arith.mulf %10, %11 : vector<16x128xf32>
    %13 = vector.broadcast %1 : vector<1x128xf32> to vector<16x128xf32>
    %14 = arith.addf %12, %13 : vector<16x128xf32>
    %cst_9 = arith.constant 0.000000e+00 : f32
    %15 = vector.broadcast %cst_9 : f32 to vector<16x128xf32>
    %16 = arith.maximumf %14, %15 : vector<16x128xf32>
    %c0_10 = arith.constant 0 : index
    %c0_11 = arith.constant 0 : index
    %c0_12 = arith.constant 0 : index
    %17 = vector.load %arg8[%c0_10, %c0_11, %c0_12] : memref<1x16x128xf32, #tpu.memory_space<vmem>>, vector<1x16x128xf32>
    %18 = vector.shape_cast %17 : vector<1x16x128xf32> to vector<16x128xf32>
    %19 = vector.shape_cast %16 : vector<16x128xf32> to vector<1x16x128xf32>
    tpu.vector_store %arg8[%c0_10, %c0_11, %c0_12], %19 {strides = array<i32>} : memref<1x16x128xf32, #tpu.memory_space<vmem>>, vector<1x16x128xf32>,
    %20 = arith.truncf %16 : vector<16x128xf32> to vector<16x128xbf16>
    %c0_13 = arith.constant 0 : index
    %c0_14 = arith.constant 0 : index
    %21 = vector.load %arg6[%c0_13, %c0_14] : memref<128x128xbf16, #tpu.memory_space<vmem>>, vector<128x128xbf16>
    %cst_15 = arith.constant dense<0.000000e+00> : vector<16x128xf32>
    %22 = tpu.matmul %20, %21, %cst_15 {dimension_numbers = #tpu.dot_dimension_numbers<[1], [0], [0], [1], [0, 0, 1, 1], [], []>} : vector<16x128xbf16>, vector<128x128xbf16>, vector<16x128xf32> -> vector<16x128xf32>
    %c0_16 = arith.constant 0 : index
    %c0_17 = arith.constant 0 : index
    %23 = vector.load %arg7[%c0_16, %c0_17] : memref<1x128xf32, #tpu.memory_space<vmem>>, vector<1x128xf32>
    %24 = vector.broadcast %23 : vector<1x128xf32> to vector<16x128xf32>
    %25 = arith.addf %22, %24 : vector<16x128xf32>
    %c0_18 = arith.constant 0 : index
    %c0_19 = arith.constant 0 : index
    %c0_20 = arith.constant 0 : index
    %26 = vector.load %arg9[%c0_18, %c0_19, %c0_20] : memref<1x16x128xf32, #tpu.memory_space<vmem>>, vector<1x16x128xf32>
    %27 = vector.shape_cast %26 : vector<1x16x128xf32> to vector<16x128xf32>
    %28 = vector.shape_cast %25 : vector<16x128xf32> to vector<1x16x128xf32>
    tpu.vector_store %arg9[%c0_18, %c0_19, %c0_20], %28 {strides = array<i32>} : memref<1x16x128xf32, #tpu.memory_space<vmem>>, vector<1x16x128xf32>,
    %cst_21 = arith.constant dense<0.000000e+00> : vector<128xf32>
    %29 = vector.multi_reduction <add>, %25, %cst_21 [0] : vector<16x128xf32> to vector<128xf32>
    %30 = vector.shape_cast %29 : vector<128xf32> to vector<1x128xf32>
    %c0_22 = arith.constant 0 : index
    %c0_23 = arith.constant 0 : index
    %c0_24 = arith.constant 0 : index
    %c0_25 = arith.constant 0 : index
    %31 = vector.load %arg10[%c0_22, %c0_23, %c0_24, %c0_25] : memref<1x1x1x128xf32, #tpu.memory_space<vmem>>, vector<1x1x1x128xf32>
    %32 = vector.shape_cast %31 : vector<1x1x1x128xf32> to vector<1x128xf32>
    %33 = vector.shape_cast %30 : vector<1x128xf32> to vector<1x1x1x128xf32>
    tpu.vector_store %arg10[%c0_22, %c0_23, %c0_24, %c0_25], %33 {strides = array<i32>} : memref<1x1x1x128xf32, #tpu.memory_space<vmem>>, vector<1x1x1x128xf32>,
    %34 = arith.mulf %25, %25 : vector<16x128xf32>
    %cst_26 = arith.constant dense<0.000000e+00> : vector<128xf32>
    %35 = vector.multi_reduction <add>, %34, %cst_26 [0] : vector<16x128xf32> to vector<128xf32>
    %36 = vector.shape_cast %35 : vector<128xf32> to vector<1x128xf32>
    %c0_27 = arith.constant 0 : index
    %c0_28 = arith.constant 0 : index
    %c0_29 = arith.constant 0 : index
    %c0_30 = arith.constant 0 : index
    %37 = vector.load %arg11[%c0_27, %c0_28, %c0_29, %c0_30] : memref<1x1x1x128xf32, #tpu.memory_space<vmem>>, vector<1x1x1x128xf32>
    %38 = vector.shape_cast %37 : vector<1x1x1x128xf32> to vector<1x128xf32>
    %39 = vector.shape_cast %36 : vector<1x128xf32> to vector<1x1x1x128xf32>
    tpu.vector_store %arg11[%c0_27, %c0_28, %c0_29, %c0_30], %39 {strides = array<i32>} : memref<1x1x1x128xf32, #tpu.memory_space<vmem>>, vector<1x1x1x128xf32>,
    return
  }
  func.func @transform_0(%arg0: i32, %arg1: i32) -> (i32, i32, i32) {
    %c0_i32 = arith.constant 0 : i32
    %c0_i32_0 = arith.constant 0 : i32
    return %arg0, %arg1, %c0_i32 : i32, i32, i32
  }
  func.func @transform_1(%arg0: i32, %arg1: i32) -> (i32, i32, i32) {
    %c0_i32 = arith.constant 0 : i32
    %c0_i32_0 = arith.constant 0 : i32
    return %arg0, %arg1, %c0_i32 : i32, i32, i32
  }
  func.func @transform_2(%arg0: i32, %arg1: i32) -> (i32, i32) {
    %c0_i32 = arith.constant 0 : i32
    %c0_i32_0 = arith.constant 0 : i32
    %c0_i32_1 = arith.constant 0 : i32
    return %c0_i32, %c0_i32_0 : i32, i32
  }
  func.func @transform_3(%arg0: i32, %arg1: i32) -> (i32, i32) {
    %c0_i32 = arith.constant 0 : i32
    %c0_i32_0 = arith.constant 0 : i32
    %c0_i32_1 = arith.constant 0 : i32
    return %c0_i32, %c0_i32_0 : i32, i32
  }
  func.func @transform_4(%arg0: i32, %arg1: i32) -> (i32, i32) {
    %c0_i32 = arith.constant 0 : i32
    %c0_i32_0 = arith.constant 0 : i32
    %c0_i32_1 = arith.constant 0 : i32
    return %c0_i32, %c0_i32_0 : i32, i32
  }
  func.func @transform_5(%arg0: i32, %arg1: i32) -> (i32, i32) {
    %c0_i32 = arith.constant 0 : i32
    %c0_i32_0 = arith.constant 0 : i32
    %c0_i32_1 = arith.constant 0 : i32
    return %c0_i32, %c0_i32_0 : i32, i32
  }
  func.func @transform_6(%arg0: i32, %arg1: i32) -> (i32, i32, i32) {
    %c0_i32 = arith.constant 0 : i32
    %c0_i32_0 = arith.constant 0 : i32
    return %arg0, %arg1, %c0_i32 : i32, i32, i32
  }
  func.func @transform_7(%arg0: i32, %arg1: i32) -> (i32, i32, i32) {
    %c0_i32 = arith.constant 0 : i32
    %c0_i32_0 = arith.constant 0 : i32
    return %arg0, %arg1, %c0_i32 : i32, i32, i32
  }
  func.func @transform_8(%arg0: i32, %arg1: i32) -> (i32, i32, i32, i32) {
    %c0_i32 = arith.constant 0 : i32
    %c0_i32_0 = arith.constant 0 : i32
    %c0_i32_1 = arith.constant 0 : i32
    return %arg0, %arg1, %c0_i32, %c0_i32_0 : i32, i32, i32, i32
  }
  func.func @transform_9(%arg0: i32, %arg1: i32) -> (i32, i32, i32, i32) {
    %c0_i32 = arith.constant 0 : i32
    %c0_i32_0 = arith.constant 0 : i32
    %c0_i32_1 = arith.constant 0 : i32
    return %arg0, %arg1, %c0_i32, %c0_i32_0 : i32, i32, i32, i32
  }
}

module attributes {stable_mosaic.version = 11 : i64} {
  func.func @conv0_pool_kernel(%arg0: i32, %arg1: memref<32x128xf32, #tpu.memory_space<vmem>>, %arg2: memref<32x8x128xbf16, #tpu.memory_space<vmem>>, %arg3: memref<32x128xf32, #tpu.memory_space<vmem>>, %arg4: memref<32x128xf32, #tpu.memory_space<vmem>>, %arg5: memref<1x1x128xf32, #tpu.memory_space<vmem>>, %arg6: memref<1x1x128xf32, #tpu.memory_space<vmem>>) attributes {dimension_semantics = [#tpu.dimension_semantics<parallel>], iteration_bounds = array<i64: 1>, scalar_prefetch = 0 : i64, scratch_operands = 0 : i64, tpu.core_type = #tpu.core_type<tc>, window_params = [{transform_indices = @transform_0, window_bounds = array<i64: 32, 128>}, {transform_indices = @transform_1, window_bounds = array<i64: 32, 8, 128>}, {transform_indices = @transform_2, window_bounds = array<i64: 32, 128>}, {transform_indices = @transform_3, window_bounds = array<i64: 32, 128>}, {transform_indices = @transform_4, window_bounds = array<i64: 1, 1, 128>}, {transform_indices = @transform_5, window_bounds = array<i64: 1, 1, 128>}]} {
    %c0 = arith.constant 0 : index
    %c0_0 = arith.constant 0 : index
    %0 = vector.load %arg1[%c0, %c0_0] : memref<32x128xf32, #tpu.memory_space<vmem>>, vector<32x128xf32>
    %c0_1 = arith.constant 0 : index
    %c0_2 = arith.constant 0 : index
    %c0_3 = arith.constant 0 : index
    %1 = vector.load %arg2[%c0_1, %c0_2, %c0_3] : memref<32x8x128xbf16, #tpu.memory_space<vmem>>, vector<32x8x128xbf16>
    %2 = arith.extf %1 : vector<32x8x128xbf16> to vector<32x8x128xf32>
    %cst = arith.constant dense<0xFF800000> : vector<32x128xf32>
    %3 = vector.multi_reduction <maximumf>, %2, %cst [1] : vector<32x8x128xf32> to vector<32x128xf32>
    %cst_4 = arith.constant dense<0x7F800000> : vector<32x128xf32>
    %4 = vector.multi_reduction <minimumf>, %2, %cst_4 [1] : vector<32x8x128xf32> to vector<32x128xf32>
    %cst_5 = arith.constant dense<0.000000e+00> : vector<32x128xf32>
    %5 = vector.multi_reduction <add>, %2, %cst_5 [1] : vector<32x8x128xf32> to vector<32x128xf32>
    %6 = arith.mulf %2, %2 : vector<32x8x128xf32>
    %cst_6 = arith.constant dense<0.000000e+00> : vector<32x128xf32>
    %7 = vector.multi_reduction <add>, %6, %cst_6 [1] : vector<32x8x128xf32> to vector<32x128xf32>
    %8 = arith.subf %0, %4 : vector<32x128xf32>
    %c0_7 = arith.constant 0 : index
    %c0_8 = arith.constant 0 : index
    %9 = vector.load %arg3[%c0_7, %c0_8] : memref<32x128xf32, #tpu.memory_space<vmem>>, vector<32x128xf32>
    tpu.vector_store %arg3[%c0_7, %c0_8], %8 {strides = array<i32>} : memref<32x128xf32, #tpu.memory_space<vmem>>, vector<32x128xf32>,
    %10 = arith.subf %0, %3 : vector<32x128xf32>
    %c0_9 = arith.constant 0 : index
    %c0_10 = arith.constant 0 : index
    %11 = vector.load %arg4[%c0_9, %c0_10] : memref<32x128xf32, #tpu.memory_space<vmem>>, vector<32x128xf32>
    tpu.vector_store %arg4[%c0_9, %c0_10], %10 {strides = array<i32>} : memref<32x128xf32, #tpu.memory_space<vmem>>, vector<32x128xf32>,
    %cst_11 = arith.constant 8.000000e+00 : f32
    %12 = vector.broadcast %cst_11 : f32 to vector<32x128xf32>
    %13 = arith.mulf %12, %0 : vector<32x128xf32>
    %14 = arith.subf %13, %5 : vector<32x128xf32>
    %cst_12 = arith.constant 8.000000e+00 : f32
    %15 = vector.broadcast %cst_12 : f32 to vector<32x128xf32>
    %16 = arith.mulf %15, %0 : vector<32x128xf32>
    %17 = arith.mulf %16, %0 : vector<32x128xf32>
    %cst_13 = arith.constant 2.000000e+00 : f32
    %18 = vector.broadcast %cst_13 : f32 to vector<32x128xf32>
    %19 = arith.mulf %18, %0 : vector<32x128xf32>
    %20 = arith.mulf %19, %5 : vector<32x128xf32>
    %21 = arith.subf %17, %20 : vector<32x128xf32>
    %22 = arith.addf %21, %7 : vector<32x128xf32>
    %cst_14 = arith.constant dense<0.000000e+00> : vector<128xf32>
    %23 = vector.multi_reduction <add>, %14, %cst_14 [0] : vector<32x128xf32> to vector<128xf32>
    %24 = vector.shape_cast %23 : vector<128xf32> to vector<1x128xf32>
    %c0_15 = arith.constant 0 : index
    %c0_16 = arith.constant 0 : index
    %c0_17 = arith.constant 0 : index
    %25 = vector.load %arg5[%c0_15, %c0_16, %c0_17] : memref<1x1x128xf32, #tpu.memory_space<vmem>>, vector<1x1x128xf32>
    %26 = vector.shape_cast %25 : vector<1x1x128xf32> to vector<1x128xf32>
    %27 = vector.shape_cast %24 : vector<1x128xf32> to vector<1x1x128xf32>
    tpu.vector_store %arg5[%c0_15, %c0_16, %c0_17], %27 {strides = array<i32>} : memref<1x1x128xf32, #tpu.memory_space<vmem>>, vector<1x1x128xf32>,
    %cst_18 = arith.constant dense<0.000000e+00> : vector<128xf32>
    %28 = vector.multi_reduction <add>, %22, %cst_18 [0] : vector<32x128xf32> to vector<128xf32>
    %29 = vector.shape_cast %28 : vector<128xf32> to vector<1x128xf32>
    %c0_19 = arith.constant 0 : index
    %c0_20 = arith.constant 0 : index
    %c0_21 = arith.constant 0 : index
    %30 = vector.load %arg6[%c0_19, %c0_20, %c0_21] : memref<1x1x128xf32, #tpu.memory_space<vmem>>, vector<1x1x128xf32>
    %31 = vector.shape_cast %30 : vector<1x1x128xf32> to vector<1x128xf32>
    %32 = vector.shape_cast %29 : vector<1x128xf32> to vector<1x1x128xf32>
    tpu.vector_store %arg6[%c0_19, %c0_20, %c0_21], %32 {strides = array<i32>} : memref<1x1x128xf32, #tpu.memory_space<vmem>>, vector<1x1x128xf32>,
    return
  }
  func.func @transform_0(%arg0: i32) -> (i32, i32) {
    %c0_i32 = arith.constant 0 : i32
    %c0_i32_0 = arith.constant 0 : i32
    return %arg0, %c0_i32 : i32, i32
  }
  func.func @transform_1(%arg0: i32) -> (i32, i32, i32) {
    %c0_i32 = arith.constant 0 : i32
    %c0_i32_0 = arith.constant 0 : i32
    %c0_i32_1 = arith.constant 0 : i32
    return %arg0, %c0_i32, %c0_i32_0 : i32, i32, i32
  }
  func.func @transform_2(%arg0: i32) -> (i32, i32) {
    %c0_i32 = arith.constant 0 : i32
    %c0_i32_0 = arith.constant 0 : i32
    return %arg0, %c0_i32 : i32, i32
  }
  func.func @transform_3(%arg0: i32) -> (i32, i32) {
    %c0_i32 = arith.constant 0 : i32
    %c0_i32_0 = arith.constant 0 : i32
    return %arg0, %c0_i32 : i32, i32
  }
  func.func @transform_4(%arg0: i32) -> (i32, i32, i32) {
    %c0_i32 = arith.constant 0 : i32
    %c0_i32_0 = arith.constant 0 : i32
    %c0_i32_1 = arith.constant 0 : i32
    return %arg0, %c0_i32, %c0_i32_0 : i32, i32, i32
  }
  func.func @transform_5(%arg0: i32) -> (i32, i32, i32) {
    %c0_i32 = arith.constant 0 : i32
    %c0_i32_0 = arith.constant 0 : i32
    %c0_i32_1 = arith.constant 0 : i32
    return %arg0, %c0_i32, %c0_i32_0 : i32, i32, i32
  }
}

module attributes {stable_mosaic.version = 11 : i64} {
  func.func @fuse_apply_kernel(%arg0: i32, %arg1: i32, %arg2: memref<1x16x128xf32, #tpu.memory_space<vmem>>, %arg3: memref<1x1x128xf32, #tpu.memory_space<vmem>>, %arg4: memref<1x1x128xf32, #tpu.memory_space<vmem>>, %arg5: memref<128x128xbf16, #tpu.memory_space<vmem>>, %arg6: memref<1x128xf32, #tpu.memory_space<vmem>>, %arg7: memref<1x16x128xf32, #tpu.memory_space<vmem>>, %arg8: memref<1x1x1x128xf32, #tpu.memory_space<vmem>>, %arg9: memref<1x1x1x128xf32, #tpu.memory_space<vmem>>) attributes {dimension_semantics = [#tpu.dimension_semantics<parallel>, #tpu.dimension_semantics<parallel>], iteration_bounds = array<i64: 2, 1>, scalar_prefetch = 0 : i64, scratch_operands = 0 : i64, tpu.core_type = #tpu.core_type<tc>, window_params = [{transform_indices = @transform_0, window_bounds = array<i64: 1, 16, 128>}, {transform_indices = @transform_1, window_bounds = array<i64: 1, 1, 128>}, {transform_indices = @transform_2, window_bounds = array<i64: 1, 1, 128>}, {pipeline_mode = #tpu.pipeline_mode<synchronous>, transform_indices = @transform_3, window_bounds = array<i64: 128, 128>}, {pipeline_mode = #tpu.pipeline_mode<synchronous>, transform_indices = @transform_4, window_bounds = array<i64: 1, 128>}, {transform_indices = @transform_5, window_bounds = array<i64: 1, 16, 128>}, {transform_indices = @transform_6, window_bounds = array<i64: 1, 1, 1, 128>}, {transform_indices = @transform_7, window_bounds = array<i64: 1, 1, 1, 128>}]} {
    %c0 = arith.constant 0 : index
    %c0_0 = arith.constant 0 : index
    %c0_1 = arith.constant 0 : index
    %0 = vector.load %arg2[%c0, %c0_0, %c0_1] : memref<1x16x128xf32, #tpu.memory_space<vmem>>, vector<1x16x128xf32>
    %1 = vector.shape_cast %0 : vector<1x16x128xf32> to vector<16x128xf32>
    %c0_2 = arith.constant 0 : index
    %c0_3 = arith.constant 0 : index
    %c0_4 = arith.constant 0 : index
    %2 = vector.load %arg3[%c0_2, %c0_3, %c0_4] : memref<1x1x128xf32, #tpu.memory_space<vmem>>, vector<1x1x128xf32>
    %3 = vector.shape_cast %2 : vector<1x1x128xf32> to vector<1x128xf32>
    %4 = vector.broadcast %3 : vector<1x128xf32> to vector<16x128xf32>
    %5 = arith.mulf %1, %4 : vector<16x128xf32>
    %c0_5 = arith.constant 0 : index
    %c0_6 = arith.constant 0 : index
    %c0_7 = arith.constant 0 : index
    %6 = vector.load %arg4[%c0_5, %c0_6, %c0_7] : memref<1x1x128xf32, #tpu.memory_space<vmem>>, vector<1x1x128xf32>
    %7 = vector.shape_cast %6 : vector<1x1x128xf32> to vector<1x128xf32>
    %8 = vector.broadcast %7 : vector<1x128xf32> to vector<16x128xf32>
    %9 = arith.addf %5, %8 : vector<16x128xf32>
    %cst = arith.constant 0.000000e+00 : f32
    %10 = vector.broadcast %cst : f32 to vector<16x128xf32>
    %11 = arith.maximumf %9, %10 : vector<16x128xf32>
    %12 = arith.truncf %11 : vector<16x128xf32> to vector<16x128xbf16>
    %c0_8 = arith.constant 0 : index
    %c0_9 = arith.constant 0 : index
    %13 = vector.load %arg5[%c0_8, %c0_9] : memref<128x128xbf16, #tpu.memory_space<vmem>>, vector<128x128xbf16>
    %cst_10 = arith.constant dense<0.000000e+00> : vector<16x128xf32>
    %14 = tpu.matmul %12, %13, %cst_10 {dimension_numbers = #tpu.dot_dimension_numbers<[1], [0], [0], [1], [0, 0, 1, 1], [], []>} : vector<16x128xbf16>, vector<128x128xbf16>, vector<16x128xf32> -> vector<16x128xf32>
    %c0_11 = arith.constant 0 : index
    %c0_12 = arith.constant 0 : index
    %15 = vector.load %arg6[%c0_11, %c0_12] : memref<1x128xf32, #tpu.memory_space<vmem>>, vector<1x128xf32>
    %16 = vector.broadcast %15 : vector<1x128xf32> to vector<16x128xf32>
    %17 = arith.addf %14, %16 : vector<16x128xf32>
    %c0_13 = arith.constant 0 : index
    %c0_14 = arith.constant 0 : index
    %c0_15 = arith.constant 0 : index
    %18 = vector.load %arg7[%c0_13, %c0_14, %c0_15] : memref<1x16x128xf32, #tpu.memory_space<vmem>>, vector<1x16x128xf32>
    %19 = vector.shape_cast %18 : vector<1x16x128xf32> to vector<16x128xf32>
    %20 = vector.shape_cast %17 : vector<16x128xf32> to vector<1x16x128xf32>
    tpu.vector_store %arg7[%c0_13, %c0_14, %c0_15], %20 {strides = array<i32>} : memref<1x16x128xf32, #tpu.memory_space<vmem>>, vector<1x16x128xf32>,
    %cst_16 = arith.constant dense<0.000000e+00> : vector<128xf32>
    %21 = vector.multi_reduction <add>, %17, %cst_16 [0] : vector<16x128xf32> to vector<128xf32>
    %22 = vector.shape_cast %21 : vector<128xf32> to vector<1x128xf32>
    %c0_17 = arith.constant 0 : index
    %c0_18 = arith.constant 0 : index
    %c0_19 = arith.constant 0 : index
    %c0_20 = arith.constant 0 : index
    %23 = vector.load %arg8[%c0_17, %c0_18, %c0_19, %c0_20] : memref<1x1x1x128xf32, #tpu.memory_space<vmem>>, vector<1x1x1x128xf32>
    %24 = vector.shape_cast %23 : vector<1x1x1x128xf32> to vector<1x128xf32>
    %25 = vector.shape_cast %22 : vector<1x128xf32> to vector<1x1x1x128xf32>
    tpu.vector_store %arg8[%c0_17, %c0_18, %c0_19, %c0_20], %25 {strides = array<i32>} : memref<1x1x1x128xf32, #tpu.memory_space<vmem>>, vector<1x1x1x128xf32>,
    %26 = arith.mulf %17, %17 : vector<16x128xf32>
    %cst_21 = arith.constant dense<0.000000e+00> : vector<128xf32>
    %27 = vector.multi_reduction <add>, %26, %cst_21 [0] : vector<16x128xf32> to vector<128xf32>
    %28 = vector.shape_cast %27 : vector<128xf32> to vector<1x128xf32>
    %c0_22 = arith.constant 0 : index
    %c0_23 = arith.constant 0 : index
    %c0_24 = arith.constant 0 : index
    %c0_25 = arith.constant 0 : index
    %29 = vector.load %arg9[%c0_22, %c0_23, %c0_24, %c0_25] : memref<1x1x1x128xf32, #tpu.memory_space<vmem>>, vector<1x1x1x128xf32>
    %30 = vector.shape_cast %29 : vector<1x1x1x128xf32> to vector<1x128xf32>
    %31 = vector.shape_cast %28 : vector<1x128xf32> to vector<1x1x1x128xf32>
    tpu.vector_store %arg9[%c0_22, %c0_23, %c0_24, %c0_25], %31 {strides = array<i32>} : memref<1x1x1x128xf32, #tpu.memory_space<vmem>>, vector<1x1x1x128xf32>,
    return
  }
  func.func @transform_0(%arg0: i32, %arg1: i32) -> (i32, i32, i32) {
    %c0_i32 = arith.constant 0 : i32
    %c0_i32_0 = arith.constant 0 : i32
    return %arg0, %arg1, %c0_i32 : i32, i32, i32
  }
  func.func @transform_1(%arg0: i32, %arg1: i32) -> (i32, i32, i32) {
    %c0_i32 = arith.constant 0 : i32
    %c0_i32_0 = arith.constant 0 : i32
    %c0_i32_1 = arith.constant 0 : i32
    return %arg0, %c0_i32, %c0_i32_0 : i32, i32, i32
  }
  func.func @transform_2(%arg0: i32, %arg1: i32) -> (i32, i32, i32) {
    %c0_i32 = arith.constant 0 : i32
    %c0_i32_0 = arith.constant 0 : i32
    %c0_i32_1 = arith.constant 0 : i32
    return %arg0, %c0_i32, %c0_i32_0 : i32, i32, i32
  }
  func.func @transform_3(%arg0: i32, %arg1: i32) -> (i32, i32) {
    %c0_i32 = arith.constant 0 : i32
    %c0_i32_0 = arith.constant 0 : i32
    %c0_i32_1 = arith.constant 0 : i32
    return %c0_i32, %c0_i32_0 : i32, i32
  }
  func.func @transform_4(%arg0: i32, %arg1: i32) -> (i32, i32) {
    %c0_i32 = arith.constant 0 : i32
    %c0_i32_0 = arith.constant 0 : i32
    %c0_i32_1 = arith.constant 0 : i32
    return %c0_i32, %c0_i32_0 : i32, i32
  }
  func.func @transform_5(%arg0: i32, %arg1: i32) -> (i32, i32, i32) {
    %c0_i32 = arith.constant 0 : i32
    %c0_i32_0 = arith.constant 0 : i32
    return %arg0, %arg1, %c0_i32 : i32, i32, i32
  }
  func.func @transform_6(%arg0: i32, %arg1: i32) -> (i32, i32, i32, i32) {
    %c0_i32 = arith.constant 0 : i32
    %c0_i32_0 = arith.constant 0 : i32
    %c0_i32_1 = arith.constant 0 : i32
    return %arg0, %arg1, %c0_i32, %c0_i32_0 : i32, i32, i32, i32
  }
  func.func @transform_7(%arg0: i32, %arg1: i32) -> (i32, i32, i32, i32) {
    %c0_i32 = arith.constant 0 : i32
    %c0_i32_0 = arith.constant 0 : i32
    %c0_i32_1 = arith.constant 0 : i32
    return %arg0, %arg1, %c0_i32, %c0_i32_0 : i32, i32, i32, i32
  }
}

module attributes {stable_mosaic.version = 11 : i64} {
  func.func @fuse_resid_kernel(%arg0: i32, %arg1: i32, %arg2: memref<1x16x128xf32, #tpu.memory_space<vmem>>, %arg3: memref<1x1x128xf32, #tpu.memory_space<vmem>>, %arg4: memref<1x1x128xf32, #tpu.memory_space<vmem>>, %arg5: memref<1x16x128xf32, #tpu.memory_space<vmem>>, %arg6: memref<128x128xbf16, #tpu.memory_space<vmem>>, %arg7: memref<1x128xf32, #tpu.memory_space<vmem>>, %arg8: memref<1x16x128xf32, #tpu.memory_space<vmem>>, %arg9: memref<1x16x128xf32, #tpu.memory_space<vmem>>, %arg10: memref<1x1x1x128xf32, #tpu.memory_space<vmem>>, %arg11: memref<1x1x1x128xf32, #tpu.memory_space<vmem>>) attributes {dimension_semantics = [#tpu.dimension_semantics<parallel>, #tpu.dimension_semantics<parallel>], iteration_bounds = array<i64: 2, 1>, scalar_prefetch = 0 : i64, scratch_operands = 0 : i64, tpu.core_type = #tpu.core_type<tc>, window_params = [{transform_indices = @transform_0, window_bounds = array<i64: 1, 16, 128>}, {transform_indices = @transform_1, window_bounds = array<i64: 1, 1, 128>}, {transform_indices = @transform_2, window_bounds = array<i64: 1, 1, 128>}, {transform_indices = @transform_3, window_bounds = array<i64: 1, 16, 128>}, {pipeline_mode = #tpu.pipeline_mode<synchronous>, transform_indices = @transform_4, window_bounds = array<i64: 128, 128>}, {pipeline_mode = #tpu.pipeline_mode<synchronous>, transform_indices = @transform_5, window_bounds = array<i64: 1, 128>}, {transform_indices = @transform_6, window_bounds = array<i64: 1, 16, 128>}, {transform_indices = @transform_7, window_bounds = array<i64: 1, 16, 128>}, {transform_indices = @transform_8, window_bounds = array<i64: 1, 1, 1, 128>}, {transform_indices = @transform_9, window_bounds = array<i64: 1, 1, 1, 128>}]} {
    %c0 = arith.constant 0 : index
    %c0_0 = arith.constant 0 : index
    %c0_1 = arith.constant 0 : index
    %0 = vector.load %arg2[%c0, %c0_0, %c0_1] : memref<1x16x128xf32, #tpu.memory_space<vmem>>, vector<1x16x128xf32>
    %1 = vector.shape_cast %0 : vector<1x16x128xf32> to vector<16x128xf32>
    %c0_2 = arith.constant 0 : index
    %c0_3 = arith.constant 0 : index
    %c0_4 = arith.constant 0 : index
    %2 = vector.load %arg3[%c0_2, %c0_3, %c0_4] : memref<1x1x128xf32, #tpu.memory_space<vmem>>, vector<1x1x128xf32>
    %3 = vector.shape_cast %2 : vector<1x1x128xf32> to vector<1x128xf32>
    %4 = vector.broadcast %3 : vector<1x128xf32> to vector<16x128xf32>
    %5 = arith.mulf %1, %4 : vector<16x128xf32>
    %c0_5 = arith.constant 0 : index
    %c0_6 = arith.constant 0 : index
    %c0_7 = arith.constant 0 : index
    %6 = vector.load %arg4[%c0_5, %c0_6, %c0_7] : memref<1x1x128xf32, #tpu.memory_space<vmem>>, vector<1x1x128xf32>
    %7 = vector.shape_cast %6 : vector<1x1x128xf32> to vector<1x128xf32>
    %8 = vector.broadcast %7 : vector<1x128xf32> to vector<16x128xf32>
    %9 = arith.addf %5, %8 : vector<16x128xf32>
    %c0_8 = arith.constant 0 : index
    %c0_9 = arith.constant 0 : index
    %c0_10 = arith.constant 0 : index
    %10 = vector.load %arg5[%c0_8, %c0_9, %c0_10] : memref<1x16x128xf32, #tpu.memory_space<vmem>>, vector<1x16x128xf32>
    %11 = vector.shape_cast %10 : vector<1x16x128xf32> to vector<16x128xf32>
    %12 = arith.addf %9, %11 : vector<16x128xf32>
    %cst = arith.constant 0.000000e+00 : f32
    %13 = vector.broadcast %cst : f32 to vector<16x128xf32>
    %14 = arith.maximumf %12, %13 : vector<16x128xf32>
    %c0_11 = arith.constant 0 : index
    %c0_12 = arith.constant 0 : index
    %c0_13 = arith.constant 0 : index
    %15 = vector.load %arg8[%c0_11, %c0_12, %c0_13] : memref<1x16x128xf32, #tpu.memory_space<vmem>>, vector<1x16x128xf32>
    %16 = vector.shape_cast %15 : vector<1x16x128xf32> to vector<16x128xf32>
    %17 = vector.shape_cast %14 : vector<16x128xf32> to vector<1x16x128xf32>
    tpu.vector_store %arg8[%c0_11, %c0_12, %c0_13], %17 {strides = array<i32>} : memref<1x16x128xf32, #tpu.memory_space<vmem>>, vector<1x16x128xf32>,
    %18 = arith.truncf %14 : vector<16x128xf32> to vector<16x128xbf16>
    %c0_14 = arith.constant 0 : index
    %c0_15 = arith.constant 0 : index
    %19 = vector.load %arg6[%c0_14, %c0_15] : memref<128x128xbf16, #tpu.memory_space<vmem>>, vector<128x128xbf16>
    %cst_16 = arith.constant dense<0.000000e+00> : vector<16x128xf32>
    %20 = tpu.matmul %18, %19, %cst_16 {dimension_numbers = #tpu.dot_dimension_numbers<[1], [0], [0], [1], [0, 0, 1, 1], [], []>} : vector<16x128xbf16>, vector<128x128xbf16>, vector<16x128xf32> -> vector<16x128xf32>
    %c0_17 = arith.constant 0 : index
    %c0_18 = arith.constant 0 : index
    %21 = vector.load %arg7[%c0_17, %c0_18] : memref<1x128xf32, #tpu.memory_space<vmem>>, vector<1x128xf32>
    %22 = vector.broadcast %21 : vector<1x128xf32> to vector<16x128xf32>
    %23 = arith.addf %20, %22 : vector<16x128xf32>
    %c0_19 = arith.constant 0 : index
    %c0_20 = arith.constant 0 : index
    %c0_21 = arith.constant 0 : index
    %24 = vector.load %arg9[%c0_19, %c0_20, %c0_21] : memref<1x16x128xf32, #tpu.memory_space<vmem>>, vector<1x16x128xf32>
    %25 = vector.shape_cast %24 : vector<1x16x128xf32> to vector<16x128xf32>
    %26 = vector.shape_cast %23 : vector<16x128xf32> to vector<1x16x128xf32>
    tpu.vector_store %arg9[%c0_19, %c0_20, %c0_21], %26 {strides = array<i32>} : memref<1x16x128xf32, #tpu.memory_space<vmem>>, vector<1x16x128xf32>,
    %cst_22 = arith.constant dense<0.000000e+00> : vector<128xf32>
    %27 = vector.multi_reduction <add>, %23, %cst_22 [0] : vector<16x128xf32> to vector<128xf32>
    %28 = vector.shape_cast %27 : vector<128xf32> to vector<1x128xf32>
    %c0_23 = arith.constant 0 : index
    %c0_24 = arith.constant 0 : index
    %c0_25 = arith.constant 0 : index
    %c0_26 = arith.constant 0 : index
    %29 = vector.load %arg10[%c0_23, %c0_24, %c0_25, %c0_26] : memref<1x1x1x128xf32, #tpu.memory_space<vmem>>, vector<1x1x1x128xf32>
    %30 = vector.shape_cast %29 : vector<1x1x1x128xf32> to vector<1x128xf32>
    %31 = vector.shape_cast %28 : vector<1x128xf32> to vector<1x1x1x128xf32>
    tpu.vector_store %arg10[%c0_23, %c0_24, %c0_25, %c0_26], %31 {strides = array<i32>} : memref<1x1x1x128xf32, #tpu.memory_space<vmem>>, vector<1x1x1x128xf32>,
    %32 = arith.mulf %23, %23 : vector<16x128xf32>
    %cst_27 = arith.constant dense<0.000000e+00> : vector<128xf32>
    %33 = vector.multi_reduction <add>, %32, %cst_27 [0] : vector<16x128xf32> to vector<128xf32>
    %34 = vector.shape_cast %33 : vector<128xf32> to vector<1x128xf32>
    %c0_28 = arith.constant 0 : index
    %c0_29 = arith.constant 0 : index
    %c0_30 = arith.constant 0 : index
    %c0_31 = arith.constant 0 : index
    %35 = vector.load %arg11[%c0_28, %c0_29, %c0_30, %c0_31] : memref<1x1x1x128xf32, #tpu.memory_space<vmem>>, vector<1x1x1x128xf32>
    %36 = vector.shape_cast %35 : vector<1x1x1x128xf32> to vector<1x128xf32>
    %37 = vector.shape_cast %34 : vector<1x128xf32> to vector<1x1x1x128xf32>
    tpu.vector_store %arg11[%c0_28, %c0_29, %c0_30, %c0_31], %37 {strides = array<i32>} : memref<1x1x1x128xf32, #tpu.memory_space<vmem>>, vector<1x1x1x128xf32>,
    return
  }
  func.func @transform_0(%arg0: i32, %arg1: i32) -> (i32, i32, i32) {
    %c0_i32 = arith.constant 0 : i32
    %c0_i32_0 = arith.constant 0 : i32
    return %arg0, %arg1, %c0_i32 : i32, i32, i32
  }
  func.func @transform_1(%arg0: i32, %arg1: i32) -> (i32, i32, i32) {
    %c0_i32 = arith.constant 0 : i32
    %c0_i32_0 = arith.constant 0 : i32
    %c0_i32_1 = arith.constant 0 : i32
    return %arg0, %c0_i32, %c0_i32_0 : i32, i32, i32
  }
  func.func @transform_2(%arg0: i32, %arg1: i32) -> (i32, i32, i32) {
    %c0_i32 = arith.constant 0 : i32
    %c0_i32_0 = arith.constant 0 : i32
    %c0_i32_1 = arith.constant 0 : i32
    return %arg0, %c0_i32, %c0_i32_0 : i32, i32, i32
  }
  func.func @transform_3(%arg0: i32, %arg1: i32) -> (i32, i32, i32) {
    %c0_i32 = arith.constant 0 : i32
    %c0_i32_0 = arith.constant 0 : i32
    return %arg0, %arg1, %c0_i32 : i32, i32, i32
  }
  func.func @transform_4(%arg0: i32, %arg1: i32) -> (i32, i32) {
    %c0_i32 = arith.constant 0 : i32
    %c0_i32_0 = arith.constant 0 : i32
    %c0_i32_1 = arith.constant 0 : i32
    return %c0_i32, %c0_i32_0 : i32, i32
  }
  func.func @transform_5(%arg0: i32, %arg1: i32) -> (i32, i32) {
    %c0_i32 = arith.constant 0 : i32
    %c0_i32_0 = arith.constant 0 : i32
    %c0_i32_1 = arith.constant 0 : i32
    return %c0_i32, %c0_i32_0 : i32, i32
  }
  func.func @transform_6(%arg0: i32, %arg1: i32) -> (i32, i32, i32) {
    %c0_i32 = arith.constant 0 : i32
    %c0_i32_0 = arith.constant 0 : i32
    return %arg0, %arg1, %c0_i32 : i32, i32, i32
  }
  func.func @transform_7(%arg0: i32, %arg1: i32) -> (i32, i32, i32) {
    %c0_i32 = arith.constant 0 : i32
    %c0_i32_0 = arith.constant 0 : i32
    return %arg0, %arg1, %c0_i32 : i32, i32, i32
  }
  func.func @transform_8(%arg0: i32, %arg1: i32) -> (i32, i32, i32, i32) {
    %c0_i32 = arith.constant 0 : i32
    %c0_i32_0 = arith.constant 0 : i32
    %c0_i32_1 = arith.constant 0 : i32
    return %arg0, %arg1, %c0_i32, %c0_i32_0 : i32, i32, i32, i32
  }
  func.func @transform_9(%arg0: i32, %arg1: i32) -> (i32, i32, i32, i32) {
    %c0_i32 = arith.constant 0 : i32
    %c0_i32_0 = arith.constant 0 : i32
    %c0_i32_1 = arith.constant 0 : i32
    return %arg0, %arg1, %c0_i32, %c0_i32_0 : i32, i32, i32, i32
  }
}

module attributes {stable_mosaic.version = 11 : i64} {
  func.func @head_kernel(%arg0: i32, %arg1: i32, %arg2: memref<1x16x128xf32, #tpu.memory_space<vmem>>, %arg3: memref<1x1x128xf32, #tpu.memory_space<vmem>>, %arg4: memref<1x1x128xf32, #tpu.memory_space<vmem>>, %arg5: memref<1x16x128xf32, #tpu.memory_space<vmem>>, %arg6: memref<1x128xf32, #tpu.memory_space<vmem>>, %arg7: memref<1x1xf32, #tpu.memory_space<vmem>>, %arg8: memref<1x1x16xf32, #tpu.memory_space<vmem>>) attributes {dimension_semantics = [#tpu.dimension_semantics<parallel>, #tpu.dimension_semantics<parallel>], iteration_bounds = array<i64: 2, 1>, scalar_prefetch = 0 : i64, scratch_operands = 0 : i64, tpu.core_type = #tpu.core_type<tc>, window_params = [{transform_indices = @transform_0, window_bounds = array<i64: 1, 16, 128>}, {transform_indices = @transform_1, window_bounds = array<i64: 1, 1, 128>}, {transform_indices = @transform_2, window_bounds = array<i64: 1, 1, 128>}, {transform_indices = @transform_3, window_bounds = array<i64: 1, 16, 128>}, {pipeline_mode = #tpu.pipeline_mode<synchronous>, transform_indices = @transform_4, window_bounds = array<i64: 1, 128>}, {pipeline_mode = #tpu.pipeline_mode<synchronous>, transform_indices = @transform_5, window_bounds = array<i64: 1, 1>}, {transform_indices = @transform_6, window_bounds = array<i64: 1, 1, 16>}]} {
    %c0 = arith.constant 0 : index
    %c0_0 = arith.constant 0 : index
    %c0_1 = arith.constant 0 : index
    %0 = vector.load %arg2[%c0, %c0_0, %c0_1] : memref<1x16x128xf32, #tpu.memory_space<vmem>>, vector<1x16x128xf32>
    %1 = vector.shape_cast %0 : vector<1x16x128xf32> to vector<16x128xf32>
    %c0_2 = arith.constant 0 : index
    %c0_3 = arith.constant 0 : index
    %c0_4 = arith.constant 0 : index
    %2 = vector.load %arg3[%c0_2, %c0_3, %c0_4] : memref<1x1x128xf32, #tpu.memory_space<vmem>>, vector<1x1x128xf32>
    %3 = vector.shape_cast %2 : vector<1x1x128xf32> to vector<1x128xf32>
    %4 = vector.broadcast %3 : vector<1x128xf32> to vector<16x128xf32>
    %5 = arith.mulf %1, %4 : vector<16x128xf32>
    %c0_5 = arith.constant 0 : index
    %c0_6 = arith.constant 0 : index
    %c0_7 = arith.constant 0 : index
    %6 = vector.load %arg4[%c0_5, %c0_6, %c0_7] : memref<1x1x128xf32, #tpu.memory_space<vmem>>, vector<1x1x128xf32>
    %7 = vector.shape_cast %6 : vector<1x1x128xf32> to vector<1x128xf32>
    %8 = vector.broadcast %7 : vector<1x128xf32> to vector<16x128xf32>
    %9 = arith.addf %5, %8 : vector<16x128xf32>
    %c0_8 = arith.constant 0 : index
    %c0_9 = arith.constant 0 : index
    %c0_10 = arith.constant 0 : index
    %10 = vector.load %arg5[%c0_8, %c0_9, %c0_10] : memref<1x16x128xf32, #tpu.memory_space<vmem>>, vector<1x16x128xf32>
    %11 = vector.shape_cast %10 : vector<1x16x128xf32> to vector<16x128xf32>
    %12 = arith.addf %9, %11 : vector<16x128xf32>
    %cst = arith.constant 0.000000e+00 : f32
    %13 = vector.broadcast %cst : f32 to vector<16x128xf32>
    %14 = arith.maximumf %12, %13 : vector<16x128xf32>
    %c0_11 = arith.constant 0 : index
    %c0_12 = arith.constant 0 : index
    %15 = vector.load %arg6[%c0_11, %c0_12] : memref<1x128xf32, #tpu.memory_space<vmem>>, vector<1x128xf32>
    %cst_13 = arith.constant dense<0.000000e+00> : vector<1x16xf32>
    %16 = tpu.matmul %15, %14, %cst_13 {dimension_numbers = #tpu.dot_dimension_numbers<[1], [1], [0], [0], [0, 0, 1, 0], [], []>} : vector<1x128xf32>, vector<16x128xf32>, vector<1x16xf32> -> vector<1x16xf32>
    %c0_14 = arith.constant 0 : index
    %c0_15 = arith.constant 0 : index
    %17 = vector.load %arg7[%c0_14, %c0_15] : memref<1x1xf32, #tpu.memory_space<vmem>>, vector<1x1xf32>
    %18 = vector.broadcast %17 : vector<1x1xf32> to vector<1x16xf32>
    %19 = arith.addf %16, %18 : vector<1x16xf32>
    %c0_16 = arith.constant 0 : index
    %c0_17 = arith.constant 0 : index
    %c0_18 = arith.constant 0 : index
    %20 = vector.load %arg8[%c0_16, %c0_17, %c0_18] : memref<1x1x16xf32, #tpu.memory_space<vmem>>, vector<1x1x16xf32>
    %21 = vector.shape_cast %20 : vector<1x1x16xf32> to vector<1x16xf32>
    %22 = vector.shape_cast %19 : vector<1x16xf32> to vector<1x1x16xf32>
    tpu.vector_store %arg8[%c0_16, %c0_17, %c0_18], %22 {strides = array<i32>} : memref<1x1x16xf32, #tpu.memory_space<vmem>>, vector<1x1x16xf32>,
    return
  }
  func.func @transform_0(%arg0: i32, %arg1: i32) -> (i32, i32, i32) {
    %c0_i32 = arith.constant 0 : i32
    %c0_i32_0 = arith.constant 0 : i32
    return %arg0, %arg1, %c0_i32 : i32, i32, i32
  }
  func.func @transform_1(%arg0: i32, %arg1: i32) -> (i32, i32, i32) {
    %c0_i32 = arith.constant 0 : i32
    %c0_i32_0 = arith.constant 0 : i32
    %c0_i32_1 = arith.constant 0 : i32
    return %arg0, %c0_i32, %c0_i32_0 : i32, i32, i32
  }
  func.func @transform_2(%arg0: i32, %arg1: i32) -> (i32, i32, i32) {
    %c0_i32 = arith.constant 0 : i32
    %c0_i32_0 = arith.constant 0 : i32
    %c0_i32_1 = arith.constant 0 : i32
    return %arg0, %c0_i32, %c0_i32_0 : i32, i32, i32
  }
  func.func @transform_3(%arg0: i32, %arg1: i32) -> (i32, i32, i32) {
    %c0_i32 = arith.constant 0 : i32
    %c0_i32_0 = arith.constant 0 : i32
    return %arg0, %arg1, %c0_i32 : i32, i32, i32
  }
  func.func @transform_4(%arg0: i32, %arg1: i32) -> (i32, i32) {
    %c0_i32 = arith.constant 0 : i32
    %c0_i32_0 = arith.constant 0 : i32
    %c0_i32_1 = arith.constant 0 : i32
    return %c0_i32, %c0_i32_0 : i32, i32
  }
  func.func @transform_5(%arg0: i32, %arg1: i32) -> (i32, i32) {
    %c0_i32 = arith.constant 0 : i32
    %c0_i32_0 = arith.constant 0 : i32
    %c0_i32_1 = arith.constant 0 : i32
    return %c0_i32, %c0_i32_0 : i32, i32
  }
  func.func @transform_6(%arg0: i32, %arg1: i32) -> (i32, i32, i32) {
    %c0_i32 = arith.constant 0 : i32
    %c0_i32_0 = arith.constant 0 : i32
    return %arg0, %c0_i32, %arg1 : i32, i32, i32
  }
}

</mosaic_0001>

<bundles_post_ra>
// kernel: nm_block_forward.13
= control target key start
LH: loop header
LB: loop body
LE: loop exit
PB: predicated region body
PF: predicated region fallthrough
CT: control target
= control target key end

     0   :  { %s285_s6 = smov 0   ;;  %s309_s0 = inlined_call_operand.vmem [shape: f32[2,16,128], index: 0, kind: input, shape index: {}]   ;;  %s310_s1 = inlined_call_operand.vmem [shape: f32[2,16,2], index: 1, kind: output, shape index: {}]  }
   0x1 LB: > { %s232_s7 = sadd.s32 4294967295, %s273_s6   ;;  %p236_p0 = scmp.ge.s32.totalorder %s273_s6, 1  ;;  %s273_s6 = sphi %s285_s6, %s11_s6  }
   0x2   : > { %p87_p1 = scmp.lt.s32.totalorder %s273_s6, 3 }
   0x4   : > { %p88_p2 = pnand %p236_p0, %p87_p1 }
   0x5   : > { %p107_p3 = scmp.lt.s32.totalorder (!%p88_p2), %s232_s7, 1 }
   0x6   : > { %91 = sbr.rel (%p88_p2) target bundleno = 378 (0x17a), region = 24 }
   0xb   : > { %s312_s7 = smov (!%p107_p3, %s232_s7), 1  ;;  %vm171_vm4 = vcmask 7168   ;;  %vm174_vm5 = vcmask 15368  }
   0xc   : > { %s245_s8 = sshll.u32 %s312_s7, 4 }
   0xd   : > { %s111_s11 = scalar_lea.vmem %s309_s0, %s245_s8  ;;  %s116_s14 = scalar_lea.vmem %s310_s1, %s245_s8 }
   0xe   : > { %v117_v0 = vld [vmem:[%s111_s11] sm:$0xff]  ;;  %v118_v1 = vld [vmem:[%s111_s11 + $0x8] sm:$0xff] }
   0xf   : > { %v119_v2 = vmul.f32 %v117_v0, %v117_v0  ;;  %v120_v3 = vmul.f32 %v118_v1, %v118_v1 }
  0x11   : > { %121 = vadd.xlane.f32.xlu0 %v119_v2 }
  0x15   : > { %123 = vadd.xlane.f32.xlu0 %v120_v3 }
  0x9a   : > { %v122_v4 = vpop.xlane.xlu0 %121 }
  0x9b   : > { %255 = vrsqrt.f32 %v122_v4  ;;  %vm127_vm0 = vcmp.eq.f32.partialorder %v122_v4, inf  ;;  %v130_v8 = vand.u32 2147483648, %v122_v4  ;;  %vm129_vm1 = vcmp.eq.f32.partialorder %v122_v4, 0.0 }
  0x9e   : > { %v124_v5 = vpop.xlane.xlu0 %123 }
  0x9f   : > { %257 = vrsqrt.f32 %v124_v5  ;;  %vm134_vm2 = vcmp.eq.f32.partialorder %v124_v5, inf  ;;  %v137_v14 = vand.u32 2147483648, %v124_v5  ;;  %vm136_vm3 = vcmp.eq.f32.partialorder %v124_v5, 0.0 }
  0xa8   : > { %v256_v6 = vpop.eup %255 }
  0xa9   : > { %v126_v7 = vmul.f32 %v256_v6, %v122_v4 }
  0xab   : > { %v128_v9 = vsel %vm127_vm0, %v122_v4, %v126_v7 }
  0xac   : > { %v258_v10 = vpop.eup %257  ;;  %v131_v11 = vsel %vm129_vm1, %v130_v8, %v128_v9 }
  0xad   : > { %v133_v12 = vmul.f32 %v258_v10, %v124_v5  ;;  %v139_v13 = vadd.f32 1e-05, %v131_v11 }
  0xaf   : > { %v135_v15 = vsel %vm134_vm2, %v124_v5, %v133_v12  ;;  %259 = vrcp.f32 %v139_v13 }
  0xb0   : > { %v138_v16 = vsel %vm136_vm3, %v137_v14, %v135_v15 }
  0xb1   : > { %v140_v17 = vadd.f32 1e-05, %v138_v16 }
  0xb3   : > { %261 = vrcp.f32 %v140_v17 }
  0xbc   : > { %v260_v18 = vpop.eup %259 }
  0xbd   : > { %v142_v20 = vmul.f32 %v260_v18, %v117_v0 }
  0xc0   : > { %v262_v19 = vpop.eup %261 }
  0xc1   : > { %v144_v21 = vmul.f32 %v262_v19, %v118_v1 }
  0xc3   : > { %v145_v22 = vadd.f32 %v144_v21, %v142_v20 }
  0xc5   : > { %v146_v23 = vrot.slane %v145_v22, 4 }
  0xc7   : > { %v147_v24 = vadd.f32 %v146_v23, %v145_v22 }
  0xc9   : > { %v148_v25 = vrot.slane %v147_v24, 2 }
  0xcb   : > { %v149_v26 = vadd.f32 %v148_v25, %v147_v24 }
  0xcd   : > { %v150_v27 = vrot.slane %v149_v26, 1 }
  0xcf   : > { %v151_v28 = vadd.f32 %v150_v27, %v149_v26 }
  0xd1   : > { %v152_v29 = vmul.f32 %v151_v28, %v142_v20  ;;  %v153_v30 = vmul.f32 %v151_v28, %v144_v21 }
  0xd3   : > { %154 = vadd.xlane.f32.xlu1 %v152_v29 }
  0xd7   : > { %156 = vadd.xlane.f32.xlu1 %v153_v30 }
 0x15c   : > { %v155_v31 = vpop.xlane.xlu1 %154 }
 0x15d   : > { %v241_v32 = vadd.f32 -1.0, %v155_v31 }
 0x15f   : > { %v161_v33 = vmul.f32 0.0625, %v241_v32 }
 0x160   : > { %v157_v34 = vpop.xlane.xlu1 %156 }
 0x161   : > { %263 = vtanh.f32 %v161_v33  ;;  %v242_v35 = vadd.f32 -1.0, %v157_v34 }
 0x163   : > { %v162_v36 = vmul.f32 0.0625, %v242_v35 }
 0x165   : > { %265 = vtanh.f32 %v162_v36 }
 0x16e   : > { %v264_v37 = vpop.eup %263 }
 0x16f   : > { %v165_v38 = vmax.f32 %v264_v37, 0.0 }
 0x171   : > { %v167_v39 = vmul.f32 %v165_v38, %v165_v38  ;;  %172 = vst.msk [vmem:[%s116_s14] sm:$0xff] %vm171_vm4, %v165_v38 }
 0x172   : > { %v266_v40 = vpop.eup %265 }
 0x173   : > { %v169_v41 = vadd.f32 %v167_v39, %v122_v4  ;;  %v166_v42 = vmax.f32 %v266_v40, 0.0 }
 0x175   : > { %175 = vst.msk [vmem:[%s116_s14] sm:$0xff] %vm174_vm5, %v169_v41  ;;  %v168_v43 = vmul.f32 %v166_v42, %v166_v42 }
 0x176   : > { %173 = vst.msk [vmem:[%s116_s14 + $0x8] sm:$0xff] %vm171_vm4, %v166_v42 }
 0x177   : > { %v170_v44 = vadd.f32 %v168_v43, %v124_v5 }
 0x179   : > { %176 = vst.msk [vmem:[%s116_s14 + $0x8] sm:$0xff] %vm174_vm5, %v170_v44 }
 0x17a PF: > { %s11_s6 = sadd.s32 1, %s273_s6  }
 0x17b   : > { %p8_p4 = scmp.ge.s32.totalorder %s11_s6, 4  }
 0x17d   :  { %10 = sbr.rel (!%p8_p4) target bundleno = 1 (0x1), region = 54 }

// kernel: nm_block_forward.14
= control target key start
LH: loop header
LB: loop body
LE: loop exit
PB: predicated region body
PF: predicated region fallthrough
CT: control target
= control target key end

     0   :  { %s703_s15 = smov 0   ;;  %s705_s16 = smov 0   ;;  %s751_s0 = inlined_call_operand.vmem [shape: f32[2,16,128], index: 0, kind: input, shape index: {}, may-alias: {0,1}]   ;;  %s752_s1 = inlined_call_operand.vmem [shape: f32[2,16,128], index: 1, kind: input, shape index: {}, may-alias: {0,1}]   ;;  %s753_s2 = inlined_call_operand.vmem [shape: f32[2,16,2], index: 2, kind: input, shape index: {}]   ;;  %s754_s3 = inlined_call_operand.vmem [shape: f32[2,2,16], index: 3, kind: input, shape index: {}]   ;;  %s755_s4 = inlined_call_operand.vmem [shape: f32[2,16,16], index: 4, kind: output, shape index: {}]  }
   0x1   :  { %s707_s17 = smov 0  }
   0x2 LB: > { %s33_s18 = sadd.s32 1, %s668_s16  ;;  %p595_p0 = scmp.ge.s32.totalorder %s672_s17, 1  ;;  %s672_s17 = sphi %s707_s17, %s14_s17   ;;  %s668_s16 = sphi %s705_s16, %s757_s16   ;;  %s664_s15 = sphi %s703_s15, %s756_s15  }
   0x3   : > { %p35_p1 = scmp.ge.s32.totalorder %s33_s18, 2  ;;  %p240_p2 = scmp.lt.s32.totalorder %s672_s17, 3 }
   0x5   : > { %s759_s18 = smov (%p35_p1, %s33_s18), 0  ;;  %p241_p3 = pnand %p595_p0, %p240_p2 }
   0x6   : > { %p303_p4 = scmp.lt.s32.totalorder (!%p241_p3), %s664_s15, 1 }
   0x7   : > { %244 = sbr.rel (%p241_p3) target bundleno = 231 (0xe7), region = 36 }
   0xc   : > { %v674_v0 = vmov 0.0   ;;  %vm675_vm0 = vmmov 0   ;;  %s761_s15 = smov (!%p303_p4, %s664_s15), 1  ;;  %v676_v1 = vmov 0   ;;  %v677_v2 = vmov 1  }
   0xd   : > { %613 = vmatprep.subr.bf16.mxu0 %v674_v0  ;;  %615 = vmatprep.mubr.msk.bf16.mxu0 %vm675_vm0, %v674_v0  ;;  %s721_s19 = sshll.u32 %s761_s15, 4  ;;  %v372_v11 = vlaneseq  ;;  %s602_s29 = sshll.u32 %s761_s15, 1  ;;  %vm437_vm1 = vcmask 130048  }
   0xe   : > { %647 = vset.pattern.permute.xlu0 %v676_v1  ;;  %648 = vset.pattern.permute.xlu1 %v677_v2  ;;  %s320_s22 = scalar_lea.vmem %s752_s1, %s721_s19  ;;  %s310_s25 = scalar_lea.vmem %s751_s0, %s721_s19 }
   0xf   : > { %v356_v3 = vld [vmem:[%s320_s22] sm:$0xff]  ;;  %v357_v4 = vld [vmem:[%s320_s22 + $0x8] sm:$0xff]  ;;  %s330_s28 = scalar_lea.vmem %s753_s2, %s721_s19  ;;  %v373_v12 = vshrl.u32 %v372_v11, 7  ;;  %s338_s6 = scalar_lea.vmem %s754_s3, %s602_s29 }
  0x10   : > { %v358_v5 = vpack.c.bf16 %v357_v4, %v356_v3  ;;  %v359_v6 = vld [vmem:[%s330_s28] sm:$0xff]  ;;  %v354_v8 = vld [vmem:[%s310_s25 + $0x8] sm:$0xff]  ;;  %s350_s9 = scalar_lea.vmem %s755_s4, %s721_s19 }
  0x11   : > { %364 = vperm.xlu0 %647, %v359_v6   ;;  %422 = vperm.xlu1 %648, %v359_v6   ;;  %v353_v7 = vld [vmem:[%s310_s25] sm:$0xff]  ;;  %v360_v9 = vld [vmem:[%s330_s28 + $0x8] sm:$0xff]  ;;  %v374_v13 = vsub.s32 0, %v373_v12  ;;  %v433_v18 = vsub.s32 1, %v373_v12 }
  0x12   : > { %614 = vmatpush3.bf16.xpose.msra.mxu0 %v358_v5  ;;  %v355_v10 = vpack.c.bf16 %v354_v8, %v353_v7  ;;  %v361_v14 = vld [vmem:[%s338_s6] sm:$0x3] }
  0x13   : > { %v375_v15 = vrot.slane %v361_v14, %v374_v13  ;;  %v434_v24 = vrot.slane %v361_v14, %v433_v18 }
  0x15   : > { %369 = vperm.xlu0 %647, %v360_v9   ;;  %426 = vperm.xlu1 %648, %v360_v9  }
  0x19   : > { %616 = vmatmul.mubr.bf16.vlgmr.msra.gmra.mxu0 %v355_v10  ;;  %649 = vset.pattern.permute.xlu0 %v677_v2 }
  0x8c   : > { %v365_v16 = vpop.permute.xlu0 %364  ;;  %v423_v22 = vpop.permute.xlu1 %422 }
  0x8d   : > { %v376_v17 = vmul.f32 %v375_v15, %v365_v16 }
  0x90   : > { %v370_v19 = vpop.permute.xlu0 %369  ;;  %v427_v33 = vpop.permute.xlu1 %426 }
  0x91   : > { %v377_v25 = vmul.f32 %v375_v15, %v370_v19 }
  0xd9   : > { %v412_v20 = vpop.f32.mrf.mxu0 }
  0xda   : > { %v413_v21 = vadd.f32 %v412_v20, %v376_v17 }
  0xdb   : > { %v617_v23 = vpop.f32.mrf.mxu0 }
  0xdc   : > { %v419_v26 = vmul.f32 2.0, %v413_v21 }
  0xdd   : > { %v415_v27 = vpop.f32.mrf.mxu0 }
  0xde   : > { %v429_v28 = vsub.f32 %v419_v26, %v423_v22  ;;  %v416_v29 = vadd.f32 %v415_v27, %v377_v25 }
  0xdf   : > { %v618_v30 = vpop.f32.mrf.mxu0 }
  0xe0   : > { %v435_v31 = vsub.f32 %v429_v28, %v434_v24  ;;  %v420_v32 = vmul.f32 2.0, %v416_v29 }
  0xe2   : > { %438 = vst.msk [vmem:[%s350_s9] sm:$0xff] %vm437_vm1, %v435_v31  ;;  %v430_v34 = vsub.f32 %v420_v32, %v427_v33 }
  0xe4   : > { %v436_v35 = vsub.f32 %v430_v34, %v434_v24 }
  0xe6   : > { %439 = vst.msk [vmem:[%s350_s9 + $0x8] sm:$0xff] %vm437_vm1, %v436_v35 }
  0xe7 PF: > { %s14_s17 = sadd.s32 1, %s672_s17   ;;  %s756_s15 = smov %s668_s16 }
  0xe8   : > { %p11_p5 = scmp.ge.s32.totalorder %s14_s17, 4   ;;  %s757_s16 = smov %s759_s18 }
  0xea   :  { %13 = sbr.rel (!%p11_p5) target bundleno = 2 (0x2), region = 75 }

// kernel: nm_block_forward.15
= control target key start
LH: loop header
LB: loop body
LE: loop exit
PB: predicated region body
PF: predicated region fallthrough
CT: control target
= control target key end

     0   :  { %v467_v1 = vmov 0   ;;  %s612_s2 = inlined_call_operand.vmem [shape: bf16[128,128], index: 2, kind: input, shape index: {}]   ;;  %s613_s5 = inlined_call_operand.vmem [shape: bf16[128,128], index: 5, kind: input, shape index: {}]   ;;  %s614_s0 = inlined_call_operand.vmem [shape: f32[32,128], index: 0, kind: input, shape index: {}]   ;;  %s615_s1 = inlined_call_operand.vmem [shape: f32[32,2], index: 1, kind: input, shape index: {}]   ;;  %s616_s3 = inlined_call_operand.vmem [shape: f32[1,128], index: 3, kind: input, shape index: {}]   ;;  %s617_s6 = inlined_call_operand.vmem [shape: f32[1,128], index: 6, kind: input, shape index: {}]   ;;  %s618_s4 = inlined_call_operand.vmem [shape: f32[1,128], index: 4, kind: input, shape index: {}]   ;;  %s619_s7 = inlined_call_operand.vmem [shape: f32[32,128], index: 7, kind: output, shape index: {0}]   ;;  %s620_s8 = inlined_call_operand.vmem [shape: bf16[32,128], index: 8, kind: output, shape index: {1}]  }
   0x1   :  { %v451_v0 = vld [vmem:[%s612_s2 + $0x38] sm:$0xff]   ;;  %450 = vset.pattern.permute.xlu1 %v467_v1  ;;  %449 = vset.pattern.permute.xlu0 %v467_v1  ;;  %v453_v3 = vld [vmem:[%s612_s2 + $0x30] sm:$0xff]   ;;  %v455_v5 = vld [vmem:[%s612_s2 + $0x28] sm:$0xff]  }
   0x2   :  { %v452_v2 = vld [vmem:[%s613_s5 + $0x38] sm:$0xff]   ;;  %408 = vmatprep.subr.bf16.mxu0 %v451_v0  ;;  %v454_v4 = vld [vmem:[%s613_s5 + $0x30] sm:$0xff]   ;;  %v456_v6 = vld [vmem:[%s613_s5 + $0x28] sm:$0xff]  }
   0x3   :  { %428 = vmatprep.subr.bf16.mxu1 %v452_v2  ;;  %409 = vmatpush3.bf16.msra.mxu0 %v451_v0  ;;  %v457_v7 = vld [vmem:[%s612_s2 + $0x20] sm:$0xff]   ;;  %v459_v9 = vld [vmem:[%s612_s2 + $0x18] sm:$0xff]   ;;  %v461_v11 = vld [vmem:[%s612_s2 + $0x10] sm:$0xff]  }
   0x4   :  { %429 = vmatpush3.bf16.msra.mxu1 %v452_v2  ;;  %410 = vmatprep.subr.bf16.mxu0 %v453_v3  ;;  %v458_v8 = vld [vmem:[%s613_s5 + $0x20] sm:$0xff]   ;;  %v460_v10 = vld [vmem:[%s613_s5 + $0x18] sm:$0xff]   ;;  %v30_v13 = vld [vmem:[%s614_s0 + $0x8] sm:$0xff] }
   0x5   :  { %430 = vmatprep.subr.bf16.mxu1 %v454_v4  ;;  %v29_v12 = vld [vmem:[%s614_s0] sm:$0xff]  ;;  %v462_v14 = vld [vmem:[%s613_s5 + $0x10] sm:$0xff]   ;;  %v38_v18 = vld [vmem:[%s615_s1 + $0x18] sm:$0xff] }
   0x6   :  { %v33_v15 = vpack.c.bf16 %v30_v13, %v29_v12  ;;  %v37_v16 = vld [vmem:[%s615_s1 + $0x10] sm:$0xff]  ;;  %v35_v17 = vld [vmem:[%s615_s1] sm:$0xff]  ;;  %v36_v19 = vld [vmem:[%s615_s1 + $0x8] sm:$0xff] }
   0x7   :  { %411 = vmatpush3.bf16.msra.mxu0 %v453_v3  ;;  %68 = vperm.xlu1 %450, %v37_v16   ;;  %v463_v20 = vld [vmem:[%s612_s2 + $0x8] sm:$0xff]   ;;  %v465_v22 = vld [vmem:[%s612_s2] sm:$0xff]   ;;  %v31_v24 = vld [vmem:[%s614_s0 + $0x10] sm:$0xff] }
   0x8   :  { %431 = vmatpush3.bf16.msra.mxu1 %v454_v4  ;;  %412 = vmatprep.subr.bf16.mxu0 %v455_v5  ;;  %v464_v21 = vld [vmem:[%s613_s5 + $0x8] sm:$0xff]   ;;  %v466_v23 = vld [vmem:[%s613_s5] sm:$0xff]   ;;  %v32_v25 = vld [vmem:[%s614_s0 + $0x18] sm:$0xff] }
   0x9   :  { %432 = vmatprep.subr.bf16.mxu1 %v456_v6  ;;  %58 = vperm.xlu0 %449, %v35_v17   ;;  %v34_v26 = vpack.c.bf16 %v32_v25, %v31_v24  ;;  %v350_v27 = vld [vmem:[%s616_s3] ss:$0 sm:$0xff] }
   0xa   :  { %424 = vmatprep.mubr.bf16.mxu0 %v33_v15  ;;  %444 = vmatprep.mubr.bf16.mxu1 %v33_v15  ;;  %v360_v31 = vld [vmem:[%s617_s6] ss:$0 sm:$0xff] }
   0xb   :  { %413 = vmatpush3.bf16.msra.mxu0 %v455_v5  ;;  %73 = vperm.xlu1 %450, %v38_v18   ;;  %v359_v35 = vld [vmem:[%s618_s4] ss:$0 sm:$0xff] }
   0xc   :  { %433 = vmatpush3.bf16.msra.mxu1 %v456_v6  ;;  %414 = vmatprep.subr.bf16.mxu0 %v457_v7 }
   0xd   :  { %434 = vmatprep.subr.bf16.mxu1 %v458_v8  ;;  %63 = vperm.xlu0 %449, %v36_v19  }
   0xf   :  { %415 = vmatpush3.bf16.msra.mxu0 %v457_v7 }
  0x10   :  { %435 = vmatpush3.bf16.msra.mxu1 %v458_v8  ;;  %416 = vmatprep.subr.bf16.mxu0 %v459_v9 }
  0x11   :  { %436 = vmatprep.subr.bf16.mxu1 %v460_v10 }
  0x13   :  { %417 = vmatpush3.bf16.msra.mxu0 %v459_v9 }
  0x14   :  { %437 = vmatpush3.bf16.msra.mxu1 %v460_v10  ;;  %418 = vmatprep.subr.bf16.mxu0 %v461_v11 }
  0x15   :  { %438 = vmatprep.subr.bf16.mxu1 %v462_v14 }
  0x17   :  { %419 = vmatpush3.bf16.msra.mxu0 %v461_v11 }
  0x18   :  { %439 = vmatpush3.bf16.msra.mxu1 %v462_v14  ;;  %420 = vmatprep.subr.bf16.mxu0 %v463_v20 }
  0x19   :  { %440 = vmatprep.subr.bf16.mxu1 %v464_v21 }
  0x1b   :  { %421 = vmatpush3.bf16.msra.mxu0 %v463_v20 }
  0x1c   :  { %441 = vmatpush3.bf16.msra.mxu1 %v464_v21  ;;  %422 = vmatprep.subr.bf16.mxu0 %v465_v22 }
  0x1d   :  { %442 = vmatprep.subr.bf16.mxu1 %v466_v23 }
  0x1f   :  { %423 = vmatpush3.bf16.msra.mxu0 %v465_v22 }
  0x20   :  { %443 = vmatpush3.bf16.msra.mxu1 %v466_v23 }
  0x22   :  { %425 = vmatmul.mubr.bf16.vlgmr.msra.gmra.mxu0 %v34_v26 }
  0x23   :  { %445 = vmatmul.mubr.bf16.vlgmr.msra.gmra.mxu1 %v34_v26 }
  0x82   :  { %v69_v28 = vpop.permute.xlu1 %68 }
  0x83   :  { %v84_v30 = vmul.f32 %v350_v27, %v69_v28  ;;  %v223_v38 = vmul.f32 %v360_v31, %v69_v28 }
  0x84   :  { %v59_v29 = vpop.permute.xlu0 %58 }
  0x85   :  { %v82_v32 = vmul.f32 %v350_v27, %v59_v29  ;;  %v221_v45 = vmul.f32 %v360_v31, %v59_v29 }
  0x86   :  { %v74_v33 = vpop.permute.xlu1 %73 }
  0x87   :  { %v85_v41 = vmul.f32 %v350_v27, %v74_v33  ;;  %v224_v46 = vmul.f32 %v360_v31, %v74_v33 }
  0x88   :  { %v64_v39 = vpop.permute.xlu0 %63 }
  0x89   :  { %v83_v48 = vmul.f32 %v350_v27, %v64_v39  ;;  %v222_v52 = vmul.f32 %v360_v31, %v64_v39 }
  0xe2   :  { %v426_v34 = vpop.f32.mrf.mxu0 }
  0xe3   :  { %v177_v36 = vadd.f32 %v426_v34, %v84_v30  ;;  %v446_v37 = vpop.f32.mrf.mxu1 }
  0xe4   :  { %v168_v40 = vpop.f32.mrf.mxu0  ;;  %v316_v53 = vadd.f32 %v446_v37, %v223_v38 }
  0xe5   :  { %v192_v42 = vadd.f32 %v359_v35, %v177_v36  ;;  %v169_v43 = vadd.f32 %v168_v40, %v82_v32  ;;  %v307_v44 = vpop.f32.mrf.mxu1 }
  0xe6   :  { %v427_v47 = vpop.f32.mrf.mxu0  ;;  %v308_v59 = vadd.f32 %v307_v44, %v221_v45 }
  0xe7   :  { %196 = vst [vmem:[%s619_s7 + $0x10] sm:$0xff] %v192_v42  ;;  %v190_v49 = vadd.f32 %v359_v35, %v169_v43  ;;  %v180_v50 = vadd.f32 %v427_v47, %v85_v41  ;;  %v447_v51 = vpop.f32.mrf.mxu1 }
  0xe8   :  { %v319_v54 = vadd.f32 %v447_v51, %v224_v46  ;;  %v171_v55 = vpop.f32.mrf.mxu0 }
  0xe9   :  { %194 = vst [vmem:[%s619_s7] sm:$0xff] %v190_v49  ;;  %v193_v56 = vadd.f32 %v359_v35, %v180_v50  ;;  %v172_v57 = vadd.f32 %v171_v55, %v83_v48  ;;  %v310_v58 = vpop.f32.mrf.mxu1 }
  0xea   :  { %v385_v60 = vpack.c.bf16 %v319_v54, %v316_v53  ;;  %v311_v61 = vadd.f32 %v310_v58, %v222_v52 }
  0xeb   :  { %197 = vst [vmem:[%s619_s7 + $0x18] sm:$0xff] %v193_v56  ;;  %v191_v62 = vadd.f32 %v359_v35, %v172_v57 }
  0xec   :  { %387 = vst [vmem:[%s620_s8 + $0x8] sm:$0xff] %v385_v60   ;;  %v380_v63 = vpack.c.bf16 %v311_v61, %v308_v59 }
  0xed   :  { %195 = vst [vmem:[%s619_s7 + $0x8] sm:$0xff] %v191_v62 }
  0xee   :  { %381 = vst [vmem:[%s620_s8] sm:$0xff] %v380_v63  }

// kernel: nm_block_forward.17
= control target key start
LH: loop header
LB: loop body
LE: loop exit
PB: predicated region body
PF: predicated region fallthrough
CT: control target
= control target key end

     0   :  { %s1028_s30 = smov 0   ;;  %s1030_s10 = smov 0   ;;  %s1117_s0 = inlined_call_operand.vmem [shape: f32[2,16,128], index: 0, kind: input, shape index: {}]   ;;  %s1118_s1 = inlined_call_operand.vmem [shape: f32[2,16,128], index: 1, kind: input, shape index: {}]   ;;  %s1119_s2 = inlined_call_operand.vmem [shape: f32[1,128], index: 2, kind: input, shape index: {}]   ;;  %s1120_s3 = inlined_call_operand.vmem [shape: f32[1,128], index: 3, kind: input, shape index: {}]   ;;  %s1121_s4 = inlined_call_operand.vmem [shape: bf16[128,128], index: 4, kind: input, shape index: {}]   ;;  %s1122_s5 = inlined_call_operand.vmem [shape: f32[1,128], index: 5, kind: input, shape index: {}]   ;;  %s1123_s6 = inlined_call_operand.vmem [shape: f32[2,16,128], index: 6, kind: output, shape index: {0}]   ;;  %s1124_s7 = inlined_call_operand.vmem [shape: f32[2,16,128], index: 7, kind: output, shape index: {1}]   ;;  %s1125_s8 = inlined_call_operand.vmem [shape: f32[2,1,1,128], index: 8, kind: output, shape index: {2}]   ;;  %s1126_s9 = inlined_call_operand.vmem [shape: f32[2,1,1,128], index: 9, kind: output, shape index: {3}]  }
   0x1   :  { %s1032_s11 = smov 0  }
   0x2 LB: > { %s32_s12 = sadd.s32 1, %s969_s10  ;;  %p862_p0 = scmp.ge.s32.totalorder %s973_s11, 1  ;;  %s973_s11 = sphi %s1032_s11, %s20_s11   ;;  %s969_s10 = sphi %s1030_s10, %s1128_s10   ;;  %s965_s30 = sphi %s1028_s30, %s1127_s30  }
   0x3   : > { %p34_p1 = scmp.ge.s32.totalorder %s32_s12, 2  ;;  %p338_p2 = scmp.lt.s32.totalorder %s973_s11, 3 }
   0x5   : > { %s1130_s12 = smov (%p34_p1, %s32_s12), 0  ;;  %p339_p3 = pnand %p862_p0, %p338_p2 }
   0x6   : > { %p413_p4 = scmp.lt.s32.totalorder (!%p339_p3), %s965_s30, 1 }
   0x7   : > { %342 = sbr.rel (%p339_p3) target bundleno = 261 (0x105), region = 44 }
   0xc   : > { %v943_v0 = vld [vmem:[%s1121_s4 + $0x38] sm:$0xff]   ;;  %v975_v1 = vmov 0.0   ;;  %v473_v2 = vlaneseq  ;;  %v944_v3 = vld [vmem:[%s1121_s4 + $0x30] sm:$0xff]   ;;  %vm976_vm0 = vmmov 0   ;;  %s1132_s30 = smov (!%p413_p4, %s965_s30), 1  ;;  %v945_v5 = vld [vmem:[%s1121_s4 + $0x28] sm:$0xff]  }
   0xd   : > { %896 = vmatprep.subr.bf16.mxu0 %v975_v1  ;;  %912 = vmatprep.mubr.msk.bf16.mxu0 %vm976_vm0, %v975_v1  ;;  %s1058_s19 = sshll.u32 %s1132_s30, 4  ;;  %v465_v7 = vld [vmem:[%s1119_s2] sm:$0x1]  ;;  %v977_v10 = vmov 0   ;;  %v947_v17 = vld [vmem:[%s1121_s4 + $0x18] sm:$0xff]   ;;  %v948_v25 = vld [vmem:[%s1121_s4 + $0x10] sm:$0xff]   ;;  %s457_s16 = scalar_lea.vmem %s1125_s8, %s1132_s30 }
   0xe   : > { %897 = vmatpush3.bf16.msra.mxu0 %v943_v0  ;;  %v474_v4 = vshrl.u32 %v473_v2, 7  ;;  %s420_s22 = scalar_lea.vmem %s1117_s0, %s1058_s19  ;;  %s430_s25 = scalar_lea.vmem %s1118_s1, %s1058_s19  ;;  %vm467_vm1 = vcmp.ge.f32.partialorder %v465_v7, 0.0  ;;  %v946_v8 = vld [vmem:[%s1121_s4 + $0x20] sm:$0xff]   ;;  %v949_v28 = vld [vmem:[%s1121_s4 + $0x8] sm:$0xff]  }
   0xf   : > { %898 = vmatprep.subr.bf16.mxu0 %v975_v1  ;;  %v468_v9 = vld [vmem:[%s420_s22] sm:$0xff]  ;;  %v472_v11 = vsel %vm467_vm1, 1, %v977_v10  ;;  %v469_v12 = vld [vmem:[%s420_s22 + $0x8] sm:$0xff]  ;;  %s440_s22 = scalar_lea.vmem %s1123_s6, %s1058_s19  ;;  %s450_s14 = scalar_lea.vmem %s1124_s7, %s1058_s19 }
  0x10   : > { %v475_v6 = vsub.s32 0, %v474_v4  ;;  %v470_v13 = vld [vmem:[%s430_s25] sm:$0xff]  ;;  %v471_v14 = vld [vmem:[%s430_s25 + $0x8] sm:$0xff]  ;;  %s463_s20 = scalar_lea.vmem %s1126_s9, %s1132_s30 }
  0x11   : > { %v871_v18 = vld [vmem:[%s1120_s3] ss:$0 sm:$0xff] }
  0x12   : > { %899 = vmatpush3.bf16.msra.mxu0 %v944_v3  ;;  %v476_v15 = vrot.slane %v472_v11, %v475_v6  ;;  %v484_v16 = vrot.slane %v465_v7, %v475_v6  ;;  %v950_v29 = vld [vmem:[%s1121_s4] sm:$0xff]  }
  0x13   : > { %900 = vmatprep.subr.bf16.mxu0 %v975_v1  ;;  %v872_v31 = vld [vmem:[%s1122_s5] ss:$0 sm:$0xff] }
  0x14   : > { %vm477_vm2 = vcmp.eq.s32.totalorder %v476_v15, 1 }
  0x15   : > { %v478_v19 = vsel %vm477_vm2, %v468_v9, %v470_v13  ;;  %v479_v20 = vsel %vm477_vm2, %v469_v12, %v471_v14 }
  0x16   : > { %901 = vmatpush3.bf16.msra.mxu0 %v945_v5  ;;  %v486_v21 = vmul.f32 %v484_v16, %v478_v19  ;;  %v487_v22 = vmul.f32 %v484_v16, %v479_v20 }
  0x17   : > { %902 = vmatprep.subr.bf16.mxu0 %v975_v1 }
  0x18   : > { %v494_v23 = vadd.f32 %v871_v18, %v486_v21  ;;  %v495_v24 = vadd.f32 %v871_v18, %v487_v22 }
  0x1a   : > { %903 = vmatpush3.bf16.msra.mxu0 %v946_v8  ;;  %v496_v26 = vmax.f32 %v494_v23, 0.0  ;;  %v497_v27 = vmax.f32 %v495_v24, 0.0 }
  0x1b   : > { %904 = vmatprep.subr.bf16.mxu0 %v975_v1 }
  0x1c   : > { %498 = vst [vmem:[%s440_s22] sm:$0xff] %v496_v26  ;;  %499 = vst [vmem:[%s440_s22 + $0x8] sm:$0xff] %v497_v27  ;;  %v500_v30 = vpack.c.bf16 %v497_v27, %v496_v26 }
  0x1e   : > { %905 = vmatpush3.bf16.msra.mxu0 %v947_v17 }
  0x1f   : > { %906 = vmatprep.subr.bf16.mxu0 %v975_v1 }
  0x22   : > { %907 = vmatpush3.bf16.msra.mxu0 %v948_v25 }
  0x23   : > { %908 = vmatprep.subr.bf16.mxu0 %v975_v1 }
  0x26   : > { %909 = vmatpush3.bf16.msra.mxu0 %v949_v28 }
  0x27   : > { %910 = vmatprep.subr.bf16.mxu0 %v975_v1 }
  0x2a   : > { %911 = vmatpush3.bf16.msra.mxu0 %v950_v29 }
  0x2d   : > { %913 = vmatmul.mubr.bf16.vlgmr.msra.gmra.mxu0 %v500_v30 }
  0xed   : > { %v606_v32 = vpop.f32.mrf.mxu0 }
  0xee   : > { %v607_v33 = vadd.f32 %v872_v31, %v606_v32 }
  0xef   : > { %v914_v34 = vpop.f32.mrf.mxu0 }
  0xf0   : > { %613 = vst [vmem:[%s450_s14] sm:$0xff] %v607_v33  ;;  %v623_v38 = vmul.f32 %v607_v33, %v607_v33 }
  0xf1   : > { %v609_v35 = vpop.f32.mrf.mxu0 }
  0xf2   : > { %v610_v36 = vadd.f32 %v872_v31, %v609_v35 }
  0xf3   : > { %v915_v37 = vpop.f32.mrf.mxu0 }
  0xf4   : > { %614 = vst [vmem:[%s450_s14 + $0x8] sm:$0xff] %v610_v36  ;;  %v615_v39 = vadd.f32 %v610_v36, %v607_v33  ;;  %v624_v40 = vmul.f32 %v610_v36, %v610_v36 }
  0xf6   : > { %v616_v41 = vrot.slane %v615_v39, 4  ;;  %v625_v42 = vadd.f32 %v624_v40, %v623_v38 }
  0xf8   : > { %v617_v43 = vadd.f32 %v616_v41, %v615_v39  ;;  %v626_v44 = vrot.slane %v625_v42, 4 }
  0xfa   : > { %v618_v45 = vrot.slane %v617_v43, 2  ;;  %v627_v46 = vadd.f32 %v626_v44, %v625_v42 }
  0xfc   : > { %v619_v47 = vadd.f32 %v618_v45, %v617_v43  ;;  %v628_v48 = vrot.slane %v627_v46, 2 }
  0xfe   : > { %v620_v49 = vrot.slane %v619_v47, 1  ;;  %v629_v50 = vadd.f32 %v628_v48, %v627_v46 }
 0x100   : > { %v621_v51 = vadd.f32 %v620_v49, %v619_v47  ;;  %v630_v52 = vrot.slane %v629_v50, 1 }
 0x102   : > { %622 = vst [vmem:[%s457_s16] sm:$0x1] %v621_v51  ;;  %v631_v53 = vadd.f32 %v630_v52, %v629_v50 }
 0x104   : > { %632 = vst [vmem:[%s463_s20] sm:$0x1] %v631_v53 }
 0x105 PF: > { %s20_s11 = sadd.s32 1, %s973_s11   ;;  %s1127_s30 = smov %s969_s10 }
 0x106   : > { %p17_p5 = scmp.ge.s32.totalorder %s20_s11, 4   ;;  %s1128_s10 = smov %s1130_s12 }
 0x108   :  { %19 = sbr.rel (!%p17_p5) target bundleno = 2 (0x2), region = 113 }

// kernel: nm_block_forward.16
= control target key start
LH: loop header
LB: loop body
LE: loop exit
PB: predicated region body
PF: predicated region fallthrough
CT: control target
= control target key end

     0   :  { %vm915_vm0 = vcmask 1041409   ;;  %vm917_vm1 = vcmask 1042434   ;;  %vm919_vm2 = vcmask 1043459   ;;  %vm921_vm3 = vcmask 1044484   ;;  %s2477_s1 = inlined_call_operand.vmem [shape: bf16[32,8,128], index: 1, kind: input, shape index: {}]   ;;  %s2478_s0 = inlined_call_operand.vmem [shape: f32[32,128], index: 0, kind: input, shape index: {}]   ;;  %s2479_s2 = inlined_call_operand.vmem [shape: f32[32,128], index: 2, kind: output, shape index: {0}]   ;;  %s2480_s3 = inlined_call_operand.vmem [shape: f32[32,128], index: 3, kind: output, shape index: {1}]   ;;  %s2481_s4 = inlined_call_operand.vmem [shape: f32[1,1,128], index: 4, kind: output, shape index: {2}]   ;;  %s2482_s5 = inlined_call_operand.vmem [shape: f32[1,1,128], index: 5, kind: output, shape index: {3}]  }
   0x1   :  { %v1227_v0 = vld [vmem:[%s2477_s1] sm:$0xff]   ;;  %v1290_v1 = vld [vmem:[%s2477_s1 + $0x8] sm:$0xff]   ;;  %v1291_v6 = vld [vmem:[%s2477_s1 + $0x10] sm:$0xff]   ;;  %vm923_vm4 = vcmask 1045509   ;;  %vm925_vm5 = vcmask 1046534   ;;  %vm927_vm6 = vcmask 1047559  }
   0x2   :  { %v1341_v2 = vunpack.c.l.bf16 %v1227_v0  ;;  %v1343_v3 = vunpack.c.h.bf16 %v1227_v0  ;;  %v1345_v4 = vunpack.c.l.bf16 %v1290_v1  ;;  %v1347_v5 = vunpack.c.h.bf16 %v1290_v1  ;;  %v1292_v7 = vld [vmem:[%s2477_s1 + $0x18] sm:$0xff]   ;;  %v1293_v8 = vld [vmem:[%s2477_s1 + $0x20] sm:$0xff]   ;;  %v1294_v13 = vld [vmem:[%s2477_s1 + $0x28] sm:$0xff]  }
   0x3   :  { %v1358_v9 = vunpack.c.l.bf16 %v1291_v6  ;;  %v1360_v10 = vunpack.c.h.bf16 %v1291_v6  ;;  %v1362_v11 = vunpack.c.l.bf16 %v1292_v7  ;;  %v1364_v12 = vunpack.c.h.bf16 %v1292_v7  ;;  %v1295_v14 = vld [vmem:[%s2477_s1 + $0x30] sm:$0xff]   ;;  %v1296_v15 = vld [vmem:[%s2477_s1 + $0x38] sm:$0xff]   ;;  %v1297_v20 = vld [vmem:[%s2477_s1 + $0x40] sm:$0xff]  }
   0x4   :  { %2551 = vst [vmem:[#allocation2_spill] sm:$0xff] %v1347_v5  ;;  %v1375_v16 = vunpack.c.l.bf16 %v1293_v8  ;;  %v1377_v17 = vunpack.c.h.bf16 %v1293_v8  ;;  %v1379_v18 = vunpack.c.l.bf16 %v1294_v13  ;;  %v1381_v19 = vunpack.c.h.bf16 %v1294_v13  ;;  %v1298_v21 = vld [vmem:[%s2477_s1 + $0x48] sm:$0xff]   ;;  %v1299_v22 = vld [vmem:[%s2477_s1 + $0x50] sm:$0xff]   ;;  %v1300_v27 = vld [vmem:[%s2477_s1 + $0x58] sm:$0xff]  }
   0x5   :  { %2552 = vst [vmem:[#allocation3_spill] sm:$0xff] %v1358_v9  ;;  %2553 = vst [vmem:[#allocation4_spill] sm:$0xff] %v1360_v10  ;;  %v1392_v23 = vunpack.c.l.bf16 %v1295_v14  ;;  %v1394_v24 = vunpack.c.h.bf16 %v1295_v14  ;;  %v1396_v25 = vunpack.c.l.bf16 %v1296_v15  ;;  %v1398_v26 = vunpack.c.h.bf16 %v1296_v15  ;;  %v1301_v28 = vld [vmem:[%s2477_s1 + $0x60] sm:$0xff]   ;;  %v1302_v29 = vld [vmem:[%s2477_s1 + $0x68] sm:$0xff]  }
   0x6   :  { %2554 = vst [vmem:[#allocation5_spill] sm:$0xff] %v1362_v11  ;;  %2555 = vst [vmem:[#allocation6_spill] sm:$0xff] %v1364_v12  ;;  %v1409_v30 = vunpack.c.l.bf16 %v1297_v20  ;;  %v1411_v31 = vunpack.c.h.bf16 %v1297_v20  ;;  %v1413_v32 = vunpack.c.l.bf16 %v1298_v21  ;;  %v1415_v33 = vunpack.c.h.bf16 %v1298_v21  ;;  %v1303_v34 = vld [vmem:[%s2477_s1 + $0x70] sm:$0xff]   ;;  %v1304_v35 = vld [vmem:[%s2477_s1 + $0x78] sm:$0xff]  }
   0x7   :  { %2556 = vst [vmem:[#allocation7_spill] sm:$0xff] %v1392_v23  ;;  %2557 = vst [vmem:[#allocation8_spill] sm:$0xff] %v1394_v24  ;;  %v1423_v36 = vunpack.c.l.bf16 %v1299_v22  ;;  %v1425_v37 = vunpack.c.h.bf16 %v1299_v22  ;;  %v1427_v38 = vunpack.c.l.bf16 %v1300_v27  ;;  %v1429_v39 = vunpack.c.h.bf16 %v1300_v27 }
   0x8   :  { %2558 = vst [vmem:[#allocation9_spill] sm:$0xff] %v1396_v25  ;;  %2559 = vst [vmem:[#allocation10_spill] sm:$0xff] %v1398_v26  ;;  %v1431_v40 = vunpack.c.l.bf16 %v1301_v28  ;;  %v1433_v41 = vunpack.c.h.bf16 %v1301_v28  ;;  %v1435_v42 = vunpack.c.l.bf16 %v1302_v29  ;;  %v1437_v43 = vunpack.c.h.bf16 %v1302_v29 }
   0x9   :  { %2560 = vst [vmem:[#allocation11_spill] sm:$0xff] %v1423_v36  ;;  %2561 = vst [vmem:[#allocation12_spill] sm:$0xff] %v1425_v37  ;;  %v1439_v44 = vunpack.c.l.bf16 %v1303_v34  ;;  %v1441_v45 = vunpack.c.h.bf16 %v1303_v34  ;;  %v1443_v46 = vunpack.c.l.bf16 %v1304_v35  ;;  %v1445_v47 = vunpack.c.h.bf16 %v1304_v35 }
   0xa   :  { %2562 = vst [vmem:[#allocation13_spill] sm:$0xff] %v1427_v38  ;;  %2563 = vst [vmem:[#allocation14_spill] sm:$0xff] %v1429_v39  ;;  %v1448_v48 = vrot.slane %v1341_v2, 4  ;;  %v1451_v49 = vrot.slane %v1343_v3, 4  ;;  %v1454_v50 = vrot.slane %v1345_v4, 4  ;;  %v1457_v51 = vrot.slane %v1347_v5, 4 }
   0xb   :  { %2564 = vst [vmem:[#allocation15_spill] sm:$0xff] %v1439_v44  ;;  %2565 = vst [vmem:[#allocation16_spill] sm:$0xff] %v1441_v45  ;;  %v1460_v52 = vrot.slane %v1358_v9, 4  ;;  %v1463_v53 = vrot.slane %v1360_v10, 4  ;;  %v1466_v54 = vrot.slane %v1362_v11, 4  ;;  %v1469_v55 = vrot.slane %v1364_v12, 4 }
   0xc   :  { %2566 = vst [vmem:[#allocation17_spill] sm:$0xff] %v1443_v46  ;;  %2567 = vst [vmem:[#allocation18_spill] sm:$0xff] %v1445_v47  ;;  %v84_v56 = vmax.f32 %v1341_v2, %v1448_v48  ;;  %v90_v57 = vmax.f32 %v1343_v3, %v1451_v49  ;;  %v96_v58 = vmax.f32 %v1345_v4, %v1454_v50 }
   0xd   :  { %2568 = vst [vmem:[#allocation19_spill] sm:$0xff] %v1457_v51  ;;  %2569 = vst [vmem:[#allocation20_spill] sm:$0xff] %v1460_v52  ;;  %v102_v59 = vmax.f32 %v1347_v5, %v1457_v51  ;;  %v108_v60 = vmax.f32 %v1358_v9, %v1460_v52  ;;  %v114_v61 = vmax.f32 %v1360_v10, %v1463_v53 }
   0xe   :  { %2570 = vst [vmem:[#allocation21_spill] sm:$0xff] %v1463_v53  ;;  %2571 = vst [vmem:[#allocation22_spill] sm:$0xff] %v1466_v54  ;;  %v120_v62 = vmax.f32 %v1362_v11, %v1466_v54  ;;  %v126_v63 = vmax.f32 %v1364_v12, %v1469_v55  ;;  %v85_v0 = vrot.slane %v84_v56, 2  ;;  %v91_v1 = vrot.slane %v90_v57, 2 }
   0xf   :  { %2572 = vst [vmem:[#allocation23_spill] sm:$0xff] %v1469_v55  ;;  %v97_v6 = vrot.slane %v96_v58, 2  ;;  %v103_v7 = vrot.slane %v102_v59, 2  ;;  %v109_v8 = vrot.slane %v108_v60, 2  ;;  %v115_v13 = vrot.slane %v114_v61, 2 }
  0x10   :  { %v121_v14 = vrot.slane %v120_v62, 2  ;;  %v127_v15 = vrot.slane %v126_v63, 2  ;;  %v86_v20 = vmax.f32 %v84_v56, %v85_v0  ;;  %v92_v21 = vmax.f32 %v90_v57, %v91_v1 }
  0x11   :  { %v98_v22 = vmax.f32 %v96_v58, %v97_v6  ;;  %v104_v27 = vmax.f32 %v102_v59, %v103_v7  ;;  %v110_v28 = vmax.f32 %v108_v60, %v109_v8  ;;  %v116_v29 = vmax.f32 %v114_v61, %v115_v13 }
  0x12   :  { %v122_v34 = vmax.f32 %v120_v62, %v121_v14  ;;  %v128_v35 = vmax.f32 %v126_v63, %v127_v15  ;;  %v87_v11 = vrot.slane %v86_v20, 1  ;;  %v93_v54 = vrot.slane %v92_v21, 1 }
  0x13   :  { %v99_v10 = vrot.slane %v98_v22, 1  ;;  %v105_v12 = vrot.slane %v104_v27, 1  ;;  %v111_v55 = vrot.slane %v110_v28, 1  ;;  %v117_v53 = vrot.slane %v116_v29, 1 }
  0x14   :  { %v123_v9 = vrot.slane %v122_v34, 1  ;;  %v129_v52 = vrot.slane %v128_v35, 1  ;;  %v1487_v5 = vmax.f32 %v86_v20, %v87_v11  ;;  %v1489_v51 = vmax.f32 %v92_v21, %v93_v54 }
  0x15   :  { %v1491_v56 = vmax.f32 %v98_v22, %v99_v10  ;;  %v1493_v57 = vmax.f32 %v104_v27, %v105_v12  ;;  %v1495_v58 = vmax.f32 %v110_v28, %v111_v55  ;;  %v1497_v59 = vmax.f32 %v116_v29, %v117_v53 }
  0x16   :  { %2573 = vst [vmem:[#allocation24_spill] sm:$0xff] %v1487_v5  ;;  %2574 = vst [vmem:[#allocation25_spill] sm:$0xff] %v1489_v51  ;;  %v1499_v60 = vmax.f32 %v122_v34, %v123_v9  ;;  %v1501_v61 = vmax.f32 %v128_v35, %v129_v52  ;;  %v1504_v62 = vrot.slane %v1375_v16, 4  ;;  %v1507_v11 = vrot.slane %v1377_v17, 4 }
  0x17   :  { %2575 = vst [vmem:[#allocation26_spill] sm:$0xff] %v1491_v56  ;;  %2576 = vst [vmem:[#allocation27_spill] sm:$0xff] %v1493_v57  ;;  %v1510_v54 = vrot.slane %v1379_v18, 4  ;;  %v1513_v10 = vrot.slane %v1381_v19, 4  ;;  %v1516_v12 = vrot.slane %v1392_v23, 4  ;;  %v1519_v9 = vrot.slane %v1394_v24, 4 }
  0x18   :  { %2577 = vst [vmem:[#allocation28_spill] sm:$0xff] %v1495_v58  ;;  %2578 = vst [vmem:[#allocation29_spill] sm:$0xff] %v1497_v59  ;;  %v1522_v52 = vrot.slane %v1396_v25, 4  ;;  %v1525_v53 = vrot.slane %v1398_v26, 4  ;;  %v132_v55 = vmax.f32 %v1375_v16, %v1504_v62  ;;  %v138_v63 = vmax.f32 %v1377_v17, %v1507_v11 }
  0x19   :  { %2579 = vst [vmem:[#allocation30_spill] sm:$0xff] %v1499_v60  ;;  %2580 = vst [vmem:[#allocation31_spill] sm:$0xff] %v1501_v61  ;;  %v144_v0 = vmax.f32 %v1379_v18, %v1510_v54  ;;  %v150_v1 = vmax.f32 %v1381_v19, %v1513_v10  ;;  %v156_v6 = vmax.f32 %v1392_v23, %v1516_v12 }
  0x1a   :  { %2581 = vst [vmem:[#allocation32_spill] sm:$0xff] %v1516_v12  ;;  %2582 = vst [vmem:[#allocation33_spill] sm:$0xff] %v1519_v9  ;;  %v162_v7 = vmax.f32 %v1394_v24, %v1519_v9  ;;  %v168_v8 = vmax.f32 %v1396_v25, %v1522_v52  ;;  %v174_v13 = vmax.f32 %v1398_v26, %v1525_v53  ;;  %v133_v14 = vrot.slane %v132_v55, 2 }
  0x1b   :  { %2583 = vst [vmem:[#allocation34_spill] sm:$0xff] %v1522_v52  ;;  %2584 = vst [vmem:[#allocation35_spill] sm:$0xff] %v1525_v53  ;;  %v139_v15 = vrot.slane %v138_v63, 2  ;;  %v145_v20 = vrot.slane %v144_v0, 2  ;;  %v151_v21 = vrot.slane %v150_v1, 2  ;;  %v157_v22 = vrot.slane %v156_v6, 2 }
  0x1c   :  { %v163_v27 = vrot.slane %v162_v7, 2  ;;  %v169_v28 = vrot.slane %v168_v8, 2  ;;  %v175_v29 = vrot.slane %v174_v13, 2  ;;  %v134_v34 = vmax.f32 %v132_v55, %v133_v14 }
  0x1d   :  { %v140_v35 = vmax.f32 %v138_v63, %v139_v15  ;;  %v146_v61 = vmax.f32 %v144_v0, %v145_v20  ;;  %v152_v60 = vmax.f32 %v150_v1, %v151_v21  ;;  %v158_v59 = vmax.f32 %v156_v6, %v157_v22 }
  0x1e   :  { %v164_v58 = vmax.f32 %v162_v7, %v163_v27  ;;  %v170_v57 = vmax.f32 %v168_v8, %v169_v28  ;;  %v176_v56 = vmax.f32 %v174_v13, %v175_v29  ;;  %v135_v51 = vrot.slane %v134_v34, 1 }
  0x1f   :  { %v141_v5 = vrot.slane %v140_v35, 1  ;;  %v147_v25 = vrot.slane %v146_v61, 1  ;;  %v153_v26 = vrot.slane %v152_v60, 1  ;;  %v159_v53 = vrot.slane %v158_v59, 1 }
  0x20   :  { %v165_v52 = vrot.slane %v164_v58, 1  ;;  %v171_v24 = vrot.slane %v170_v57, 1  ;;  %v177_v9 = vrot.slane %v176_v56, 1  ;;  %v1543_v23 = vmax.f32 %v134_v34, %v135_v51 }
  0x21   :  { %v1545_v12 = vmax.f32 %v140_v35, %v141_v5  ;;  %v1547_v55 = vmax.f32 %v146_v61, %v147_v25  ;;  %v1549_v63 = vmax.f32 %v152_v60, %v153_v26  ;;  %v1551_v0 = vmax.f32 %v158_v59, %v159_v53 }
  0x22   :  { %2585 = vst [vmem:[#allocation36_spill] sm:$0xff] %v1543_v23  ;;  %v1553_v1 = vmax.f32 %v164_v58, %v165_v52  ;;  %v1555_v6 = vmax.f32 %v170_v57, %v171_v24  ;;  %v1557_v7 = vmax.f32 %v176_v56, %v177_v9  ;;  %v1560_v8 = vrot.slane %v1409_v30, 4 }
  0x23   :  { %2586 = vst [vmem:[#allocation37_spill] sm:$0xff] %v1545_v12  ;;  %2587 = vst [vmem:[#allocation38_spill] sm:$0xff] %v1547_v55  ;;  %v1563_v51 = vrot.slane %v1411_v31, 4  ;;  %v1566_v5 = vrot.slane %v1413_v32, 4  ;;  %v1569_v25 = vrot.slane %v1415_v33, 4  ;;  %v1572_v26 = vrot.slane %v1423_v36, 4 }
  0x24   :  { %2588 = vst [vmem:[#allocation39_spill] sm:$0xff] %v1549_v63  ;;  %2589 = vst [vmem:[#allocation40_spill] sm:$0xff] %v1551_v0  ;;  %v1575_v24 = vrot.slane %v1425_v37, 4  ;;  %v1578_v56 = vrot.slane %v1427_v38, 4  ;;  %v1581_v57 = vrot.slane %v1429_v39, 4  ;;  %v180_v58 = vmax.f32 %v1409_v30, %v1560_v8 }
  0x25   :  { %2590 = vst [vmem:[#allocation41_spill] sm:$0xff] %v1553_v1  ;;  %2591 = vst [vmem:[#allocation42_spill] sm:$0xff] %v1555_v6  ;;  %v186_v59 = vmax.f32 %v1411_v31, %v1563_v51  ;;  %v192_v60 = vmax.f32 %v1413_v32, %v1566_v5  ;;  %v198_v61 = vmax.f32 %v1415_v33, %v1569_v25 }
  0x26   :  { %2592 = vst [vmem:[#allocation43_spill] sm:$0xff] %v1557_v7  ;;  %2593 = vst [vmem:[#allocation44_spill] sm:$0xff] %v1572_v26  ;;  %v204_v9 = vmax.f32 %v1423_v36, %v1572_v26  ;;  %v210_v52 = vmax.f32 %v1425_v37, %v1575_v24  ;;  %v216_v53 = vmax.f32 %v1427_v38, %v1578_v56  ;;  %v181_v14 = vrot.slane %v180_v58, 2 }
  0x27   :  { %2594 = vst [vmem:[#allocation45_spill] sm:$0xff] %v1575_v24  ;;  %2595 = vst [vmem:[#allocation46_spill] sm:$0xff] %v1578_v56  ;;  %v222_v13 = vmax.f32 %v1429_v39, %v1581_v57  ;;  %v187_v15 = vrot.slane %v186_v59, 2  ;;  %v193_v20 = vrot.slane %v192_v60, 2  ;;  %v199_v21 = vrot.slane %v198_v61, 2 }
  0x28   :  { %2596 = vst [vmem:[#allocation47_spill] sm:$0xff] %v1581_v57  ;;  %v205_v22 = vrot.slane %v204_v9, 2  ;;  %v211_v27 = vrot.slane %v210_v52, 2  ;;  %v217_v28 = vrot.slane %v216_v53, 2  ;;  %v182_v34 = vmax.f32 %v180_v58, %v181_v14 }
  0x29   :  { %v223_v29 = vrot.slane %v222_v13, 2  ;;  %v188_v35 = vmax.f32 %v186_v59, %v187_v15  ;;  %v194_v7 = vmax.f32 %v192_v60, %v193_v20  ;;  %v200_v6 = vmax.f32 %v198_v61, %v199_v21 }
  0x2a   :  { %v206_v1 = vmax.f32 %v204_v9, %v205_v22  ;;  %v212_v0 = vmax.f32 %v210_v52, %v211_v27  ;;  %v218_v63 = vmax.f32 %v216_v53, %v217_v28  ;;  %v183_v12 = vrot.slane %v182_v34, 1 }
  0x2b   :  { %v224_v55 = vmax.f32 %v222_v13, %v223_v29  ;;  %v189_v23 = vrot.slane %v188_v35, 1  ;;  %v195_v38 = vrot.slane %v194_v7, 1  ;;  %v201_v39 = vrot.slane %v200_v6, 1 }
  0x2c   :  { %v207_v57 = vrot.slane %v206_v1, 1  ;;  %v213_v56 = vrot.slane %v212_v0, 1  ;;  %v219_v37 = vrot.slane %v218_v63, 1  ;;  %v1599_v36 = vmax.f32 %v182_v34, %v183_v12 }
  0x2d   :  { %v225_v24 = vrot.slane %v224_v55, 1  ;;  %v1601_v26 = vmax.f32 %v188_v35, %v189_v23  ;;  %v1603_v58 = vmax.f32 %v194_v7, %v195_v38  ;;  %v1605_v59 = vmax.f32 %v200_v6, %v201_v39 }
  0x2e   :  { %2597 = vst [vmem:[#allocation48_spill] sm:$0xff] %v1599_v36  ;;  %v1607_v60 = vmax.f32 %v206_v1, %v207_v57  ;;  %v1609_v61 = vmax.f32 %v212_v0, %v213_v56  ;;  %v1611_v9 = vmax.f32 %v218_v63, %v219_v37  ;;  %v1616_v53 = vrot.slane %v1431_v40, 4 }
  0x2f   :  { %2598 = vst [vmem:[#allocation49_spill] sm:$0xff] %v1601_v26  ;;  %2599 = vst [vmem:[#allocation50_spill] sm:$0xff] %v1603_v58  ;;  %v1613_v52 = vmax.f32 %v224_v55, %v225_v24  ;;  %v1619_v12 = vrot.slane %v1433_v41, 4  ;;  %v1622_v23 = vrot.slane %v1435_v42, 4  ;;  %v1625_v38 = vrot.slane %v1437_v43, 4 }
  0x30   :  { %2600 = vst [vmem:[#allocation51_spill] sm:$0xff] %v1605_v59  ;;  %2601 = vst [vmem:[#allocation52_spill] sm:$0xff] %v1607_v60  ;;  %v1628_v39 = vrot.slane %v1439_v44, 4  ;;  %v1631_v37 = vrot.slane %v1441_v45, 4  ;;  %v1634_v55 = vrot.slane %v1443_v46, 4  ;;  %v1637_v63 = vrot.slane %v1445_v47, 4 }
  0x31   :  { %2602 = vst [vmem:[#allocation53_spill] sm:$0xff] %v1609_v61  ;;  %2603 = vst [vmem:[#allocation54_spill] sm:$0xff] %v1611_v9  ;;  %v228_v0 = vmax.f32 %v1431_v40, %v1616_v53  ;;  %v234_v1 = vmax.f32 %v1433_v41, %v1619_v12  ;;  %v240_v6 = vmax.f32 %v1435_v42, %v1622_v23 }
  0x32   :  { %2604 = vst [vmem:[#allocation55_spill] sm:$0xff] %v1613_v52  ;;  %2605 = vst [vmem:[#allocation56_spill] sm:$0xff] %v1628_v39  ;;  %v246_v7 = vmax.f32 %v1437_v43, %v1625_v38  ;;  %v252_v24 = vmax.f32 %v1439_v44, %v1628_v39  ;;  %v258_v56 = vmax.f32 %v1441_v45, %v1631_v37 }
  0x33   :  { %2606 = vst [vmem:[#allocation57_spill] sm:$0xff] %v1631_v37  ;;  %2607 = vst [vmem:[#allocation58_spill] sm:$0xff] %v1634_v55  ;;  %v264_v57 = vmax.f32 %v1443_v46, %v1634_v55  ;;  %v270_v13 = vmax.f32 %v1445_v47, %v1637_v63  ;;  %v229_v14 = vrot.slane %v228_v0, 2  ;;  %v235_v15 = vrot.slane %v234_v1, 2 }
  0x34   :  { %2608 = vst [vmem:[#allocation59_spill] sm:$0xff] %v1637_v63  ;;  %v241_v20 = vrot.slane %v240_v6, 2  ;;  %v247_v21 = vrot.slane %v246_v7, 2  ;;  %v253_v22 = vrot.slane %v252_v24, 2  ;;  %v259_v27 = vrot.slane %v258_v56, 2 }
  0x35   :  { %v265_v28 = vrot.slane %v264_v57, 2  ;;  %v271_v29 = vrot.slane %v270_v13, 2  ;;  %v230_v34 = vmax.f32 %v228_v0, %v229_v14  ;;  %v236_v35 = vmax.f32 %v234_v1, %v235_v15  ;;  %v2626_v14 = vld [vmem:[#allocation6_spill] sm:$0xff] }
  0x36   :  { %v242_v52 = vmax.f32 %v240_v6, %v241_v20  ;;  %v248_v9 = vmax.f32 %v246_v7, %v247_v21  ;;  %v254_v61 = vmax.f32 %v252_v24, %v253_v22  ;;  %v260_v60 = vmax.f32 %v258_v56, %v259_v27 }
  0x37   :  { %v266_v59 = vmax.f32 %v264_v57, %v265_v28  ;;  %v272_v58 = vmax.f32 %v270_v13, %v271_v29  ;;  %v231_v26 = vrot.slane %v230_v34, 1  ;;  %v237_v36 = vrot.slane %v236_v35, 1  ;;  %v2625_v13 = vld [vmem:[#allocation23_spill] sm:$0xff] }
  0x38   :  { %v243_v46 = vrot.slane %v242_v52, 1  ;;  %v249_v47 = vrot.slane %v248_v9, 1  ;;  %v255_v63 = vrot.slane %v254_v61, 1  ;;  %v261_v55 = vrot.slane %v260_v60, 1 }
  0x39   :  { %v267_v45 = vrot.slane %v266_v59, 1  ;;  %v273_v37 = vrot.slane %v272_v58, 1  ;;  %v1655_v44 = vmax.f32 %v230_v34, %v231_v26  ;;  %v1657_v39 = vmax.f32 %v236_v35, %v237_v36 }
  0x3a   :  { %v1659_v0 = vmax.f32 %v242_v52, %v243_v46  ;;  %v1661_v1 = vmax.f32 %v248_v9, %v249_v47  ;;  %v1663_v6 = vmax.f32 %v254_v61, %v255_v63  ;;  %v1665_v7 = vmax.f32 %v260_v60, %v261_v55  ;;  %v2617_v46 = vld [vmem:[#allocation19_spill] sm:$0xff]  ;;  %v2618_v47 = vld [vmem:[#allocation2_spill] sm:$0xff]  ;;  %v2619_v61 = vld [vmem:[#allocation20_spill] sm:$0xff] }
  0x3b   :  { %2609 = vst [vmem:[#allocation60_spill] sm:$0xff] %v1655_v44  ;;  %2610 = vst [vmem:[#allocation61_spill] sm:$0xff] %v1657_v39  ;;  %v1667_v24 = vmax.f32 %v266_v59, %v267_v45  ;;  %v1669_v56 = vmax.f32 %v272_v58, %v273_v37  ;;  %v276_v57 = vmin.f32 %v1341_v2, %v1448_v48  ;;  %v2620_v52 = vld [vmem:[#allocation3_spill] sm:$0xff]  ;;  %v2621_v55 = vld [vmem:[#allocation21_spill] sm:$0xff] }
  0x3c   :  { %2611 = vst [vmem:[#allocation62_spill] sm:$0xff] %v1659_v0  ;;  %2612 = vst [vmem:[#allocation63_spill] sm:$0xff] %v1661_v1  ;;  %v282_v26 = vmin.f32 %v1343_v3, %v1451_v49  ;;  %v288_v36 = vmin.f32 %v1345_v4, %v1454_v50  ;;  %v294_v9 = vmin.f32 %v2618_v47, %v2617_v46  ;;  %v2622_v45 = vld [vmem:[#allocation4_spill] sm:$0xff]  ;;  %v2623_v58 = vld [vmem:[#allocation22_spill] sm:$0xff] }
  0x3d   :  { %2613 = vst [vmem:[#allocation64_spill] sm:$0xff] %v1663_v6  ;;  %2614 = vst [vmem:[#allocation65_spill] sm:$0xff] %v1665_v7  ;;  %v300_v60 = vmin.f32 %v2620_v52, %v2619_v61  ;;  %v306_v59 = vmin.f32 %v2622_v45, %v2621_v55  ;;  %v2624_v37 = vld [vmem:[#allocation5_spill] sm:$0xff]  ;;  %v318_v15 = vmin.f32 %v2626_v14, %v2625_v13  ;;  %v277_v20 = vrot.slane %v276_v57, 2 }
  0x3e   :  { %2615 = vst [vmem:[#allocation66_spill] sm:$0xff] %v1667_v24  ;;  %2616 = vst [vmem:[#allocation67_spill] sm:$0xff] %v1669_v56  ;;  %v312_v63 = vmin.f32 %v2624_v37, %v2623_v58  ;;  %v283_v21 = vrot.slane %v282_v26, 2  ;;  %v289_v22 = vrot.slane %v288_v36, 2  ;;  %v295_v27 = vrot.slane %v294_v9, 2 }
  0x3f   :  { %v301_v28 = vrot.slane %v300_v60, 2  ;;  %v307_v29 = vrot.slane %v306_v59, 2  ;;  %v319_v35 = vrot.slane %v318_v15, 2  ;;  %v278_v56 = vmin.f32 %v276_v57, %v277_v20 }
  0x40   :  { %v313_v34 = vrot.slane %v312_v63, 2  ;;  %v284_v24 = vmin.f32 %v282_v26, %v283_v21  ;;  %v290_v7 = vmin.f32 %v288_v36, %v289_v22  ;;  %v296_v6 = vmin.f32 %v294_v9, %v295_v27 }
  0x41   :  { %v302_v1 = vmin.f32 %v300_v60, %v301_v28  ;;  %v308_v0 = vmin.f32 %v306_v59, %v307_v29  ;;  %v320_v44 = vmin.f32 %v318_v15, %v319_v35  ;;  %v279_v37 = vrot.slane %v278_v56, 1 }
  0x42   :  { %v314_v39 = vmin.f32 %v312_v63, %v313_v34  ;;  %v285_v58 = vrot.slane %v284_v24, 1  ;;  %v291_v45 = vrot.slane %v290_v7, 1  ;;  %v297_v14 = vrot.slane %v296_v6, 1 }
  0x43   :  { %v303_v13 = vrot.slane %v302_v1, 1  ;;  %v309_v55 = vrot.slane %v308_v0, 1  ;;  %v321_v61 = vrot.slane %v320_v44, 1  ;;  %v1687_v47 = vmin.f32 %v278_v56, %v279_v37  ;;  %v2642_v37 = vld [vmem:[#allocation10_spill] sm:$0xff] }
  0x44   :  { %v315_v52 = vrot.slane %v314_v39, 1  ;;  %v1689_v46 = vmin.f32 %v284_v24, %v285_v58  ;;  %v1691_v57 = vmin.f32 %v290_v7, %v291_v45  ;;  %v1693_v26 = vmin.f32 %v296_v6, %v297_v14  ;;  %v2636_v24 = vld [vmem:[#allocation7_spill] sm:$0xff] }
  0x45   :  { %2627 = vst [vmem:[#allocation68_spill] sm:$0xff] %v1687_v47  ;;  %v1695_v36 = vmin.f32 %v302_v1, %v303_v13  ;;  %v1697_v9 = vmin.f32 %v308_v0, %v309_v55  ;;  %v1701_v59 = vmin.f32 %v320_v44, %v321_v61  ;;  %v324_v63 = vmin.f32 %v1375_v16, %v1504_v62  ;;  %v2635_v1 = vld [vmem:[#allocation32_spill] sm:$0xff]  ;;  %v2637_v55 = vld [vmem:[#allocation33_spill] sm:$0xff]  ;;  %v2639_v44 = vld [vmem:[#allocation34_spill] sm:$0xff] }
  0x46   :  { %2628 = vst [vmem:[#allocation69_spill] sm:$0xff] %v1689_v46  ;;  %2629 = vst [vmem:[#allocation70_spill] sm:$0xff] %v1691_v57  ;;  %v1699_v60 = vmin.f32 %v314_v39, %v315_v52  ;;  %v330_v56 = vmin.f32 %v1377_v17, %v1507_v11  ;;  %v336_v7 = vmin.f32 %v1379_v18, %v1510_v54  ;;  %v2638_v39 = vld [vmem:[#allocation8_spill] sm:$0xff]  ;;  %v2640_v61 = vld [vmem:[#allocation9_spill] sm:$0xff] }
  0x47   :  { %2630 = vst [vmem:[#allocation71_spill] sm:$0xff] %v1693_v26  ;;  %2631 = vst [vmem:[#allocation72_spill] sm:$0xff] %v1695_v36  ;;  %v342_v6 = vmin.f32 %v1381_v19, %v1513_v10  ;;  %v348_v0 = vmin.f32 %v2636_v24, %v2635_v1  ;;  %v354_v52 = vmin.f32 %v2638_v39, %v2637_v55  ;;  %v2641_v58 = vld [vmem:[#allocation35_spill] sm:$0xff]  ;;  %v325_v14 = vrot.slane %v324_v63, 2 }
  0x48   :  { %2632 = vst [vmem:[#allocation73_spill] sm:$0xff] %v1697_v9  ;;  %2633 = vst [vmem:[#allocation74_spill] sm:$0xff] %v1699_v60  ;;  %v360_v45 = vmin.f32 %v2640_v61, %v2639_v44  ;;  %v366_v13 = vmin.f32 %v2642_v37, %v2641_v58  ;;  %v331_v15 = vrot.slane %v330_v56, 2  ;;  %v337_v20 = vrot.slane %v336_v7, 2 }
  0x49   :  { %2634 = vst [vmem:[#allocation75_spill] sm:$0xff] %v1701_v59  ;;  %v343_v21 = vrot.slane %v342_v6, 2  ;;  %v349_v22 = vrot.slane %v348_v0, 2  ;;  %v355_v27 = vrot.slane %v354_v52, 2  ;;  %v326_v34 = vmin.f32 %v324_v63, %v325_v14 }
  0x4a   :  { %v361_v28 = vrot.slane %v360_v45, 2  ;;  %v367_v29 = vrot.slane %v366_v13, 2  ;;  %v332_v35 = vmin.f32 %v330_v56, %v331_v15  ;;  %v338_v59 = vmin.f32 %v336_v7, %v337_v20 }
  0x4b   :  { %v344_v60 = vmin.f32 %v342_v6, %v343_v21  ;;  %v350_v9 = vmin.f32 %v348_v0, %v349_v22  ;;  %v356_v36 = vmin.f32 %v354_v52, %v355_v27  ;;  %v327_v46 = vrot.slane %v326_v34, 1 }
  0x4c   :  { %v362_v26 = vmin.f32 %v360_v45, %v361_v28  ;;  %v368_v57 = vmin.f32 %v366_v13, %v367_v29  ;;  %v333_v47 = vrot.slane %v332_v35, 1  ;;  %v339_v61 = vrot.slane %v338_v59, 1 }
  0x4d   :  { %v345_v37 = vrot.slane %v344_v60, 1  ;;  %v351_v58 = vrot.slane %v350_v9, 1  ;;  %v357_v44 = vrot.slane %v356_v36, 1  ;;  %v1719_v24 = vmin.f32 %v326_v34, %v327_v46 }
  0x4e   :  { %v363_v39 = vrot.slane %v362_v26, 1  ;;  %v369_v55 = vrot.slane %v368_v57, 1  ;;  %v1721_v1 = vmin.f32 %v332_v35, %v333_v47  ;;  %v1723_v63 = vmin.f32 %v338_v59, %v339_v61  ;;  %v2652_v59 = vld [vmem:[#allocation11_spill] sm:$0xff] }
  0x4f   :  { %2643 = vst [vmem:[#allocation76_spill] sm:$0xff] %v1719_v24  ;;  %v1725_v56 = vmin.f32 %v344_v60, %v345_v37  ;;  %v1727_v7 = vmin.f32 %v350_v9, %v351_v58  ;;  %v1729_v6 = vmin.f32 %v356_v36, %v357_v44  ;;  %v372_v45 = vmin.f32 %v1409_v30, %v1560_v8  ;;  %v2651_v9 = vld [vmem:[#allocation44_spill] sm:$0xff]  ;;  %v2653_v44 = vld [vmem:[#allocation45_spill] sm:$0xff]  ;;  %v2657_v58 = vld [vmem:[#allocation47_spill] sm:$0xff] }
  0x50   :  { %2644 = vst [vmem:[#allocation77_spill] sm:$0xff] %v1721_v1  ;;  %2645 = vst [vmem:[#allocation78_spill] sm:$0xff] %v1723_v63  ;;  %v1731_v0 = vmin.f32 %v362_v26, %v363_v39  ;;  %v1733_v52 = vmin.f32 %v368_v57, %v369_v55  ;;  %v378_v46 = vmin.f32 %v1411_v31, %v1563_v51  ;;  %v2654_v26 = vld [vmem:[#allocation12_spill] sm:$0xff]  ;;  %v2655_v57 = vld [vmem:[#allocation46_spill] sm:$0xff] }
  0x51   :  { %2646 = vst [vmem:[#allocation79_spill] sm:$0xff] %v1725_v56  ;;  %2647 = vst [vmem:[#allocation80_spill] sm:$0xff] %v1727_v7  ;;  %v384_v47 = vmin.f32 %v1413_v32, %v1566_v5  ;;  %v390_v60 = vmin.f32 %v1415_v33, %v1569_v25  ;;  %v396_v36 = vmin.f32 %v2652_v59, %v2651_v9  ;;  %v2656_v55 = vld [vmem:[#allocation13_spill] sm:$0xff]  ;;  %v2658_v37 = vld [vmem:[#allocation14_spill] sm:$0xff]  ;;  %v373_v14 = vrot.slane %v372_v45, 2 }
  0x52   :  { %2648 = vst [vmem:[#allocation81_spill] sm:$0xff] %v1729_v6  ;;  %2649 = vst [vmem:[#allocation82_spill] sm:$0xff] %v1731_v0  ;;  %v402_v39 = vmin.f32 %v2654_v26, %v2653_v44  ;;  %v408_v61 = vmin.f32 %v2656_v55, %v2655_v57  ;;  %v414_v13 = vmin.f32 %v2658_v37, %v2657_v58  ;;  %v379_v15 = vrot.slane %v378_v46, 2 }
  0x53   :  { %2650 = vst [vmem:[#allocation83_spill] sm:$0xff] %v1733_v52  ;;  %v385_v20 = vrot.slane %v384_v47, 2  ;;  %v391_v21 = vrot.slane %v390_v60, 2  ;;  %v397_v22 = vrot.slane %v396_v36, 2  ;;  %v374_v34 = vmin.f32 %v372_v45, %v373_v14 }
  0x54   :  { %v403_v27 = vrot.slane %v402_v39, 2  ;;  %v409_v28 = vrot.slane %v408_v61, 2  ;;  %v415_v29 = vrot.slane %v414_v13, 2  ;;  %v380_v35 = vmin.f32 %v378_v46, %v379_v15 }
  0x55   :  { %v386_v52 = vmin.f32 %v384_v47, %v385_v20  ;;  %v392_v0 = vmin.f32 %v390_v60, %v391_v21  ;;  %v398_v6 = vmin.f32 %v396_v36, %v397_v22  ;;  %v375_v1 = vrot.slane %v374_v34, 1 }
  0x56   :  { %v404_v7 = vmin.f32 %v402_v39, %v403_v27  ;;  %v410_v56 = vmin.f32 %v408_v61, %v409_v28  ;;  %v416_v63 = vmin.f32 %v414_v13, %v415_v29  ;;  %v381_v24 = vrot.slane %v380_v35, 1 }
  0x57   :  { %v387_v55 = vrot.slane %v386_v52, 1  ;;  %v393_v37 = vrot.slane %v392_v0, 1  ;;  %v399_v58 = vrot.slane %v398_v6, 1  ;;  %v1751_v59 = vmin.f32 %v374_v34, %v375_v1 }
  0x58   :  { %v405_v57 = vrot.slane %v404_v7, 1  ;;  %v411_v26 = vrot.slane %v410_v56, 1  ;;  %v417_v44 = vrot.slane %v416_v63, 1  ;;  %v1753_v9 = vmin.f32 %v380_v35, %v381_v24 }
  0x59   :  { %2659 = vst [vmem:[#allocation84_spill] sm:$0xff] %v1751_v59  ;;  %v1755_v45 = vmin.f32 %v386_v52, %v387_v55  ;;  %v1757_v46 = vmin.f32 %v392_v0, %v393_v37  ;;  %v1759_v47 = vmin.f32 %v398_v6, %v399_v58  ;;  %v420_v61 = vmin.f32 %v1431_v40, %v1616_v53  ;;  %v2667_v6 = vld [vmem:[#allocation56_spill] sm:$0xff]  ;;  %v2668_v52 = vld [vmem:[#allocation15_spill] sm:$0xff]  ;;  %v2674_v37 = vld [vmem:[#allocation18_spill] sm:$0xff] }
  0x5a   :  { %2660 = vst [vmem:[#allocation85_spill] sm:$0xff] %v1753_v9  ;;  %v1761_v60 = vmin.f32 %v404_v7, %v405_v57  ;;  %v1763_v36 = vmin.f32 %v410_v56, %v411_v26  ;;  %v1765_v39 = vmin.f32 %v416_v63, %v417_v44  ;;  %v426_v1 = vmin.f32 %v1433_v41, %v1619_v12  ;;  %v2669_v57 = vld [vmem:[#allocation57_spill] sm:$0xff]  ;;  %v2670_v56 = vld [vmem:[#allocation16_spill] sm:$0xff]  ;;  %v2671_v63 = vld [vmem:[#allocation58_spill] sm:$0xff] }
  0x5b   :  { %2661 = vst [vmem:[#allocation86_spill] sm:$0xff] %v1755_v45  ;;  %2662 = vst [vmem:[#allocation87_spill] sm:$0xff] %v1757_v46  ;;  %v432_v24 = vmin.f32 %v1435_v42, %v1622_v23  ;;  %v438_v0 = vmin.f32 %v1437_v43, %v1625_v38  ;;  %v444_v7 = vmin.f32 %v2668_v52, %v2667_v6  ;;  %v2672_v44 = vld [vmem:[#allocation17_spill] sm:$0xff]  ;;  %v2673_v58 = vld [vmem:[#allocation59_spill] sm:$0xff]  ;;  %v421_v14 = vrot.slane %v420_v61, 2 }
  0x5c   :  { %2663 = vst [vmem:[#allocation88_spill] sm:$0xff] %v1759_v47  ;;  %2664 = vst [vmem:[#allocation89_spill] sm:$0xff] %v1761_v60  ;;  %v450_v26 = vmin.f32 %v2670_v56, %v2669_v57  ;;  %v456_v55 = vmin.f32 %v2672_v44, %v2671_v63  ;;  %v462_v13 = vmin.f32 %v2674_v37, %v2673_v58  ;;  %v427_v15 = vrot.slane %v426_v1, 2 }
  0x5d   :  { %2665 = vst [vmem:[#allocation90_spill] sm:$0xff] %v1763_v36  ;;  %2666 = vst [vmem:[#allocation91_spill] sm:$0xff] %v1765_v39  ;;  %v433_v20 = vrot.slane %v432_v24, 2  ;;  %v439_v21 = vrot.slane %v438_v0, 2  ;;  %v445_v22 = vrot.slane %v444_v7, 2  ;;  %v422_v34 = vmin.f32 %v420_v61, %v421_v14 }
  0x5e   :  { %v451_v27 = vrot.slane %v450_v26, 2  ;;  %v457_v28 = vrot.slane %v456_v55, 2  ;;  %v463_v29 = vrot.slane %v462_v13, 2  ;;  %v428_v35 = vmin.f32 %v426_v1, %v427_v15 }
  0x5f   :  { %v434_v39 = vmin.f32 %v432_v24, %v433_v20  ;;  %v440_v36 = vmin.f32 %v438_v0, %v439_v21  ;;  %v446_v60 = vmin.f32 %v444_v7, %v445_v22  ;;  %v423_v9 = vrot.slane %v422_v34, 1 }
  0x60   :  { %v452_v47 = vmin.f32 %v450_v26, %v451_v27  ;;  %v458_v46 = vmin.f32 %v456_v55, %v457_v28  ;;  %v464_v45 = vmin.f32 %v462_v13, %v463_v29  ;;  %v429_v59 = vrot.slane %v428_v35, 1  ;;  %v2691_v13 = vld [vmem:[#allocation23_spill] sm:$0xff] }
  0x61   :  { %v435_v44 = vrot.slane %v434_v39, 1  ;;  %v441_v37 = vrot.slane %v440_v36, 1  ;;  %v447_v58 = vrot.slane %v446_v60, 1  ;;  %v1783_v52 = vmin.f32 %v422_v34, %v423_v9 }
  0x62   :  { %v453_v63 = vrot.slane %v452_v47, 1  ;;  %v459_v56 = vrot.slane %v458_v46, 1  ;;  %v465_v57 = vrot.slane %v464_v45, 1  ;;  %v1785_v6 = vmin.f32 %v428_v35, %v429_v59 }
  0x63   :  { %2675 = vst [vmem:[#allocation92_spill] sm:$0xff] %v1783_v52  ;;  %v1787_v61 = vmin.f32 %v434_v39, %v435_v44  ;;  %v1789_v1 = vmin.f32 %v440_v36, %v441_v37  ;;  %v1791_v24 = vmin.f32 %v446_v60, %v447_v58  ;;  %v468_v55 = vadd.f32 %v1341_v2, %v1448_v48  ;;  %v2683_v39 = vld [vmem:[#allocation19_spill] sm:$0xff]  ;;  %v2684_v36 = vld [vmem:[#allocation2_spill] sm:$0xff]  ;;  %v2685_v60 = vld [vmem:[#allocation20_spill] sm:$0xff] }
  0x64   :  { %2676 = vst [vmem:[#allocation93_spill] sm:$0xff] %v1785_v6  ;;  %v1793_v0 = vmin.f32 %v452_v47, %v453_v63  ;;  %v1795_v7 = vmin.f32 %v458_v46, %v459_v56  ;;  %v1797_v26 = vmin.f32 %v464_v45, %v465_v57  ;;  %v474_v9 = vadd.f32 %v1343_v3, %v1451_v49  ;;  %v2686_v58 = vld [vmem:[#allocation3_spill] sm:$0xff]  ;;  %v2687_v63 = vld [vmem:[#allocation21_spill] sm:$0xff]  ;;  %v2688_v46 = vld [vmem:[#allocation4_spill] sm:$0xff] }
  0x65   :  { %2677 = vst [vmem:[#allocation94_spill] sm:$0xff] %v1787_v61  ;;  %2678 = vst [vmem:[#allocation95_spill] sm:$0xff] %v1789_v1  ;;  %v480_v59 = vadd.f32 %v1345_v4, %v1454_v50  ;;  %v486_v44 = vadd.f32 %v2684_v36, %v2683_v39  ;;  %v492_v47 = vadd.f32 %v2686_v58, %v2685_v60  ;;  %v2689_v45 = vld [vmem:[#allocation22_spill] sm:$0xff]  ;;  %v2690_v57 = vld [vmem:[#allocation5_spill] sm:$0xff]  ;;  %v469_v15 = vrot.slane %v468_v55, 2 }
  0x66   :  { %2679 = vst [vmem:[#allocation96_spill] sm:$0xff] %v1791_v24  ;;  %2680 = vst [vmem:[#allocation97_spill] sm:$0xff] %v1793_v0  ;;  %v498_v56 = vadd.f32 %v2688_v46, %v2687_v63  ;;  %v504_v37 = vadd.f32 %v2690_v57, %v2689_v45  ;;  %v2692_v48 = vld [vmem:[#allocation6_spill] sm:$0xff]  ;;  %v475_v49 = vrot.slane %v474_v9, 2 }
  0x67   :  { %2681 = vst [vmem:[#allocation98_spill] sm:$0xff] %v1795_v7  ;;  %2682 = vst [vmem:[#allocation99_spill] sm:$0xff] %v1797_v26  ;;  %v510_v14 = vadd.f32 %v2692_v48, %v2691_v13  ;;  %v481_v20 = vrot.slane %v480_v59, 2  ;;  %v487_v21 = vrot.slane %v486_v44, 2  ;;  %v493_v50 = vrot.slane %v492_v47, 2 }
  0x68   :  { %v499_v22 = vrot.slane %v498_v56, 2  ;;  %v505_v27 = vrot.slane %v504_v37, 2  ;;  %v470_v29 = vadd.f32 %v469_v15, %v468_v55  ;;  %v476_v34 = vadd.f32 %v475_v49, %v474_v9  ;;  %v2702_v15 = vld [vmem:[#allocation7_spill] sm:$0xff]  ;;  %v2703_v49 = vld [vmem:[#allocation33_spill] sm:$0xff] }
  0x69   :  { %v511_v28 = vrot.slane %v510_v14, 2  ;;  %v482_v35 = vadd.f32 %v481_v20, %v480_v59  ;;  %v488_v39 = vadd.f32 %v487_v21, %v486_v44  ;;  %v494_v60 = vadd.f32 %v493_v50, %v492_v47  ;;  %v2707_v21 = vld [vmem:[#allocation35_spill] sm:$0xff] }
  0x6a   :  { %v500_v63 = vadd.f32 %v499_v22, %v498_v56  ;;  %v506_v26 = vadd.f32 %v505_v27, %v504_v37  ;;  %v471_v45 = vrot.slane %v470_v29, 1  ;;  %v477_v0 = vrot.slane %v476_v34, 1 }
  0x6b   :  { %v512_v7 = vadd.f32 %v511_v28, %v510_v14  ;;  %v483_v24 = vrot.slane %v482_v35, 1  ;;  %v489_v13 = vrot.slane %v488_v39, 1  ;;  %v495_v1 = vrot.slane %v494_v60, 1 }
  0x6c   :  { %v501_v61 = vrot.slane %v500_v63, 1  ;;  %v507_v6 = vrot.slane %v506_v26, 1  ;;  %v1815_v48 = vadd.f32 %v471_v45, %v470_v29  ;;  %v1817_v57 = vadd.f32 %v477_v0, %v476_v34 }
  0x6d   :  { %v513_v52 = vrot.slane %v512_v7, 1  ;;  %v1819_v55 = vadd.f32 %v483_v24, %v482_v35  ;;  %v1821_v9 = vadd.f32 %v489_v13, %v488_v39  ;;  %v1823_v59 = vadd.f32 %v495_v1, %v494_v60  ;;  %v2701_v1 = vld [vmem:[#allocation32_spill] sm:$0xff] }
  0x6e   :  { %2693 = vst [vmem:[#allocation19_spill] sm:$0xff] %v1815_v48  ;;  %2694 = vst [vmem:[#allocation2_spill] sm:$0xff] %v1817_v57  ;;  %v1825_v44 = vadd.f32 %v501_v61, %v500_v63  ;;  %v1827_v47 = vadd.f32 %v507_v6, %v506_v26  ;;  %v516_v37 = vadd.f32 %v1375_v16, %v1504_v62  ;;  %v2704_v6 = vld [vmem:[#allocation8_spill] sm:$0xff]  ;;  %v2708_v62 = vld [vmem:[#allocation10_spill] sm:$0xff] }
  0x6f   :  { %2695 = vst [vmem:[#allocation20_spill] sm:$0xff] %v1819_v55  ;;  %2696 = vst [vmem:[#allocation3_spill] sm:$0xff] %v1821_v9  ;;  %v1829_v56 = vadd.f32 %v513_v52, %v512_v7  ;;  %v522_v14 = vadd.f32 %v1377_v17, %v1507_v11  ;;  %v528_v24 = vadd.f32 %v1379_v18, %v1510_v54  ;;  %v2705_v52 = vld [vmem:[#allocation34_spill] sm:$0xff]  ;;  %v2706_v7 = vld [vmem:[#allocation9_spill] sm:$0xff] }
  0x70   :  { %2697 = vst [vmem:[#allocation21_spill] sm:$0xff] %v1823_v59  ;;  %2698 = vst [vmem:[#allocation4_spill] sm:$0xff] %v1825_v44  ;;  %v534_v0 = vadd.f32 %v1381_v19, %v1513_v10  ;;  %v540_v61 = vadd.f32 %v2702_v15, %v2701_v1  ;;  %v546_v26 = vadd.f32 %v2704_v6, %v2703_v49  ;;  %v517_v22 = vrot.slane %v516_v37, 2 }
  0x71   :  { %2699 = vst [vmem:[#allocation22_spill] sm:$0xff] %v1827_v47  ;;  %2700 = vst [vmem:[#allocation23_spill] sm:$0xff] %v1829_v56  ;;  %v552_v20 = vadd.f32 %v2706_v7, %v2705_v52  ;;  %v558_v50 = vadd.f32 %v2708_v62, %v2707_v21  ;;  %v523_v11 = vrot.slane %v522_v14, 2  ;;  %v529_v27 = vrot.slane %v528_v24, 2 }
  0x72   :  { %v535_v28 = vrot.slane %v534_v0, 2  ;;  %v541_v54 = vrot.slane %v540_v61, 2  ;;  %v547_v29 = vrot.slane %v546_v26, 2  ;;  %v518_v35 = vadd.f32 %v517_v22, %v516_v37  ;;  %v2718_v22 = vld [vmem:[#allocation11_spill] sm:$0xff] }
  0x73   :  { %v553_v34 = vrot.slane %v552_v20, 2  ;;  %v559_v10 = vrot.slane %v558_v50, 2  ;;  %v524_v39 = vadd.f32 %v523_v11, %v522_v14  ;;  %v530_v60 = vadd.f32 %v529_v27, %v528_v24  ;;  %v2719_v11 = vld [vmem:[#allocation45_spill] sm:$0xff] }
  0x74   :  { %v536_v63 = vadd.f32 %v535_v28, %v534_v0  ;;  %v542_v45 = vadd.f32 %v541_v54, %v540_v61  ;;  %v548_v13 = vadd.f32 %v547_v29, %v546_v26  ;;  %v519_v52 = vrot.slane %v518_v35, 1  ;;  %v2722_v28 = vld [vmem:[#allocation13_spill] sm:$0xff]  ;;  %v2723_v29 = vld [vmem:[#allocation47_spill] sm:$0xff] }
  0x75   :  { %v554_v1 = vadd.f32 %v553_v34, %v552_v20  ;;  %v560_v49 = vadd.f32 %v559_v10, %v558_v50  ;;  %v525_v56 = vrot.slane %v524_v39, 1  ;;  %v531_v47 = vrot.slane %v530_v60, 1 }
  0x76   :  { %v537_v21 = vrot.slane %v536_v63, 1  ;;  %v543_v44 = vrot.slane %v542_v45, 1  ;;  %v549_v59 = vrot.slane %v548_v13, 1  ;;  %v1847_v57 = vadd.f32 %v519_v52, %v518_v35 }
  0x77   :  { %v555_v9 = vrot.slane %v554_v1, 1  ;;  %v561_v55 = vrot.slane %v560_v49, 1  ;;  %v1849_v48 = vadd.f32 %v525_v56, %v524_v39  ;;  %v1851_v37 = vadd.f32 %v531_v47, %v530_v60 }
  0x78   :  { %2709 = vst [vmem:[#allocation32_spill] sm:$0xff] %v1847_v57  ;;  %v1853_v14 = vadd.f32 %v537_v21, %v536_v63  ;;  %v1855_v24 = vadd.f32 %v543_v44, %v542_v45  ;;  %v1857_v0 = vadd.f32 %v549_v59, %v548_v13  ;;  %v564_v20 = vadd.f32 %v1409_v30, %v1560_v8  ;;  %v2717_v44 = vld [vmem:[#allocation44_spill] sm:$0xff]  ;;  %v2724_v8 = vld [vmem:[#allocation14_spill] sm:$0xff] }
  0x79   :  { %2710 = vst [vmem:[#allocation7_spill] sm:$0xff] %v1849_v48  ;;  %2711 = vst [vmem:[#allocation33_spill] sm:$0xff] %v1851_v37  ;;  %v1859_v61 = vadd.f32 %v555_v9, %v554_v1  ;;  %v1861_v26 = vadd.f32 %v561_v55, %v560_v49  ;;  %v570_v50 = vadd.f32 %v1411_v31, %v1563_v51  ;;  %v2720_v9 = vld [vmem:[#allocation12_spill] sm:$0xff]  ;;  %v2721_v55 = vld [vmem:[#allocation46_spill] sm:$0xff] }
  0x7a   :  { %2712 = vst [vmem:[#allocation8_spill] sm:$0xff] %v1853_v14  ;;  %2713 = vst [vmem:[#allocation34_spill] sm:$0xff] %v1855_v24  ;;  %v576_v47 = vadd.f32 %v1413_v32, %v1566_v5  ;;  %v582_v56 = vadd.f32 %v1415_v33, %v1569_v25  ;;  %v588_v59 = vadd.f32 %v2718_v22, %v2717_v44  ;;  %v565_v10 = vrot.slane %v564_v20, 2 }
  0x7b   :  { %2714 = vst [vmem:[#allocation9_spill] sm:$0xff] %v1857_v0  ;;  %2715 = vst [vmem:[#allocation35_spill] sm:$0xff] %v1859_v61  ;;  %v594_v27 = vadd.f32 %v2720_v9, %v2719_v11  ;;  %v600_v54 = vadd.f32 %v2722_v28, %v2721_v55  ;;  %v606_v34 = vadd.f32 %v2724_v8, %v2723_v29  ;;  %v571_v51 = vrot.slane %v570_v50, 2 }
  0x7c   :  { %2716 = vst [vmem:[#allocation10_spill] sm:$0xff] %v1861_v26  ;;  %v577_v35 = vrot.slane %v576_v47, 2  ;;  %v583_v39 = vrot.slane %v582_v56, 2  ;;  %v589_v5 = vrot.slane %v588_v59, 2  ;;  %v566_v45 = vadd.f32 %v565_v10, %v564_v20  ;;  %v2734_v10 = vld [vmem:[#allocation15_spill] sm:$0xff] }
  0x7d   :  { %v595_v60 = vrot.slane %v594_v27, 2  ;;  %v601_v63 = vrot.slane %v600_v54, 2  ;;  %v607_v25 = vrot.slane %v606_v34, 2  ;;  %v572_v13 = vadd.f32 %v571_v51, %v570_v50  ;;  %v2735_v51 = vld [vmem:[#allocation57_spill] sm:$0xff] }
  0x7e   :  { %v578_v1 = vadd.f32 %v577_v35, %v576_v47  ;;  %v584_v49 = vadd.f32 %v583_v39, %v582_v56  ;;  %v590_v52 = vadd.f32 %v589_v5, %v588_v59  ;;  %v567_v55 = vrot.slane %v566_v45, 1  ;;  %v2738_v39 = vld [vmem:[#allocation17_spill] sm:$0xff] }
  0x7f   :  { %v596_v21 = vadd.f32 %v595_v60, %v594_v27  ;;  %v602_v44 = vadd.f32 %v601_v63, %v600_v54  ;;  %v608_v11 = vadd.f32 %v607_v25, %v606_v34  ;;  %v573_v26 = vrot.slane %v572_v13, 1  ;;  %v2739_v60 = vld [vmem:[#allocation59_spill] sm:$0xff] }
  0x80   :  { %v579_v61 = vrot.slane %v578_v1, 1  ;;  %v585_v29 = vrot.slane %v584_v49, 1  ;;  %v591_v0 = vrot.slane %v590_v52, 1  ;;  %v1879_v48 = vadd.f32 %v567_v55, %v566_v45 }
  0x81   :  { %v597_v24 = vrot.slane %v596_v21, 1  ;;  %v603_v14 = vrot.slane %v602_v44, 1  ;;  %v609_v37 = vrot.slane %v608_v11, 1  ;;  %v1881_v57 = vadd.f32 %v573_v26, %v572_v13 }
  0x82   :  { %2725 = vst [vmem:[#allocation44_spill] sm:$0xff] %v1879_v48  ;;  %v1883_v20 = vadd.f32 %v579_v61, %v578_v1  ;;  %v1885_v50 = vadd.f32 %v585_v29, %v584_v49  ;;  %v1887_v47 = vadd.f32 %v591_v0, %v590_v52  ;;  %v612_v54 = vadd.f32 %v1431_v40, %v1616_v53  ;;  %v2733_v0 = vld [vmem:[#allocation56_spill] sm:$0xff]  ;;  %v2740_v53 = vld [vmem:[#allocation18_spill] sm:$0xff] }
  0x83   :  { %2726 = vst [vmem:[#allocation11_spill] sm:$0xff] %v1881_v57  ;;  %v1889_v56 = vadd.f32 %v597_v24, %v596_v21  ;;  %v1891_v59 = vadd.f32 %v603_v14, %v602_v44  ;;  %v1893_v27 = vadd.f32 %v609_v37, %v608_v11  ;;  %v618_v34 = vadd.f32 %v1433_v41, %v1619_v12  ;;  %v2736_v14 = vld [vmem:[#allocation16_spill] sm:$0xff]  ;;  %v2737_v37 = vld [vmem:[#allocation58_spill] sm:$0xff] }
  0x84   :  { %2727 = vst [vmem:[#allocation45_spill] sm:$0xff] %v1883_v20  ;;  %2728 = vst [vmem:[#allocation12_spill] sm:$0xff] %v1885_v50  ;;  %v624_v61 = vadd.f32 %v1435_v42, %v1622_v23  ;;  %v630_v26 = vadd.f32 %v1437_v43, %v1625_v38  ;;  %v636_v24 = vadd.f32 %v2734_v10, %v2733_v0  ;;  %v613_v25 = vrot.slane %v612_v54, 2 }
  0x85   :  { %2729 = vst [vmem:[#allocation46_spill] sm:$0xff] %v1887_v47  ;;  %2730 = vst [vmem:[#allocation13_spill] sm:$0xff] %v1889_v56  ;;  %v642_v35 = vadd.f32 %v2736_v14, %v2735_v51  ;;  %v648_v5 = vadd.f32 %v2738_v39, %v2737_v37  ;;  %v654_v63 = vadd.f32 %v2740_v53, %v2739_v60  ;;  %v619_v12 = vrot.slane %v618_v34, 2 }
  0x86   :  { %2731 = vst [vmem:[#allocation47_spill] sm:$0xff] %v1891_v59  ;;  %2732 = vst [vmem:[#allocation14_spill] sm:$0xff] %v1893_v27  ;;  %v625_v45 = vrot.slane %v624_v61, 2  ;;  %v631_v13 = vrot.slane %v630_v26, 2  ;;  %v637_v23 = vrot.slane %v636_v24, 2  ;;  %v614_v52 = vadd.f32 %v613_v25, %v612_v54  ;;  %v2746_v25 = vld [vmem:[#allocation6_spill] sm:$0xff] }
  0x87   :  { %v643_v1 = vrot.slane %v642_v35, 2  ;;  %v649_v49 = vrot.slane %v648_v5, 2  ;;  %v655_v38 = vrot.slane %v654_v63, 2  ;;  %v620_v21 = vadd.f32 %v619_v12, %v618_v34 }
  0x88   :  { %v626_v44 = vadd.f32 %v625_v45, %v624_v61  ;;  %v632_v11 = vadd.f32 %v631_v13, %v630_v26  ;;  %v638_v55 = vadd.f32 %v637_v23, %v636_v24  ;;  %v615_v37 = vrot.slane %v614_v52, 1 }
  0x89   :  { %v644_v29 = vadd.f32 %v643_v1, %v642_v35  ;;  %v650_v0 = vadd.f32 %v649_v49, %v648_v5  ;;  %v656_v51 = vadd.f32 %v655_v38, %v654_v63  ;;  %v621_v27 = vrot.slane %v620_v21, 1 }
  0x8a   :  { %v627_v59 = vrot.slane %v626_v44, 1  ;;  %v633_v60 = vrot.slane %v632_v11, 1  ;;  %v639_v56 = vrot.slane %v638_v55, 1  ;;  %v1911_v57 = vadd.f32 %v615_v37, %v614_v52 }
  0x8b   :  { %v645_v47 = vrot.slane %v644_v29, 1  ;;  %v651_v50 = vrot.slane %v650_v0, 1  ;;  %v657_v20 = vrot.slane %v656_v51, 1  ;;  %v1913_v48 = vadd.f32 %v621_v27, %v620_v21 }
  0x8c   :  { %v1915_v54 = vadd.f32 %v627_v59, %v626_v44  ;;  %v1917_v34 = vadd.f32 %v633_v60, %v632_v11  ;;  %v1919_v61 = vadd.f32 %v639_v56, %v638_v55  ;;  %v659_v5 = vmul.f32 %v1341_v2, %v1341_v2 }
  0x8d   :  { %v1921_v26 = vadd.f32 %v645_v47, %v644_v29  ;;  %v1923_v24 = vadd.f32 %v651_v50, %v650_v0  ;;  %v1925_v35 = vadd.f32 %v657_v20, %v656_v51  ;;  %v660_v63 = vmul.f32 %v1343_v3, %v1343_v3  ;;  %v2745_v20 = vld [vmem:[#allocation5_spill] sm:$0xff] }
  0x8e   :  { %2741 = vst [vmem:[#allocation56_spill] sm:$0xff] %v1919_v61  ;;  %v661_v59 = vmul.f32 %v1345_v4, %v1345_v4  ;;  %v662_v27 = vmul.f32 %v2684_v36, %v2684_v36  ;;  %v663_v47 = vmul.f32 %v2686_v58, %v2686_v58  ;;  %v664_v50 = vmul.f32 %v2688_v46, %v2688_v46 }
  0x8f   :  { %2742 = vst [vmem:[#allocation15_spill] sm:$0xff] %v1921_v26  ;;  %2743 = vst [vmem:[#allocation57_spill] sm:$0xff] %v1923_v24  ;;  %v665_v56 = vmul.f32 %v2745_v20, %v2745_v20  ;;  %v666_v2 = vmul.f32 %v2746_v25, %v2746_v25  ;;  %v1945_v3 = vmul.f32 %v1375_v16, %v1375_v16  ;;  %v691_v12 = vrot.slane %v659_v5, 4 }
  0x90   :  { %2744 = vst [vmem:[#allocation16_spill] sm:$0xff] %v1925_v35  ;;  %v1949_v4 = vmul.f32 %v1377_v17, %v1377_v17  ;;  %v1953_v36 = vmul.f32 %v1379_v18, %v1379_v18  ;;  %v1957_v58 = vmul.f32 %v1381_v19, %v1381_v19  ;;  %v1961_v46 = vmul.f32 %v2702_v15, %v2702_v15 }
  0x91   :  { %v1965_v16 = vmul.f32 %v2704_v6, %v2704_v6  ;;  %v1969_v17 = vmul.f32 %v2706_v7, %v2706_v7  ;;  %v1973_v18 = vmul.f32 %v2708_v62, %v2708_v62  ;;  %v1977_v19 = vmul.f32 %v1409_v30, %v1409_v30 }
  0x92   :  { %v1981_v15 = vmul.f32 %v1411_v31, %v1411_v31  ;;  %v1985_v6 = vmul.f32 %v1413_v32, %v1413_v32  ;;  %v1989_v7 = vmul.f32 %v1415_v33, %v1415_v33  ;;  %v1993_v62 = vmul.f32 %v2718_v22, %v2718_v22 }
  0x93   :  { %v1997_v30 = vmul.f32 %v2720_v9, %v2720_v9  ;;  %v2001_v31 = vmul.f32 %v2722_v28, %v2722_v28  ;;  %v2005_v32 = vmul.f32 %v2724_v8, %v2724_v8  ;;  %v2009_v33 = vmul.f32 %v1431_v40, %v1431_v40 }
  0x94   :  { %v2013_v22 = vmul.f32 %v1433_v41, %v1433_v41  ;;  %v2017_v9 = vmul.f32 %v1435_v42, %v1435_v42  ;;  %v2021_v28 = vmul.f32 %v1437_v43, %v1437_v43  ;;  %v2025_v8 = vmul.f32 %v2734_v10, %v2734_v10 }
  0x95   :  { %v2029_v40 = vmul.f32 %v2736_v14, %v2736_v14  ;;  %v2033_v41 = vmul.f32 %v2738_v39, %v2738_v39  ;;  %v2037_v42 = vmul.f32 %v2740_v53, %v2740_v53  ;;  %v697_v45 = vrot.slane %v660_v63, 4 }
  0x96   :  { %v703_v43 = vrot.slane %v661_v59, 4  ;;  %v709_v13 = vrot.slane %v662_v27, 4  ;;  %v715_v23 = vrot.slane %v663_v47, 4  ;;  %v721_v1 = vrot.slane %v664_v50, 4 }
  0x97   :  { %v727_v10 = vrot.slane %v665_v56, 4  ;;  %v733_v49 = vrot.slane %v666_v2, 4  ;;  %v692_v38 = vadd.f32 %v691_v12, %v659_v5  ;;  %v698_v52 = vadd.f32 %v697_v45, %v660_v63 }
  0x98   :  { %v704_v14 = vadd.f32 %v703_v43, %v661_v59  ;;  %v710_v21 = vadd.f32 %v709_v13, %v662_v27  ;;  %v716_v44 = vadd.f32 %v715_v23, %v663_v47  ;;  %v722_v11 = vadd.f32 %v721_v1, %v664_v50 }
  0x99   :  { %v728_v39 = vadd.f32 %v727_v10, %v665_v56  ;;  %v734_v55 = vadd.f32 %v733_v49, %v666_v2  ;;  %v693_v29 = vrot.slane %v692_v38, 2  ;;  %v699_v0 = vrot.slane %v698_v52, 2 }
  0x9a   :  { %v705_v53 = vrot.slane %v704_v14, 2  ;;  %v711_v51 = vrot.slane %v710_v21, 2  ;;  %v717_v37 = vrot.slane %v716_v44, 2  ;;  %v723_v60 = vrot.slane %v722_v11, 2 }
  0x9b   :  { %v729_v20 = vrot.slane %v728_v39, 2  ;;  %v735_v25 = vrot.slane %v734_v55, 2  ;;  %v694_v35 = vadd.f32 %v693_v29, %v692_v38  ;;  %v700_v24 = vadd.f32 %v699_v0, %v698_v52 }
  0x9c   :  { %v706_v26 = vadd.f32 %v705_v53, %v704_v14  ;;  %v712_v61 = vadd.f32 %v711_v51, %v710_v21  ;;  %v718_v5 = vadd.f32 %v717_v37, %v716_v44  ;;  %v724_v63 = vadd.f32 %v723_v60, %v722_v11 }
  0x9d   :  { %v730_v59 = vadd.f32 %v729_v20, %v728_v39  ;;  %v736_v27 = vadd.f32 %v735_v25, %v734_v55  ;;  %v695_v47 = vrot.slane %v694_v35, 1  ;;  %v701_v50 = vrot.slane %v700_v24, 1 }
  0x9e   :  { %v707_v56 = vrot.slane %v706_v26, 1  ;;  %v713_v2 = vrot.slane %v712_v61, 1  ;;  %v719_v12 = vrot.slane %v718_v5, 1  ;;  %v725_v45 = vrot.slane %v724_v63, 1 }
  0x9f   :  { %v731_v43 = vrot.slane %v730_v59, 1  ;;  %v737_v13 = vrot.slane %v736_v27, 1  ;;  %v2039_v23 = vadd.f32 %v695_v47, %v694_v35  ;;  %v2041_v1 = vadd.f32 %v701_v50, %v700_v24 }
  0xa0   :  { %v2043_v10 = vadd.f32 %v707_v56, %v706_v26  ;;  %v2045_v49 = vadd.f32 %v713_v2, %v712_v61  ;;  %v2047_v38 = vadd.f32 %v719_v12, %v718_v5  ;;  %v2049_v52 = vadd.f32 %v725_v45, %v724_v63 }
  0xa1   :  { %v2051_v14 = vadd.f32 %v731_v43, %v730_v59  ;;  %v2053_v21 = vadd.f32 %v737_v13, %v736_v27  ;;  %v739_v44 = vrot.slane %v1945_v3, 4  ;;  %v745_v11 = vrot.slane %v1949_v4, 4 }
  0xa2   :  { %v751_v35 = vrot.slane %v1953_v36, 4  ;;  %v757_v24 = vrot.slane %v1957_v58, 4  ;;  %v763_v26 = vrot.slane %v1961_v46, 4  ;;  %v769_v61 = vrot.slane %v1965_v16, 4 }
  0xa3   :  { %v775_v39 = vrot.slane %v1969_v17, 4  ;;  %v781_v55 = vrot.slane %v1973_v18, 4  ;;  %v740_v29 = vadd.f32 %v739_v44, %v1945_v3  ;;  %v746_v0 = vadd.f32 %v745_v11, %v1949_v4 }
  0xa4   :  { %v752_v53 = vadd.f32 %v751_v35, %v1953_v36  ;;  %v758_v51 = vadd.f32 %v757_v24, %v1957_v58  ;;  %v764_v37 = vadd.f32 %v763_v26, %v1961_v46  ;;  %v770_v60 = vadd.f32 %v769_v61, %v1965_v16 }
  0xa5   :  { %v776_v20 = vadd.f32 %v775_v39, %v1969_v17  ;;  %v782_v25 = vadd.f32 %v781_v55, %v1973_v18  ;;  %v741_v5 = vrot.slane %v740_v29, 2  ;;  %v747_v63 = vrot.slane %v746_v0, 2 }
  0xa6   :  { %v753_v59 = vrot.slane %v752_v53, 2  ;;  %v759_v27 = vrot.slane %v758_v51, 2  ;;  %v765_v47 = vrot.slane %v764_v37, 2  ;;  %v771_v3 = vrot.slane %v770_v60, 2 }
  0xa7   :  { %v777_v50 = vrot.slane %v776_v20, 2  ;;  %v783_v4 = vrot.slane %v782_v25, 2  ;;  %v742_v56 = vadd.f32 %v741_v5, %v740_v29  ;;  %v748_v36 = vadd.f32 %v747_v63, %v746_v0 }
  0xa8   :  { %v754_v2 = vadd.f32 %v753_v59, %v752_v53  ;;  %v760_v58 = vadd.f32 %v759_v27, %v758_v51  ;;  %v766_v12 = vadd.f32 %v765_v47, %v764_v37  ;;  %v772_v46 = vadd.f32 %v771_v3, %v770_v60 }
  0xa9   :  { %v778_v45 = vadd.f32 %v777_v50, %v776_v20  ;;  %v784_v16 = vadd.f32 %v783_v4, %v782_v25  ;;  %v743_v43 = vrot.slane %v742_v56, 1  ;;  %v749_v17 = vrot.slane %v748_v36, 1 }
  0xaa   :  { %v755_v13 = vrot.slane %v754_v2, 1  ;;  %v761_v18 = vrot.slane %v760_v58, 1  ;;  %v767_v44 = vrot.slane %v766_v12, 1  ;;  %v773_v11 = vrot.slane %v772_v46, 1 }
  0xab   :  { %v779_v35 = vrot.slane %v778_v45, 1  ;;  %v785_v24 = vrot.slane %v784_v16, 1  ;;  %v2071_v26 = vadd.f32 %v743_v43, %v742_v56  ;;  %v2073_v61 = vadd.f32 %v749_v17, %v748_v36 }
  0xac   :  { %v2075_v39 = vadd.f32 %v755_v13, %v754_v2  ;;  %v2077_v55 = vadd.f32 %v761_v18, %v760_v58  ;;  %v2079_v29 = vadd.f32 %v767_v44, %v766_v12  ;;  %v2081_v0 = vadd.f32 %v773_v11, %v772_v46 }
  0xad   :  { %v2083_v53 = vadd.f32 %v779_v35, %v778_v45  ;;  %v2085_v51 = vadd.f32 %v785_v24, %v784_v16  ;;  %v787_v37 = vrot.slane %v1977_v19, 4  ;;  %v793_v60 = vrot.slane %v1981_v15, 4 }
  0xae   :  { %v799_v20 = vrot.slane %v1985_v6, 4  ;;  %v805_v25 = vrot.slane %v1989_v7, 4  ;;  %v811_v5 = vrot.slane %v1993_v62, 4  ;;  %v817_v63 = vrot.slane %v1997_v30, 4 }
  0xaf   :  { %v823_v59 = vrot.slane %v2001_v31, 4  ;;  %v829_v27 = vrot.slane %v2005_v32, 4  ;;  %v788_v47 = vadd.f32 %v787_v37, %v1977_v19  ;;  %v794_v3 = vadd.f32 %v793_v60, %v1981_v15 }
  0xb0   :  { %v800_v50 = vadd.f32 %v799_v20, %v1985_v6  ;;  %v806_v4 = vadd.f32 %v805_v25, %v1989_v7  ;;  %v812_v56 = vadd.f32 %v811_v5, %v1993_v62  ;;  %v818_v36 = vadd.f32 %v817_v63, %v1997_v30 }
  0xb1   :  { %v824_v2 = vadd.f32 %v823_v59, %v2001_v31  ;;  %v830_v58 = vadd.f32 %v829_v27, %v2005_v32  ;;  %v789_v12 = vrot.slane %v788_v47, 2  ;;  %v795_v46 = vrot.slane %v794_v3, 2 }
  0xb2   :  { %v801_v45 = vrot.slane %v800_v50, 2  ;;  %v807_v16 = vrot.slane %v806_v4, 2  ;;  %v813_v43 = vrot.slane %v812_v56, 2  ;;  %v819_v19 = vrot.slane %v818_v36, 2 }
  0xb3   :  { %v825_v17 = vrot.slane %v824_v2, 2  ;;  %v831_v15 = vrot.slane %v830_v58, 2  ;;  %v790_v13 = vadd.f32 %v789_v12, %v788_v47  ;;  %v796_v6 = vadd.f32 %v795_v46, %v794_v3 }
  0xb4   :  { %v802_v18 = vadd.f32 %v801_v45, %v800_v50  ;;  %v808_v7 = vadd.f32 %v807_v16, %v806_v4  ;;  %v814_v44 = vadd.f32 %v813_v43, %v812_v56  ;;  %v820_v62 = vadd.f32 %v819_v19, %v818_v36 }
  0xb5   :  { %v826_v11 = vadd.f32 %v825_v17, %v824_v2  ;;  %v832_v30 = vadd.f32 %v831_v15, %v830_v58  ;;  %v791_v35 = vrot.slane %v790_v13, 1  ;;  %v797_v31 = vrot.slane %v796_v6, 1 }
  0xb6   :  { %v803_v24 = vrot.slane %v802_v18, 1  ;;  %v809_v32 = vrot.slane %v808_v7, 1  ;;  %v815_v37 = vrot.slane %v814_v44, 1  ;;  %v821_v60 = vrot.slane %v820_v62, 1 }
  0xb7   :  { %v827_v20 = vrot.slane %v826_v11, 1  ;;  %v833_v25 = vrot.slane %v832_v30, 1  ;;  %v2103_v5 = vadd.f32 %v791_v35, %v790_v13  ;;  %v2105_v63 = vadd.f32 %v797_v31, %v796_v6 }
  0xb8   :  { %v2107_v59 = vadd.f32 %v803_v24, %v802_v18  ;;  %v2109_v27 = vadd.f32 %v809_v32, %v808_v7  ;;  %v2111_v47 = vadd.f32 %v815_v37, %v814_v44  ;;  %v2113_v3 = vadd.f32 %v821_v60, %v820_v62 }
  0xb9   :  { %v2115_v50 = vadd.f32 %v827_v20, %v826_v11  ;;  %v2117_v4 = vadd.f32 %v833_v25, %v832_v30  ;;  %v835_v56 = vrot.slane %v2009_v33, 4  ;;  %v841_v36 = vrot.slane %v2013_v22, 4 }
  0xba   :  { %v847_v2 = vrot.slane %v2017_v9, 4  ;;  %v853_v58 = vrot.slane %v2021_v28, 4  ;;  %v859_v12 = vrot.slane %v2025_v8, 4  ;;  %v865_v46 = vrot.slane %v2029_v40, 4 }
  0xbb   :  { %v871_v45 = vrot.slane %v2033_v41, 4  ;;  %v877_v16 = vrot.slane %v2037_v42, 4  ;;  %v836_v43 = vadd.f32 %v835_v56, %v2009_v33  ;;  %v842_v19 = vadd.f32 %v841_v36, %v2013_v22 }
  0xbc   :  { %v848_v17 = vadd.f32 %v847_v2, %v2017_v9  ;;  %v854_v15 = vadd.f32 %v853_v58, %v2021_v28  ;;  %v860_v13 = vadd.f32 %v859_v12, %v2025_v8  ;;  %v866_v6 = vadd.f32 %v865_v46, %v2029_v40 }
  0xbd   :  { %v872_v18 = vadd.f32 %v871_v45, %v2033_v41  ;;  %v878_v7 = vadd.f32 %v877_v16, %v2037_v42  ;;  %v837_v44 = vrot.slane %v836_v43, 2  ;;  %v843_v62 = vrot.slane %v842_v19, 2 }
  0xbe   :  { %v849_v11 = vrot.slane %v848_v17, 2  ;;  %v855_v30 = vrot.slane %v854_v15, 2  ;;  %v861_v35 = vrot.slane %v860_v13, 2  ;;  %v867_v33 = vrot.slane %v866_v6, 2 }
  0xbf   :  { %v873_v31 = vrot.slane %v872_v18, 2  ;;  %v879_v22 = vrot.slane %v878_v7, 2  ;;  %v838_v24 = vadd.f32 %v837_v44, %v836_v43  ;;  %v844_v9 = vadd.f32 %v843_v62, %v842_v19  ;;  %v2750_v62 = vld [vmem:[#allocation76_spill] sm:$0xff] }
  0xc0   :  { %v850_v32 = vadd.f32 %v849_v11, %v848_v17  ;;  %v856_v28 = vadd.f32 %v855_v30, %v854_v15  ;;  %v862_v37 = vadd.f32 %v861_v35, %v860_v13  ;;  %v868_v8 = vadd.f32 %v867_v33, %v866_v6  ;;  %v2747_v13 = vld [vmem:[#allocation68_spill] sm:$0xff]  ;;  %v2748_v6 = vld [vmem:[#allocation69_spill] sm:$0xff] }
  0xc1   :  { %v874_v60 = vadd.f32 %v873_v31, %v872_v18  ;;  %v880_v40 = vadd.f32 %v879_v22, %v878_v7  ;;  %v839_v20 = vrot.slane %v838_v24, 1  ;;  %v845_v41 = vrot.slane %v844_v9, 1  ;;  %v2749_v7 = vld [vmem:[#allocation70_spill] sm:$0xff]  ;;  %v2751_v11 = vld [vmem:[#allocation77_spill] sm:$0xff]  ;;  %v2752_v35 = vld [vmem:[#allocation84_spill] sm:$0xff] }
  0xc2   :  { %v851_v25 = vrot.slane %v850_v32, 1  ;;  %v857_v42 = vrot.slane %v856_v28, 1  ;;  %v863_v56 = vrot.slane %v862_v37, 1  ;;  %v869_v36 = vrot.slane %v868_v8, 1  ;;  %v2753_v33 = vld [vmem:[#allocation85_spill] sm:$0xff]  ;;  %v2754_v22 = vld [vmem:[#allocation92_spill] sm:$0xff] }
  0xc3   :  { %v875_v2 = vrot.slane %v874_v60, 1  ;;  %v881_v58 = vrot.slane %v880_v40, 1  ;;  %v2135_v12 = vadd.f32 %v839_v20, %v838_v24  ;;  %v2137_v46 = vadd.f32 %v845_v41, %v844_v9  ;;  %v2755_v24 = vld [vmem:[#allocation93_spill] sm:$0xff]  ;;  %v2759_v20 = vld [vmem:[#allocation94_spill] sm:$0xff] }
  0xc4   :  { %v2139_v45 = vadd.f32 %v851_v25, %v850_v32  ;;  %v2141_v16 = vadd.f32 %v857_v42, %v856_v28  ;;  %v2143_v43 = vadd.f32 %v863_v56, %v862_v37  ;;  %v2145_v19 = vadd.f32 %v869_v36, %v868_v8  ;;  %v2756_v32 = vld [vmem:[#allocation71_spill] sm:$0xff]  ;;  %v2757_v37 = vld [vmem:[#allocation78_spill] sm:$0xff]  ;;  %v2760_v25 = vld [vmem:[#allocation72_spill] sm:$0xff] }
  0xc5   :  { %v2147_v17 = vadd.f32 %v875_v2, %v874_v60  ;;  %v2149_v15 = vadd.f32 %v881_v58, %v880_v40  ;;  %v916_v18 = vsel %vm915_vm0, %v2748_v6, %v2747_v13  ;;  %v929_v30 = vsel %vm915_vm0, %v2751_v11, %v2750_v62  ;;  %v2758_v60 = vld [vmem:[#allocation86_spill] sm:$0xff]  ;;  %v2761_v56 = vld [vmem:[#allocation79_spill] sm:$0xff]  ;;  %v2766_v11 = vld [vmem:[#allocation88_spill] sm:$0xff] }
  0xc6   :  { %v918_v44 = vsel %vm917_vm1, %v2749_v7, %v916_v18  ;;  %v936_v31 = vsel %vm915_vm0, %v2753_v33, %v2752_v35  ;;  %v943_v9 = vsel %vm915_vm0, %v2755_v24, %v2754_v22  ;;  %v930_v8 = vsel %vm917_vm1, %v2757_v37, %v929_v30  ;;  %v2762_v2 = vld [vmem:[#allocation87_spill] sm:$0xff]  ;;  %v2764_v18 = vld [vmem:[#allocation73_spill] sm:$0xff]  ;;  %v2767_v35 = vld [vmem:[#allocation96_spill] sm:$0xff] }
  0xc7   :  { %v920_v28 = vsel %vm919_vm2, %v2756_v32, %v918_v44  ;;  %v937_v40 = vsel %vm917_vm1, %v2758_v60, %v936_v31  ;;  %v944_v41 = vsel %vm917_vm1, %v2759_v20, %v943_v9  ;;  %v931_v36 = vsel %vm919_vm2, %v2761_v56, %v930_v8  ;;  %v2763_v13 = vld [vmem:[#allocation95_spill] sm:$0xff]  ;;  %v2765_v44 = vld [vmem:[#allocation80_spill] sm:$0xff]  ;;  %v2768_v31 = vld [vmem:[#allocation74_spill] sm:$0xff] }
  0xc8   :  { %v922_v42 = vsel %vm921_vm3, %v2760_v25, %v920_v28  ;;  %v938_v58 = vsel %vm919_vm2, %v2762_v2, %v937_v40  ;;  %v945_v6 = vsel %vm919_vm2, %v2763_v13, %v944_v41  ;;  %v932_v62 = vsel %vm921_vm3, %v2765_v44, %v931_v36  ;;  %v2769_v24 = vld [vmem:[#allocation81_spill] sm:$0xff]  ;;  %v2200_v60 = vld [vmem:[%s2478_s0] sm:$0xff]  ;;  %v2772_v40 = vld [vmem:[#allocation75_spill] sm:$0xff] }
  0xc9   :  { %v924_v7 = vsel %vm923_vm4, %v2764_v18, %v922_v42  ;;  %v939_v30 = vsel %vm921_vm3, %v2766_v11, %v938_v58  ;;  %v946_v33 = vsel %vm921_vm3, %v2767_v35, %v945_v6  ;;  %v933_v9 = vsel %vm923_vm4, %v2769_v24, %v932_v62  ;;  %v2770_v32 = vld [vmem:[#allocation89_spill] sm:$0xff]  ;;  %v2773_v41 = vld [vmem:[#allocation82_spill] sm:$0xff]  ;;  %v2213_v58 = vld [vmem:[%s2478_s0 + $0x8] sm:$0xff] }
  0xca   :  { %v926_v22 = vsel %vm925_vm5, %v2768_v31, %v924_v7  ;;  %v940_v28 = vsel %vm923_vm4, %v2770_v32, %v939_v30  ;;  %v2771_v37 = vld [vmem:[#allocation97_spill] sm:$0xff]  ;;  %v934_v25 = vsel %vm925_vm5, %v2773_v41, %v933_v9  ;;  %v2774_v42 = vld [vmem:[#allocation90_spill] sm:$0xff]  ;;  %v2218_v13 = vld [vmem:[%s2478_s0 + $0x10] sm:$0xff] }
  0xcb   :  { %v947_v8 = vsel %vm923_vm4, %v2771_v37, %v946_v33  ;;  %v928_v20 = vsel %vm927_vm6, %v2772_v40, %v926_v22  ;;  %v941_v56 = vsel %vm925_vm5, %v2774_v42, %v940_v28  ;;  %v2775_v36 = vld [vmem:[#allocation98_spill] sm:$0xff]  ;;  %v2223_v6 = vld [vmem:[%s2478_s0 + $0x18] sm:$0xff]  ;;  %v2776_v18 = vld [vmem:[#allocation83_spill] sm:$0xff] }
  0xcc   :  { %v948_v2 = vsel %vm925_vm5, %v2775_v36, %v947_v8  ;;  %v935_v7 = vsel %vm927_vm6, %v2776_v18, %v934_v25  ;;  %v2777_v44 = vld [vmem:[#allocation91_spill] sm:$0xff]  ;;  %v954_v35 = vsub.f32 %v2200_v60, %v928_v20  ;;  %v2779_v24 = vld [vmem:[#allocation24_spill] sm:$0xff]  ;;  %v2780_v9 = vld [vmem:[#allocation25_spill] sm:$0xff] }
  0xcd   :  { %v942_v62 = vsel %vm927_vm6, %v2777_v44, %v941_v56  ;;  %v2778_v11 = vld [vmem:[#allocation99_spill] sm:$0xff]  ;;  %v955_v33 = vsub.f32 %v2213_v58, %v935_v7  ;;  %v994_v32 = vsel %vm915_vm0, %v2780_v9, %v2779_v24  ;;  %v2781_v28 = vld [vmem:[#allocation26_spill] sm:$0xff]  ;;  %v2782_v8 = vld [vmem:[#allocation36_spill] sm:$0xff] }
  0xce   :  { %v949_v30 = vsel %vm927_vm6, %v2778_v11, %v948_v2  ;;  %v956_v31 = vsub.f32 %v2218_v13, %v942_v62  ;;  %958 = vst [vmem:[%s2479_s2] sm:$0xff] %v954_v35  ;;  %v995_v37 = vsel %vm917_vm1, %v2781_v28, %v994_v32  ;;  %v2783_v40 = vld [vmem:[#allocation37_spill] sm:$0xff]  ;;  %v2784_v41 = vld [vmem:[#allocation48_spill] sm:$0xff]  ;;  %v2788_v18 = vld [vmem:[#allocation27_spill] sm:$0xff] }
  0xcf   :  { %v957_v22 = vsub.f32 %v2223_v6, %v949_v30  ;;  %v1001_v20 = vsel %vm915_vm0, %v2783_v40, %v2782_v8  ;;  %v2785_v25 = vld [vmem:[#allocation49_spill] sm:$0xff]  ;;  %v2786_v56 = vld [vmem:[#allocation60_spill] sm:$0xff]  ;;  %959 = vst [vmem:[%s2479_s2 + $0x8] sm:$0xff] %v955_v33  ;;  %v996_v7 = vsel %vm919_vm2, %v2788_v18, %v995_v37  ;;  %v2789_v44 = vld [vmem:[#allocation38_spill] sm:$0xff] }
  0xd0   :  { %v1008_v42 = vsel %vm915_vm0, %v2785_v25, %v2784_v41  ;;  %v2787_v36 = vld [vmem:[#allocation61_spill] sm:$0xff]  ;;  %960 = vst [vmem:[%s2479_s2 + $0x10] sm:$0xff] %v956_v31  ;;  %v1002_v62 = vsel %vm917_vm1, %v2789_v44, %v1001_v20  ;;  %v2790_v11 = vld [vmem:[#allocation50_spill] sm:$0xff]  ;;  %v2792_v24 = vld [vmem:[#allocation28_spill] sm:$0xff] }
  0xd1   :  { %v1015_v2 = vsel %vm915_vm0, %v2787_v36, %v2786_v56  ;;  %961 = vst [vmem:[%s2479_s2 + $0x18] sm:$0xff] %v957_v22  ;;  %v1009_v30 = vsel %vm917_vm1, %v2790_v11, %v1008_v42  ;;  %v2791_v35 = vld [vmem:[#allocation62_spill] sm:$0xff]  ;;  %v997_v9 = vsel %vm921_vm3, %v2792_v24, %v996_v7  ;;  %v2793_v31 = vld [vmem:[#allocation39_spill] sm:$0xff]  ;;  %v2796_v40 = vld [vmem:[#allocation29_spill] sm:$0xff] }
  0xd2   :  { %v1016_v33 = vsel %vm917_vm1, %v2791_v35, %v1015_v2  ;;  %v1003_v32 = vsel %vm919_vm2, %v2793_v31, %v1002_v62  ;;  %v2794_v28 = vld [vmem:[#allocation51_spill] sm:$0xff]  ;;  %v998_v20 = vsel %vm923_vm4, %v2796_v40, %v997_v9  ;;  %v2797_v41 = vld [vmem:[#allocation40_spill] sm:$0xff]  ;;  %v2800_v18 = vld [vmem:[#allocation30_spill] sm:$0xff] }
  0xd3   :  { %v1010_v22 = vsel %vm919_vm2, %v2794_v28, %v1009_v30  ;;  %v2795_v8 = vld [vmem:[#allocation63_spill] sm:$0xff]  ;;  %v1004_v25 = vsel %vm921_vm3, %v2797_v41, %v1003_v32  ;;  %v2798_v42 = vld [vmem:[#allocation52_spill] sm:$0xff]  ;;  %v999_v7 = vsel %vm925_vm5, %v2800_v18, %v998_v20  ;;  %v2801_v44 = vld [vmem:[#allocation41_spill] sm:$0xff] }
  0xd4   :  { %v1017_v37 = vsel %vm919_vm2, %v2795_v8, %v1016_v33  ;;  %v1011_v56 = vsel %vm921_vm3, %v2798_v42, %v1010_v22  ;;  %v2799_v36 = vld [vmem:[#allocation64_spill] sm:$0xff]  ;;  %v1005_v62 = vsel %vm923_vm4, %v2801_v44, %v1004_v25  ;;  %v2802_v11 = vld [vmem:[#allocation53_spill] sm:$0xff]  ;;  %v2804_v24 = vld [vmem:[#allocation31_spill] sm:$0xff]  ;;  %v2312_v44 = vmul.f32 8.0, %v2200_v60 }
  0xd5   :  { %v1018_v2 = vsel %vm921_vm3, %v2799_v36, %v1017_v37  ;;  %v1012_v30 = vsel %vm923_vm4, %v2802_v11, %v1011_v56  ;;  %v2803_v35 = vld [vmem:[#allocation65_spill] sm:$0xff]  ;;  %v1000_v9 = vsel %vm927_vm6, %v2804_v24, %v999_v7  ;;  %v2805_v31 = vld [vmem:[#allocation42_spill] sm:$0xff]  ;;  %v2808_v40 = vld [vmem:[#allocation43_spill] sm:$0xff]  ;;  %v2321_v11 = vmul.f32 8.0, %v2218_v13 }
  0xd6   :  { %v1019_v33 = vsel %vm923_vm4, %v2803_v35, %v1018_v2  ;;  %v1006_v32 = vsel %vm925_vm5, %v2805_v31, %v1005_v62  ;;  %v2806_v28 = vld [vmem:[#allocation54_spill] sm:$0xff]  ;;  %v2809_v41 = vld [vmem:[#allocation55_spill] sm:$0xff]  ;;  %v1026_v36 = vsub.f32 %v2200_v60, %v1000_v9  ;;  %v2318_v62 = vmul.f32 8.0, %v2213_v58  ;;  %v2813_v9 = vld [vmem:[#allocation20_spill] sm:$0xff] }
  0xd7   :  { %v1013_v22 = vsel %vm925_vm5, %v2806_v28, %v1012_v30  ;;  %v2807_v8 = vld [vmem:[#allocation66_spill] sm:$0xff]  ;;  %v1007_v20 = vsel %vm927_vm6, %v2808_v40, %v1006_v32  ;;  %v2810_v42 = vld [vmem:[#allocation67_spill] sm:$0xff]  ;;  %v2324_v30 = vmul.f32 8.0, %v2223_v6  ;;  %v2814_v32 = vld [vmem:[#allocation32_spill] sm:$0xff] }
  0xd8   :  { %v1020_v37 = vsel %vm925_vm5, %v2807_v8, %v1019_v33  ;;  %v1014_v25 = vsel %vm927_vm6, %v2809_v41, %v1013_v22  ;;  %v1027_v2 = vsub.f32 %v2213_v58, %v1007_v20  ;;  %1030 = vst [vmem:[%s2480_s3] sm:$0xff] %v1026_v36  ;;  %v2811_v35 = vld [vmem:[#allocation19_spill] sm:$0xff]  ;;  %v2812_v33 = vld [vmem:[#allocation2_spill] sm:$0xff]  ;;  %v2816_v8 = vld [vmem:[#allocation44_spill] sm:$0xff]  ;;  %v1091_v20 = vsel %vm915_vm0, %v1913_v48, %v1911_v57 }
  0xd9   :  { %v1021_v56 = vsel %vm927_vm6, %v2810_v42, %v1020_v37  ;;  %v1028_v18 = vsub.f32 %v2218_v13, %v1014_v25  ;;  %v1070_v24 = vsel %vm915_vm0, %v2812_v33, %v2811_v35  ;;  %v2815_v28 = vld [vmem:[#allocation7_spill] sm:$0xff]  ;;  %v2819_v42 = vld [vmem:[#allocation33_spill] sm:$0xff]  ;;  %v2822_v33 = vld [vmem:[#allocation8_spill] sm:$0xff] }
  0xda   :  { %v1029_v7 = vsub.f32 %v2223_v6, %v1021_v56  ;;  %1031 = vst [vmem:[%s2480_s3 + $0x8] sm:$0xff] %v1027_v2  ;;  %v1071_v31 = vsel %vm917_vm1, %v2813_v9, %v1070_v24  ;;  %v1077_v22 = vsel %vm915_vm0, %v2815_v28, %v2814_v32  ;;  %v2817_v37 = vld [vmem:[#allocation11_spill] sm:$0xff]  ;;  %v2820_v36 = vld [vmem:[#allocation45_spill] sm:$0xff]  ;;  %v2823_v9 = vld [vmem:[#allocation12_spill] sm:$0xff] }
  0xdb   :  { %1032 = vst [vmem:[%s2480_s3 + $0x10] sm:$0xff] %v1028_v18  ;;  %v1084_v40 = vsel %vm915_vm0, %v2817_v37, %v2816_v8  ;;  %v2818_v41 = vld [vmem:[#allocation3_spill] sm:$0xff]  ;;  %v1078_v56 = vsel %vm917_vm1, %v2819_v42, %v1077_v22  ;;  %v1092_v18 = vsel %vm917_vm1, %v1915_v54, %v1091_v20  ;;  %v2825_v28 = vld [vmem:[#allocation34_spill] sm:$0xff]  ;;  %v2827_v37 = vld [vmem:[#allocation56_spill] sm:$0xff] }
  0xdc   :  { %1033 = vst [vmem:[%s2480_s3 + $0x18] sm:$0xff] %v1029_v7  ;;  %v1072_v25 = vsel %vm919_vm2, %v2818_v41, %v1071_v31  ;;  %v1085_v2 = vsel %vm917_vm1, %v2820_v36, %v1084_v40  ;;  %v2821_v7 = vld [vmem:[#allocation21_spill] sm:$0xff]  ;;  %v1079_v24 = vsel %vm919_vm2, %v2822_v33, %v1078_v56  ;;  %v1093_v48 = vsel %vm919_vm2, %v1917_v34, %v1092_v18  ;;  %v2824_v31 = vld [vmem:[#allocation4_spill] sm:$0xff]  ;;  %v2826_v8 = vld [vmem:[#allocation46_spill] sm:$0xff] }
  0xdd   :  { %v1073_v35 = vsel %vm921_vm3, %v2821_v7, %v1072_v25  ;;  %v1086_v57 = vsel %vm919_vm2, %v2823_v9, %v1085_v2  ;;  %v1080_v22 = vsel %vm921_vm3, %v2825_v28, %v1079_v24  ;;  %v1094_v40 = vsel %vm921_vm3, %v2827_v37, %v1093_v48  ;;  %v2828_v20 = vld [vmem:[#allocation22_spill] sm:$0xff]  ;;  %v2829_v25 = vld [vmem:[#allocation9_spill] sm:$0xff]  ;;  %v2831_v36 = vld [vmem:[#allocation15_spill] sm:$0xff] }
  0xde   :  { %v1074_v32 = vsel %vm923_vm4, %v2824_v31, %v1073_v35  ;;  %v1087_v54 = vsel %vm921_vm3, %v2826_v8, %v1086_v57  ;;  %v1081_v42 = vsel %vm923_vm4, %v2829_v25, %v1080_v22  ;;  %v2830_v56 = vld [vmem:[#allocation13_spill] sm:$0xff]  ;;  %v1095_v2 = vsel %vm923_vm4, %v2831_v36, %v1094_v40  ;;  %v2832_v18 = vld [vmem:[#allocation23_spill] sm:$0xff]  ;;  %v2836_v31 = vld [vmem:[#allocation10_spill] sm:$0xff] }
  0xdf   :  { %v1075_v41 = vsel %vm925_vm5, %v2828_v20, %v1074_v32  ;;  %v1088_v34 = vsel %vm923_vm4, %v2830_v56, %v1087_v54  ;;  %v2833_v35 = vld [vmem:[#allocation35_spill] sm:$0xff]  ;;  %v2835_v57 = vld [vmem:[#allocation57_spill] sm:$0xff]  ;;  %v2837_v28 = vld [vmem:[#allocation14_spill] sm:$0xff]  ;;  %v1106_v25 = vmul.f32 %v2312_v44, %v2200_v60  ;;  %v1108_v56 = vmul.f32 %v2321_v11, %v2218_v13 }
  0xe0   :  { %v1076_v7 = vsel %vm927_vm6, %v2832_v18, %v1075_v41  ;;  %v1082_v33 = vsel %vm925_vm5, %v2833_v35, %v1081_v42  ;;  %v2834_v24 = vld [vmem:[#allocation47_spill] sm:$0xff]  ;;  %v1096_v48 = vsel %vm925_vm5, %v2835_v57, %v1095_v2  ;;  %v2838_v8 = vld [vmem:[#allocation16_spill] sm:$0xff]  ;;  %v1107_v42 = vmul.f32 %v2318_v62, %v2213_v58 }
  0xe1   :  { %v1089_v9 = vsel %vm925_vm5, %v2834_v24, %v1088_v34  ;;  %v1083_v32 = vsel %vm927_vm6, %v2836_v31, %v1082_v33  ;;  %v1097_v54 = vsel %vm927_vm6, %v2838_v8, %v1096_v48  ;;  %v1102_v37 = vsub.f32 %v2312_v44, %v1076_v7 }
  0xe2   :  { %v1090_v22 = vsel %vm927_vm6, %v2837_v28, %v1089_v9  ;;  %v1103_v40 = vsub.f32 %v2318_v62, %v1083_v32  ;;  %v1105_v41 = vsub.f32 %v2324_v30, %v1097_v54  ;;  %v1109_v34 = vmul.f32 %v2324_v30, %v2223_v6 }
  0xe3   :  { %v1104_v20 = vsub.f32 %v2321_v11, %v1090_v22  ;;  %v1110_v36 = vmul.f32 2.0, %v2200_v60  ;;  %v1111_v2 = vmul.f32 2.0, %v2213_v58  ;;  %v1112_v18 = vmul.f32 2.0, %v2218_v13 }
  0xe4   :  { %v1113_v35 = vmul.f32 2.0, %v2223_v6  ;;  %v1154_v44 = vsel %vm915_vm0, %v2041_v1, %v2039_v23  ;;  %v1161_v11 = vsel %vm915_vm0, %v2073_v61, %v2071_v26  ;;  %v1168_v60 = vsel %vm915_vm0, %v2105_v63, %v2103_v5 }
  0xe5   :  { %v1114_v33 = vmul.f32 %v1110_v36, %v1076_v7  ;;  %v1155_v62 = vsel %vm917_vm1, %v2043_v10, %v1154_v44  ;;  %v1115_v58 = vmul.f32 %v1111_v2, %v1083_v32  ;;  %v1116_v13 = vmul.f32 %v1112_v18, %v1090_v22 }
  0xe6   :  { %v1117_v30 = vmul.f32 %v1113_v35, %v1097_v54  ;;  %v1156_v6 = vsel %vm919_vm2, %v2045_v49, %v1155_v62  ;;  %v1162_v1 = vsel %vm917_vm1, %v2075_v39, %v1161_v11  ;;  %v1169_v10 = vsel %vm917_vm1, %v2107_v59, %v1168_v60 }
  0xe7   :  { %v1118_v24 = vsub.f32 %v1106_v25, %v1114_v33  ;;  %v1157_v23 = vsel %vm921_vm3, %v2047_v38, %v1156_v6  ;;  %v1119_v26 = vsub.f32 %v1107_v42, %v1115_v58  ;;  %v1120_v61 = vsub.f32 %v1108_v56, %v1116_v13 }
  0xe8   :  { %v1121_v7 = vsub.f32 %v1109_v34, %v1117_v30  ;;  %v1158_v5 = vsel %vm923_vm4, %v2049_v52, %v1157_v23  ;;  %v1163_v49 = vsel %vm919_vm2, %v2077_v55, %v1162_v1  ;;  %v1170_v38 = vsel %vm919_vm2, %v2109_v27, %v1169_v10 }
  0xe9   :  { %v1159_v63 = vsel %vm925_vm5, %v2051_v14, %v1158_v5  ;;  %v1175_v39 = vsel %vm915_vm0, %v2137_v46, %v2135_v12  ;;  %v1164_v9 = vsel %vm921_vm3, %v2079_v29, %v1163_v49  ;;  %v1171_v52 = vsel %vm921_vm3, %v2111_v47, %v1170_v38 }
  0xea   :  { %v1160_v59 = vsel %vm927_vm6, %v2053_v21, %v1159_v63  ;;  %v1176_v14 = vsel %vm917_vm1, %v2139_v45, %v1175_v39  ;;  %v1165_v55 = vsel %vm923_vm4, %v2081_v0, %v1164_v9  ;;  %v1172_v27 = vsel %vm923_vm4, %v2113_v3, %v1171_v52 }
  0xeb   :  { %v1177_v12 = vsel %vm919_vm2, %v2141_v16, %v1176_v14  ;;  %v1186_v46 = vadd.f32 %v1160_v59, %v1118_v24  ;;  %v1166_v21 = vsel %vm925_vm5, %v2083_v53, %v1165_v55  ;;  %v1173_v29 = vsel %vm925_vm5, %v2115_v50, %v1172_v27 }
  0xec   :  { %v1178_v47 = vsel %vm921_vm3, %v2143_v43, %v1177_v12  ;;  %v1190_v45 = vadd.f32 %v1103_v40, %v1102_v37  ;;  %v1167_v0 = vsel %vm927_vm6, %v2085_v51, %v1166_v21  ;;  %v1174_v3 = vsel %vm927_vm6, %v2117_v4, %v1173_v29 }
  0xed   :  { %v1179_v16 = vsel %vm923_vm4, %v2145_v19, %v1178_v47  ;;  %v1187_v53 = vadd.f32 %v1167_v0, %v1119_v26  ;;  %v1188_v48 = vadd.f32 %v1174_v3, %v1120_v61 }
  0xee   :  { %v1180_v57 = vsel %vm925_vm5, %v2147_v17, %v1179_v16  ;;  %v1191_v31 = vadd.f32 %v1190_v45, %v1104_v20 }
  0xef   :  { %v1181_v50 = vsel %vm927_vm6, %v2149_v15, %v1180_v57  ;;  %v1200_v28 = vadd.f32 %v1187_v53, %v1186_v46 }
  0xf0   :  { %v1189_v43 = vadd.f32 %v1181_v50, %v1121_v7  ;;  %v1192_v32 = vadd.f32 %v1191_v31, %v1105_v41 }
  0xf1   :  { %v1201_v51 = vadd.f32 %v1200_v28, %v1188_v48 }
  0xf2   :  { %v1193_v22 = vrot.slane %v1192_v32, 4 }
  0xf3   :  { %v1202_v54 = vadd.f32 %v1201_v51, %v1189_v43 }
  0xf4   :  { %v1194_v8 = vadd.f32 %v1193_v22, %v1192_v32 }
  0xf5   :  { %v1203_v37 = vrot.slane %v1202_v54, 4 }
  0xf6   :  { %v1195_v4 = vrot.slane %v1194_v8, 2 }
  0xf7   :  { %v1204_v19 = vadd.f32 %v1203_v37, %v1202_v54 }
  0xf8   :  { %v1196_v40 = vadd.f32 %v1195_v4, %v1194_v8 }
  0xf9   :  { %v1205_v42 = vrot.slane %v1204_v19, 2 }
  0xfa   :  { %v1197_v25 = vrot.slane %v1196_v40, 1 }
  0xfb   :  { %v1206_v56 = vadd.f32 %v1205_v42, %v1204_v19 }
  0xfc   :  { %v1198_v17 = vadd.f32 %v1197_v25, %v1196_v40 }
  0xfd   :  { %v1207_v15 = vrot.slane %v1206_v56, 1 }
  0xfe   :  { %1199 = vst [vmem:[%s2481_s4] sm:$0x1] %v1198_v17 }
  0xff   :  { %v1208_v20 = vadd.f32 %v1207_v15, %v1206_v56 }
 0x101   :  { %1209 = vst [vmem:[%s2482_s5] sm:$0x1] %v1208_v20 }

// kernel: nm_block_forward.18
= control target key start
LH: loop header
LB: loop body
LE: loop exit
PB: predicated region body
PF: predicated region fallthrough
CT: control target
= control target key end

     0   :  { %s863_s24 = smov 0   ;;  %s865_s25 = smov 0   ;;  %s946_s0 = inlined_call_operand.vmem [shape: f32[2,16,128], index: 0, kind: input, shape index: {}]   ;;  %s947_s1 = inlined_call_operand.vmem [shape: f32[2,1,128], index: 1, kind: input, shape index: {}]   ;;  %s948_s2 = inlined_call_operand.vmem [shape: f32[2,1,128], index: 2, kind: input, shape index: {}]   ;;  %s949_s3 = inlined_call_operand.vmem [shape: bf16[128,128], index: 3, kind: input, shape index: {}]   ;;  %s950_s4 = inlined_call_operand.vmem [shape: f32[1,128], index: 4, kind: input, shape index: {}]   ;;  %s951_s5 = inlined_call_operand.vmem [shape: f32[2,16,128], index: 5, kind: output, shape index: {0}]   ;;  %s952_s6 = inlined_call_operand.vmem [shape: f32[2,1,1,128], index: 6, kind: output, shape index: {1}]   ;;  %s953_s7 = inlined_call_operand.vmem [shape: f32[2,1,1,128], index: 7, kind: output, shape index: {2}]  }
   0x1   :  { %s867_s26 = smov 0  }
   0x2 LB: > { %s30_s27 = sadd.s32 1, %s815_s25  ;;  %p714_p0 = scmp.ge.s32.totalorder %s819_s26, 1  ;;  %s819_s26 = sphi %s867_s26, %s18_s26   ;;  %s815_s25 = sphi %s865_s25, %s955_s25   ;;  %s811_s24 = sphi %s863_s24, %s954_s24  }
   0x3   : > { %p32_p1 = scmp.ge.s32.totalorder %s30_s27, 2  ;;  %p283_p2 = scmp.lt.s32.totalorder %s819_s26, 3 }
   0x5   : > { %s957_s27 = smov (%p32_p1, %s30_s27), 0  ;;  %p284_p3 = pnand %p714_p0, %p283_p2 }
   0x6   : > { %p342_p4 = scmp.lt.s32.totalorder (!%p284_p3), %s811_s24, 1 }
   0x7   : > { %287 = sbr.rel (%p284_p3) target bundleno = 261 (0x105), region = 40 }
   0xc   : > { %v789_v0 = vld [vmem:[%s949_s3 + $0x38] sm:$0xff]   ;;  %v821_v1 = vmov 0.0   ;;  %v790_v2 = vld [vmem:[%s949_s3 + $0x30] sm:$0xff]   ;;  %vm822_vm0 = vmmov 0   ;;  %s959_s24 = smov (!%p342_p4, %s811_s24), 1  ;;  %v791_v3 = vld [vmem:[%s949_s3 + $0x28] sm:$0xff]  }
   0xd   : > { %743 = vmatprep.subr.bf16.mxu0 %v821_v1  ;;  %759 = vmatprep.mubr.msk.bf16.mxu0 %vm822_vm0, %v821_v1  ;;  %s732_s11 = sshll.u32 %s959_s24, 4  ;;  %v792_v4 = vld [vmem:[%s949_s3 + $0x20] sm:$0xff]   ;;  %s353_s19 = scalar_lea.vmem %s947_s1, %s959_s24  ;;  %v793_v5 = vld [vmem:[%s949_s3 + $0x18] sm:$0xff]   ;;  %v794_v11 = vld [vmem:[%s949_s3 + $0x10] sm:$0xff]  }
   0xe   : > { %744 = vmatpush3.bf16.msra.mxu0 %v789_v0  ;;  %s349_s16 = scalar_lea.vmem %s946_s0, %s732_s11  ;;  %v719_v8 = vld [vmem:[%s353_s19] ss:$0 sm:$0xff]  ;;  %s356_s28 = scalar_lea.vmem %s948_s2, %s959_s24  ;;  %v795_v15 = vld [vmem:[%s949_s3 + $0x8] sm:$0xff]  }
   0xf   : > { %745 = vmatprep.subr.bf16.mxu0 %v821_v1  ;;  %v380_v6 = vld [vmem:[%s349_s16] sm:$0xff]  ;;  %v381_v7 = vld [vmem:[%s349_s16 + $0x8] sm:$0xff]  ;;  %s365_s17 = scalar_lea.vmem %s951_s5, %s732_s11  ;;  %s372_s19 = scalar_lea.vmem %s952_s6, %s959_s24 }
  0x10   : > { %v389_v9 = vmul.f32 %v719_v8, %v380_v6  ;;  %v390_v10 = vmul.f32 %v719_v8, %v381_v7  ;;  %v720_v12 = vld [vmem:[%s356_s28] ss:$0 sm:$0xff]  ;;  %s378_s22 = scalar_lea.vmem %s953_s7, %s959_s24 }
  0x11   : > { %v796_v18 = vld [vmem:[%s949_s3] sm:$0xff]  }
  0x12   : > { %746 = vmatpush3.bf16.msra.mxu0 %v790_v2  ;;  %v398_v13 = vadd.f32 %v720_v12, %v389_v9  ;;  %v399_v14 = vadd.f32 %v720_v12, %v390_v10  ;;  %v721_v20 = vld [vmem:[%s950_s4] ss:$0 sm:$0xff] }
  0x13   : > { %747 = vmatprep.subr.bf16.mxu0 %v821_v1 }
  0x14   : > { %v400_v16 = vmax.f32 %v398_v13, 0.0  ;;  %v401_v17 = vmax.f32 %v399_v14, 0.0 }
  0x16   : > { %748 = vmatpush3.bf16.msra.mxu0 %v791_v3  ;;  %v402_v19 = vpack.c.bf16 %v401_v17, %v400_v16 }
  0x17   : > { %749 = vmatprep.subr.bf16.mxu0 %v821_v1 }
  0x1a   : > { %750 = vmatpush3.bf16.msra.mxu0 %v792_v4 }
  0x1b   : > { %751 = vmatprep.subr.bf16.mxu0 %v821_v1 }
  0x1e   : > { %752 = vmatpush3.bf16.msra.mxu0 %v793_v5 }
  0x1f   : > { %753 = vmatprep.subr.bf16.mxu0 %v821_v1 }
  0x22   : > { %754 = vmatpush3.bf16.msra.mxu0 %v794_v11 }
  0x23   : > { %755 = vmatprep.subr.bf16.mxu0 %v821_v1 }
  0x26   : > { %756 = vmatpush3.bf16.msra.mxu0 %v795_v15 }
  0x27   : > { %757 = vmatprep.subr.bf16.mxu0 %v821_v1 }
  0x2a   : > { %758 = vmatpush3.bf16.msra.mxu0 %v796_v18 }
  0x2d   : > { %760 = vmatmul.mubr.bf16.vlgmr.msra.gmra.mxu0 %v402_v19 }
  0xed   : > { %v508_v21 = vpop.f32.mrf.mxu0 }
  0xee   : > { %v509_v22 = vadd.f32 %v721_v20, %v508_v21 }
  0xef   : > { %v761_v23 = vpop.f32.mrf.mxu0 }
  0xf0   : > { %515 = vst [vmem:[%s365_s17] sm:$0xff] %v509_v22  ;;  %v525_v27 = vmul.f32 %v509_v22, %v509_v22 }
  0xf1   : > { %v511_v24 = vpop.f32.mrf.mxu0 }
  0xf2   : > { %v512_v25 = vadd.f32 %v721_v20, %v511_v24 }
  0xf3   : > { %v762_v26 = vpop.f32.mrf.mxu0 }
  0xf4   : > { %516 = vst [vmem:[%s365_s17 + $0x8] sm:$0xff] %v512_v25  ;;  %v517_v28 = vadd.f32 %v512_v25, %v509_v22  ;;  %v526_v29 = vmul.f32 %v512_v25, %v512_v25 }
  0xf6   : > { %v518_v30 = vrot.slane %v517_v28, 4  ;;  %v527_v31 = vadd.f32 %v526_v29, %v525_v27 }
  0xf8   : > { %v519_v32 = vadd.f32 %v518_v30, %v517_v28  ;;  %v528_v33 = vrot.slane %v527_v31, 4 }
  0xfa   : > { %v520_v34 = vrot.slane %v519_v32, 2  ;;  %v529_v35 = vadd.f32 %v528_v33, %v527_v31 }
  0xfc   : > { %v521_v36 = vadd.f32 %v520_v34, %v519_v32  ;;  %v530_v37 = vrot.slane %v529_v35, 2 }
  0xfe   : > { %v522_v38 = vrot.slane %v521_v36, 1  ;;  %v531_v39 = vadd.f32 %v530_v37, %v529_v35 }
 0x100   : > { %v523_v40 = vadd.f32 %v522_v38, %v521_v36  ;;  %v532_v41 = vrot.slane %v531_v39, 1 }
 0x102   : > { %524 = vst [vmem:[%s372_s19] sm:$0x1] %v523_v40  ;;  %v533_v42 = vadd.f32 %v532_v41, %v531_v39 }
 0x104   : > { %534 = vst [vmem:[%s378_s22] sm:$0x1] %v533_v42 }
 0x105 PF: > { %s18_s26 = sadd.s32 1, %s819_s26   ;;  %s954_s24 = smov %s815_s25 }
 0x106   : > { %p15_p5 = scmp.ge.s32.totalorder %s18_s26, 4   ;;  %s955_s25 = smov %s957_s27 }
 0x108   :  { %17 = sbr.rel (!%p15_p5) target bundleno = 2 (0x2), region = 100 }

// kernel: nm_block_forward.19
= control target key start
LH: loop header
LB: loop body
LE: loop exit
PB: predicated region body
PF: predicated region fallthrough
CT: control target
= control target key end

     0   :  { %s1066_s30 = smov 0   ;;  %s1068_s10 = smov 0   ;;  %s1157_s0 = inlined_call_operand.vmem [shape: f32[2,16,128], index: 0, kind: input, shape index: {}]   ;;  %s1158_s1 = inlined_call_operand.vmem [shape: f32[2,1,128], index: 1, kind: input, shape index: {}]   ;;  %s1159_s2 = inlined_call_operand.vmem [shape: f32[2,1,128], index: 2, kind: input, shape index: {}]   ;;  %s1160_s3 = inlined_call_operand.vmem [shape: f32[2,16,128], index: 3, kind: input, shape index: {}]   ;;  %s1161_s4 = inlined_call_operand.vmem [shape: bf16[128,128], index: 4, kind: input, shape index: {}]   ;;  %s1162_s5 = inlined_call_operand.vmem [shape: f32[1,128], index: 5, kind: input, shape index: {}]   ;;  %s1163_s6 = inlined_call_operand.vmem [shape: f32[2,16,128], index: 6, kind: output, shape index: {0}]   ;;  %s1164_s7 = inlined_call_operand.vmem [shape: f32[2,16,128], index: 7, kind: output, shape index: {1}]   ;;  %s1165_s8 = inlined_call_operand.vmem [shape: f32[2,1,1,128], index: 8, kind: output, shape index: {2}]   ;;  %s1166_s9 = inlined_call_operand.vmem [shape: f32[2,1,1,128], index: 9, kind: output, shape index: {3}]  }
   0x1   :  { %s1070_s11 = smov 0  }
   0x2 LB: > { %s32_s12 = sadd.s32 1, %s1008_s10  ;;  %p901_p0 = scmp.ge.s32.totalorder %s1012_s11, 1  ;;  %s1012_s11 = sphi %s1070_s11, %s20_s11   ;;  %s1008_s10 = sphi %s1068_s10, %s1168_s10   ;;  %s1004_s30 = sphi %s1066_s30, %s1167_s30  }
   0x3   : > { %p34_p1 = scmp.ge.s32.totalorder %s32_s12, 2  ;;  %p354_p2 = scmp.lt.s32.totalorder %s1012_s11, 3 }
   0x5   : > { %s1170_s12 = smov (%p34_p1, %s32_s12), 0  ;;  %p355_p3 = pnand %p901_p0, %p354_p2 }
   0x6   : > { %p435_p4 = scmp.lt.s32.totalorder (!%p355_p3), %s1004_s30, 1 }
   0x7   : > { %358 = sbr.rel (%p355_p3) target bundleno = 261 (0x105), region = 44 }
   0xc   : > { %v982_v0 = vld [vmem:[%s1161_s4 + $0x38] sm:$0xff]   ;;  %v1014_v1 = vmov 0.0   ;;  %v983_v2 = vld [vmem:[%s1161_s4 + $0x30] sm:$0xff]   ;;  %vm1015_vm0 = vmmov 0   ;;  %s1172_s30 = smov (!%p435_p4, %s1004_s30), 1  ;;  %v984_v3 = vld [vmem:[%s1161_s4 + $0x28] sm:$0xff]  }
   0xd   : > { %936 = vmatprep.subr.bf16.mxu0 %v1014_v1  ;;  %952 = vmatprep.mubr.msk.bf16.mxu0 %vm1015_vm0, %v1014_v1  ;;  %s1096_s19 = sshll.u32 %s1172_s30, 4  ;;  %s446_s22 = scalar_lea.vmem %s1158_s1, %s1172_s30  ;;  %v985_v10 = vld [vmem:[%s1161_s4 + $0x20] sm:$0xff]   ;;  %v986_v17 = vld [vmem:[%s1161_s4 + $0x18] sm:$0xff]   ;;  %v987_v20 = vld [vmem:[%s1161_s4 + $0x10] sm:$0xff]  }
   0xe   : > { %937 = vmatpush3.bf16.msra.mxu0 %v982_v0  ;;  %s442_s25 = scalar_lea.vmem %s1157_s0, %s1096_s19  ;;  %s449_s28 = scalar_lea.vmem %s1159_s2, %s1172_s30  ;;  %v910_v6 = vld [vmem:[%s446_s22] ss:$0 sm:$0xff]  ;;  %v988_v21 = vld [vmem:[%s1161_s4 + $0x8] sm:$0xff]  }
   0xf   : > { %938 = vmatprep.subr.bf16.mxu0 %v1014_v1  ;;  %s458_s14 = scalar_lea.vmem %s1160_s3, %s1096_s19  ;;  %v493_v4 = vld [vmem:[%s442_s25] sm:$0xff]  ;;  %v494_v5 = vld [vmem:[%s442_s25 + $0x8] sm:$0xff]  ;;  %s468_s22 = scalar_lea.vmem %s1163_s6, %s1096_s19 }
  0x10   : > { %v502_v7 = vmul.f32 %v910_v6, %v493_v4  ;;  %v503_v8 = vmul.f32 %v910_v6, %v494_v5  ;;  %v911_v9 = vld [vmem:[%s449_s28] ss:$0 sm:$0xff]  ;;  %v514_v12 = vld [vmem:[%s458_s14 + $0x8] sm:$0xff]  ;;  %s478_s16 = scalar_lea.vmem %s1164_s7, %s1096_s19  ;;  %s485_s18 = scalar_lea.vmem %s1165_s8, %s1172_s30 }
  0x11   : > { %v513_v11 = vld [vmem:[%s458_s14] sm:$0xff] }
  0x12   : > { %939 = vmatpush3.bf16.msra.mxu0 %v983_v2  ;;  %v511_v13 = vadd.f32 %v911_v9, %v502_v7  ;;  %v512_v14 = vadd.f32 %v911_v9, %v503_v8  ;;  %v989_v22 = vld [vmem:[%s1161_s4] sm:$0xff]  }
  0x13   : > { %940 = vmatprep.subr.bf16.mxu0 %v1014_v1  ;;  %v912_v24 = vld [vmem:[%s1162_s5] ss:$0 sm:$0xff] }
  0x14   : > { %v515_v15 = vadd.f32 %v513_v11, %v511_v13  ;;  %v516_v16 = vadd.f32 %v514_v12, %v512_v14 }
  0x16   : > { %941 = vmatpush3.bf16.msra.mxu0 %v984_v3  ;;  %v517_v18 = vmax.f32 %v515_v15, 0.0  ;;  %v518_v19 = vmax.f32 %v516_v16, 0.0 }
  0x17   : > { %942 = vmatprep.subr.bf16.mxu0 %v1014_v1 }
  0x18   : > { %519 = vst [vmem:[%s468_s22] sm:$0xff] %v517_v18  ;;  %520 = vst [vmem:[%s468_s22 + $0x8] sm:$0xff] %v518_v19  ;;  %v521_v23 = vpack.c.bf16 %v518_v19, %v517_v18  ;;  %s491_s22 = scalar_lea.vmem %s1166_s9, %s1172_s30 }
  0x1a   : > { %943 = vmatpush3.bf16.msra.mxu0 %v985_v10 }
  0x1b   : > { %944 = vmatprep.subr.bf16.mxu0 %v1014_v1 }
  0x1e   : > { %945 = vmatpush3.bf16.msra.mxu0 %v986_v17 }
  0x1f   : > { %946 = vmatprep.subr.bf16.mxu0 %v1014_v1 }
  0x22   : > { %947 = vmatpush3.bf16.msra.mxu0 %v987_v20 }
  0x23   : > { %948 = vmatprep.subr.bf16.mxu0 %v1014_v1 }
  0x26   : > { %949 = vmatpush3.bf16.msra.mxu0 %v988_v21 }
  0x27   : > { %950 = vmatprep.subr.bf16.mxu0 %v1014_v1 }
  0x2a   : > { %951 = vmatpush3.bf16.msra.mxu0 %v989_v22 }
  0x2d   : > { %953 = vmatmul.mubr.bf16.vlgmr.msra.gmra.mxu0 %v521_v23 }
  0xed   : > { %v627_v25 = vpop.f32.mrf.mxu0 }
  0xee   : > { %v628_v26 = vadd.f32 %v912_v24, %v627_v25 }
  0xef   : > { %v954_v27 = vpop.f32.mrf.mxu0 }
  0xf0   : > { %634 = vst [vmem:[%s478_s16] sm:$0xff] %v628_v26  ;;  %v644_v31 = vmul.f32 %v628_v26, %v628_v26 }
  0xf1   : > { %v630_v28 = vpop.f32.mrf.mxu0 }
  0xf2   : > { %v631_v29 = vadd.f32 %v912_v24, %v630_v28 }
  0xf3   : > { %v955_v30 = vpop.f32.mrf.mxu0 }
  0xf4   : > { %635 = vst [vmem:[%s478_s16 + $0x8] sm:$0xff] %v631_v29  ;;  %v636_v32 = vadd.f32 %v631_v29, %v628_v26  ;;  %v645_v33 = vmul.f32 %v631_v29, %v631_v29 }
  0xf6   : > { %v637_v34 = vrot.slane %v636_v32, 4  ;;  %v646_v35 = vadd.f32 %v645_v33, %v644_v31 }
  0xf8   : > { %v638_v36 = vadd.f32 %v637_v34, %v636_v32  ;;  %v647_v37 = vrot.slane %v646_v35, 4 }
  0xfa   : > { %v639_v38 = vrot.slane %v638_v36, 2  ;;  %v648_v39 = vadd.f32 %v647_v37, %v646_v35 }
  0xfc   : > { %v640_v40 = vadd.f32 %v639_v38, %v638_v36  ;;  %v649_v41 = vrot.slane %v648_v39, 2 }
  0xfe   : > { %v641_v42 = vrot.slane %v640_v40, 1  ;;  %v650_v43 = vadd.f32 %v649_v41, %v648_v39 }
 0x100   : > { %v642_v44 = vadd.f32 %v641_v42, %v640_v40  ;;  %v651_v45 = vrot.slane %v650_v43, 1 }
 0x102   : > { %643 = vst [vmem:[%s485_s18] sm:$0x1] %v642_v44  ;;  %v652_v46 = vadd.f32 %v651_v45, %v650_v43 }
 0x104   : > { %653 = vst [vmem:[%s491_s22] sm:$0x1] %v652_v46 }
 0x105 PF: > { %s20_s11 = sadd.s32 1, %s1012_s11   ;;  %s1167_s30 = smov %s1008_s10 }
 0x106   : > { %p17_p5 = scmp.ge.s32.totalorder %s20_s11, 4   ;;  %s1168_s10 = smov %s1170_s12 }
 0x108   :  { %19 = sbr.rel (!%p17_p5) target bundleno = 2 (0x2), region = 119 }

// kernel: nm_block_forward.25
= control target key start
LH: loop header
LB: loop body
LE: loop exit
PB: predicated region body
PF: predicated region fallthrough
CT: control target
= control target key end

     0   :  { %s896_s0 = inlined_call_operand.vmem [shape: f32[2,16,128], index: 0, kind: input, shape index: {}]   ;;  %s897_s1 = inlined_call_operand.vmem [shape: f32[2,1,128], index: 1, kind: input, shape index: {}]   ;;  %s898_s2 = inlined_call_operand.vmem [shape: f32[2,1,128], index: 2, kind: input, shape index: {}]   ;;  %s899_s3 = inlined_call_operand.vmem [shape: f32[2,16,128], index: 3, kind: input, shape index: {}]   ;;  %s900_s4 = inlined_call_operand.vmem [shape: f32[1,128], index: 4, kind: input, shape index: {}]   ;;  %s901_s5 = inlined_call_operand.<no memory space> [shape: f32[1,1], index: 5, kind: input, shape index: {}]   ;;  %s902_s6 = inlined_call_operand.hbm [shape: f32[2,1,16], index: 6, kind: output, shape index: {}]  }
   0x1   :  { %v11_v0 = vstv %s901_s5 }
   0x2   :  { %12 = vst [vmem:[#allocation2] sm:$0x1] %v11_v0 }
   0x3   :  { %13 = vsyncpa [#allocation4], 0 }
   0x4   :  { %15 = vsyncpa [#allocation4 + $0x1], 0  ;;  %s779_s23 = smov 0   ;;  %s781_s24 = smov 0  }
   0x5   :  { %s783_s25 = smov 0   ;;  %s785_s26 = smov 0  }
   0x6   :  { %s787_s27 = smov 0   ;;  %s789_s28 = smov 0  }
   0x7 LB: > { %s574_s5 = sadd.s32 4294967295, %s735_s28   ;;  %s575_s29 = sadd.s32 4294967294, %s735_s28   ;;  %s735_s28 = sphi %s789_s28, %s21_s28   ;;  %s731_s27 = sphi %s787_s27, %s909_s27   ;;  %s727_s26 = sphi %s785_s26, %s908_s26   ;;  %s723_s25 = sphi %s783_s25, %s907_s25   ;;  %s719_s24 = sphi %s781_s24, %s906_s24   ;;  %s715_s23 = sphi %s779_s23, %s905_s23  }
   0x8   : > { %s33_s30 = sadd.s32 1, %s731_s27  ;;  %s192_s7 = sadd.s32 1, %s723_s25 }
   0x9   : > { %p35_p0 = scmp.ge.s32.totalorder %s33_s30, 2  ;;  %p202_p1 = scmp.ne.s32.totalorder %s723_s25, %s719_s24 }
   0xa   : > { %p203_p2 = scmp.eq.s32.totalorder %s574_s5, 1  ;;  %p208_p3 = scmp.ne.s32.totalorder %s719_s24, %s715_s23 }
   0xb   : > { %s911_s30 = smov (%p35_p0, %s33_s30), 0  ;;  %p209_p5 = scmp.eq.s32.totalorder %s575_s29, 1 }
   0xc   : > { %p819_p4 = por %p203_p2, %p202_p1  ;;  %s187_s9 = ssub.s32 %s731_s27, %s911_s30 }
   0xd   : > { %p578_p6 = scmp.ge.s32.totalorder %s735_s28, 1  ;;  %p190_p7 = scmp.eq.s32.totalorder %s187_s9, 0 }
   0xe   : > { %p826_p8 = por %p209_p5, %p208_p3  ;;  %p271_p9 = scmp.lt.s32.totalorder %s735_s28, 3 }
   0xf   : > { %s832_s11 = scalar_select %p190_p7, %s723_s25, %s192_s7  }
  0x10   : > { %p272_p10 = pnand %p578_p6, %p271_p9 }
  0x11   : > { %p320_p11 = scmp.lt.s32.totalorder (!%p272_p10), %s727_s26, 1  ;;  %s585_s14 = sshll.u32 (!%p272_p10), %s727_s26, 4 }
  0x12   : > { %275 = sbr.rel (%p272_p10) target bundleno = 251 (0xfb), region = 44 }
  0x17   : > { %v737_v1 = vmov 0.0   ;;  %vm738_vm0 = vmmov 0   ;;  %v372_v2 = vld [vmem:[#allocation2] sm:$0x1]  ;;  %s321_s12 = scalar_select %p320_p11, %s727_s26, 1  ;;  %v739_v3 = vmov 0   ;;  %v378_v19 = vlaneseq }
  0x18   : > { %593 = vmatprep.subr.mxu0 %v737_v1  ;;  %597 = vmatprep.mubr.msk.f32.mxu0 %vm738_vm0, %v737_v1  ;;  %v371_v18 = vld [vmem:[%s900_s4] sm:$0x1]  ;;  %vm452_vm1 = vcmask 122880   ;;  %s740_s26 = smov [#allocation3]  }
  0x19   : > { %658 = vset.pattern.permute.xlu0 %v739_v3  ;;  %s588_s13 = sshll.u32 %s321_s12, 4  ;;  %s331_s16 = scalar_lea.vmem %s897_s1, %s321_s12  ;;  %v379_v20 = vshrl.u32 %v378_v19, 7 }
  0x1a   : > { %375 = vperm.xlu0 %658, %v372_v2   ;;  %s327_s19 = scalar_lea.vmem %s896_s0, %s588_s13  ;;  %s334_s22 = scalar_lea.vmem %s898_s2, %s321_s12  ;;  %v583_v4 = vld [vmem:[%s331_s16] ss:$0 sm:$0xff] }
  0x1b   : > { %s343_s7 = scalar_lea.vmem %s899_s3, %s588_s13  ;;  %v345_v5 = vld [vmem:[%s327_s19] sm:$0xff]  ;;  %v346_v6 = vld [vmem:[%s327_s19 + $0x8] sm:$0xff]  ;;  %s317_s13 = sand.u32 1, %s719_s24   ;;  %v380_v21 = vsub.s32 0, %v379_v20 }
  0x1c   : > { %v584_v7 = vld [vmem:[%s334_s22] ss:$0 sm:$0xff]  ;;  %v354_v8 = vmul.f32 %v583_v4, %v345_v5  ;;  %v355_v9 = vmul.f32 %v583_v4, %v346_v6  ;;  %v366_v11 = vld [vmem:[%s343_s7 + $0x8] sm:$0xff]  ;;  %s318_s15 = scalar_lea.vmem [#allocation3], %s317_s13  ;;  %s856_s19 = scalar_lea.hbm %s902_s6, %s585_s14 }
  0x1d   : > { %v365_v10 = vld [vmem:[%s343_s7] sm:$0xff]  ;;  %s468_s16 = sshll.u32 %s318_s15, 4  ;;  %s455_s20 = scalar_lea.sflag [#allocation4], %s317_s13  ;;  %s469_s16 = int_to_ptr.vmem [resolvable:$true] %s468_s16 }
  0x1e   : > { %v363_v12 = vadd.f32 %v584_v7, %v354_v8  ;;  %v364_v13 = vadd.f32 %v584_v7, %v355_v9  ;;  %s659_s21 = scalar_lea.vmem %s469_s16, 16  ;;  %s663_s22 = sshll.u32 %s740_s26, 4  ;;  %s664_s22 = int_to_ptr.vmem [resolvable:$false] %s663_s22 }
  0x1f   : > { %p660_p12 = scmp.ne.s32.totalorder %s469_s16, %s659_s21  ;;  %s665_s5 = scalar_lea.vmem %s664_s22, 32 }
  0x20   : > { %v368_v14 = vadd.f32 %v366_v11, %v364_v13  ;;  %v367_v15 = vadd.f32 %v365_v10, %v363_v12  ;;  %p666_p1 = scmp.lt.s32.totalorder %s469_s16, %s664_s22  ;;  %p667_p2 = scmp.lt.s32.totalorder %s665_s5, %s659_s21 }
  0x21   : > { %p661_p13 = pnand %p660_p12, %p819_p4 }
  0x22   : > { %v370_v16 = vmax.f32 %v368_v14, 0.0  ;;  %v369_v17 = vmax.f32 %v367_v15, 0.0  ;;  %p668_p3 = por %p667_p2, %p666_p1 }
  0x23   : > { %p662_p0 = pneg %p661_p13 }
  0x24   : > { %594 = vmatpush3.xpose.msra.mxu0 %v370_v16 }
  0x25   : > { %595 = vmatprep.subr.mxu0 %v737_v1  ;;  %p669_p5 = pnand %p668_p3, %p662_p0 }
  0x28   : > { %596 = vmatpush3.xpose.msra.mxu0 %v369_v17 }
  0x2b   : > { %598 = vmatmul.mubr.f32.vlgmr.msra.gmra.mxu0 %v371_v18 }
  0x95   : > { %v376_v22 = vpop.permute.xlu0 %375 }
  0x96   : > { %v381_v23 = vrot.slane %v376_v22, %v380_v21 }
  0xeb   : > { %v448_v24 = vpop.f32.mrf.mxu0 }
  0xec   : > { %v449_v25 = vadd.f32 %v448_v24, %v381_v23 }
  0xed   : > { %v599_v26 = vpop.f32.mrf.mxu0 }
  0xee   : > { %453 = vst.msk [vmem:[%s318_s15] sm:$0x1] %vm452_vm1, %v449_v25 }
  0xef   : > { %672 = shalt.err (!%p669_p5)
}
  0xf0   : > { %s673_s29 = scalar_lea.hbm %s856_s19, 16  ;;  %s677_s12 = scalar_lea.hbm %s902_s6, 32 }
  0xf1   : > { %p674_p6 = scmp.ne.s32.totalorder %s856_s19, %s673_s29  ;;  %p678_p10 = scmp.lt.s32.totalorder %s856_s19, %s902_s6 }
  0xf2   : > { %p679_p11 = scmp.lt.s32.totalorder %s677_s12, %s673_s29 }
  0xf3   : > { %p675_p7 = pnand %p674_p6, %p819_p4 }
  0xf4   : > { %p680_p12 = por %p679_p11, %p678_p10 }
  0xf5   : > { %p676_p9 = pneg %p675_p7 }
  0xf7   : > { %p681_p13 = pnand %p680_p12, %p676_p9 }
  0xf9   : > { %684 = shalt.err (!%p681_p13)
}
  0xfa   : > { %600 = dma.vmem_to_hbm [thread:$0]  (%p819_p4), %s469_s16, 16, %s856_s19, %s455_s20  }
  0xfb PF: > { %p606_p0 = scmp.ge.s32.totalorder %s735_s28, 2  ;;  %s480_s15 = sand.u32 1, %s715_s23  }
  0xfc   : > { %s481_s17 = scalar_lea.sflag [#allocation4], %s480_s15 }
  0xfd   : > { %p603_p1 = pnand %p606_p0, %p826_p8 }
  0xff   : > { %p604_p2 = pneg %p603_p1 }
 0x101   : > { %710 = dma.done.wait (%p604_p2), %s481_s17, 16  }
 0x102   : > { %712 = vsyncadd (%p604_p2), %s481_s17, 4294967280  ;;  %s21_s28 = sadd.s32 1, %s735_s28   ;;  %s905_s23 = smov %s719_s24 }
 0x103   : > { %p18_p3 = scmp.ge.s32.totalorder %s21_s28, 4   ;;  %s906_s24 = smov %s723_s25 }
 0x104   : > { %s907_s25 = smov %s832_s11  ;;  %s908_s26 = smov %s731_s27 }
 0x105   : > { %s909_s27 = smov %s911_s30  ;;  %20 = sbr.rel (!%p18_p3) target bundleno = 7 (0x7), region = 88 }
 0x10a   :  { %485 = vsyncpa [#allocation4], 1 }
 0x10b   :  { %487 = vsyncpa [#allocation4 + $0x1], 1 }

</bundles_post_ra>
